<compile_context>
chip_gen: v5e
topology: v5e:2x2
jax: 0.10.0
libtpu: 0.0.40
codegen_flags: <defaults>
</compile_context>

<pallas_src>
import functools

import jax
import jax.numpy as jnp
from jax import lax
from jax.experimental import pallas as pl
from jax.experimental.pallas import tpu as pltpu

DILATIONS = (1, 2, 4)


# ----------------------------------------------------------------------------
# Fused Pallas kernel (one grid step = one (batch, row-tile) block)
# ----------------------------------------------------------------------------
def _desnow_kernel(xpad_ref, xflat_ref, wpyr_ref, bpyr_ref,
                   whead_ref, bhead_ref, wr2_ref, br2_ref,
                   ysf_ref, yhat_ref, z_ref,
                   fc_t,                       # VMEM scratch: (fc_ch, TH*W)
                   *, W, TH, Cin, hidden, dilations, max_d):
    t = pl.program_id(1)
    r0 = t * TH                                # first output row of this tile
    thw = TH * W

    # ---- dilation pyramid -> fc^T kept in VMEM (channels on sublanes) -------
    for di, d in enumerate(dilations):
        taps = []
        for kh in range(3):
            for kw in range(3):
                dh = max_d + d * (kh - 1)      # offset inside max_d-padded input
                dw = max_d + d * (kw - 1)
                taps.append(xpad_ref[0, pl.ds(r0 + dh, TH), dw:dw + W, :])
        # im2col: one K = 9*Cin matmul per dilation (instead of 9 K=Cin matmuls)
        patch = jnp.concatenate(taps, axis=-1).reshape(thw, 9 * Cin)
        feat = jnp.dot(patch, wpyr_ref[di],
                       preferred_element_type=jnp.float32) + bpyr_ref[di]
        feat = jnp.maximum(feat, 0.0)
        fc_t[di * hidden:(di + 1) * hidden, :] = feat.T      # (hidden, TH*W)

    # ---- fused 1x1 heads: rows = [ z (1) | a (Cin) | r1 (hidden) ] ----------
    heads = jnp.dot(whead_ref[...], fc_t[...],
                    preferred_element_type=jnp.float32) + bhead_ref[...]
    z = jax.nn.sigmoid(heads[0:1, :])                        # (1, TH*W)
    a = heads[1:1 + Cin, :]                                  # (Cin, TH*W)
    h = jnp.maximum(heads[1 + Cin:, :], 0.0)                 # (hidden, TH*W)
    r = jnp.dot(wr2_ref[...], h,
                preferred_element_type=jnp.float32) + br2_ref[...]

    # ---- translucency recovery + residual add (lane-dense, NCHW-flat) -------
    x_t = xflat_ref[0]                                       # (Cin, TH*W)
    y_sf = z * a + (1.0 - z) * x_t
    ysf_ref[0] = y_sf
    yhat_ref[0] = y_sf + r
    z_ref[0] = z


def _pick_tile_h(H, W):
    """Row-tile height: lane-dense (TH*W % 128 == 0), bounded VMEM, and >=2
    row tiles per image when possible (grid depth / v7x megacore)."""
    divisors = [th for th in range(1, H + 1) if H % th == 0]
    dense = [th for th in divisors if (th * W) % 128 == 0 and th * W <= 2048]
    multi = [th for th in dense if th < H]
    if multi:
        return max(multi)
    if dense:
        return max(dense)
    return H      # fallback: whole image (block == full dims is always legal)


# ----------------------------------------------------------------------------
# Parameter init (deterministic, synthetic) and forward
# ----------------------------------------------------------------------------
def init_params(key, cin=4, hidden=8):
    ks = jax.random.split(key, 16)

    def u(k, shape, fan_in):
        s = 1.0 / jnp.sqrt(jnp.float32(fan_in))
        return jax.random.uniform(k, shape, jnp.float32, -s, s)

    fc_ch = hidden * len(DILATIONS)
    params = {
        "pyr": [(u(ks[2 * i], (3, 3, cin, hidden), 9 * cin),
                 u(ks[2 * i + 1], (1, hidden), 9 * cin))
                for i in range(len(DILATIONS))],
        "wz": u(ks[6], (fc_ch, 1), fc_ch),   "bz": u(ks[7], (1, 1), fc_ch),
        "wa": u(ks[8], (fc_ch, cin), fc_ch), "ba": u(ks[9], (1, cin), fc_ch),
        "wr1": u(ks[10], (fc_ch, hidden), fc_ch), "br1": u(ks[11], (1, hidden), fc_ch),
        "wr2": u(ks[12], (hidden, cin), hidden),  "br2": u(ks[13], (1, cin), hidden),
    }
    return params


def desnow_forward(params, x_nchw):
    """Fused Pallas implementation. Input/outputs NCHW (PyTorch convention)."""
    x = x_nchw.astype(jnp.float32)
    N, Cin, H, W = x.shape
    hidden = params["pyr"][0][0].shape[-1]
    fc_ch = hidden * len(DILATIONS)
    n_head = 1 + Cin + hidden
    max_d = max(DILATIONS)
    TH = _pick_tile_h(H, W)
    THW = TH * W
    Hp, Wp = H + 2 * max_d, W + 2 * max_d

    # host-side weight packing (tiny; constant-folded under jit)
    w_pyr = jnp.stack([w.reshape(9 * Cin, hidden) for w, _ in params["pyr"]])
    b_pyr = jnp.stack([b.reshape(1, hidden) for _, b in params["pyr"]])
    w_head_t = jnp.concatenate(
        [params["wz"], params["wa"], params["wr1"]], axis=1).T      # (n_head, fc_ch)
    b_head_t = jnp.concatenate(
        [params["bz"], params["ba"], params["br1"]], axis=1).T      # (n_head, 1)
    wr2_t = params["wr2"].T                                         # (Cin, hidden)
    br2_t = params["br2"].T                                         # (Cin, 1)

    # input in two (cheap) forms: NHWC padded for the conv taps, NCHW-flat for
    # the blend (free reshape, no transpose).
    x_pad = jnp.pad(jnp.transpose(x, (0, 2, 3, 1)),
                    ((0, 0), (max_d, max_d), (max_d, max_d), (0, 0)))
    x_flat = x.reshape(N, Cin, H * W)

    kern = functools.partial(
        _desnow_kernel, W=W, TH=TH, Cin=Cin, hidden=hidden,
        dilations=DILATIONS, max_d=max_d)

    y_sf, y_hat, z_hat = pl.pallas_call(
        kern,
        out_shape=(jax.ShapeDtypeStruct((N, Cin, H * W), jnp.float32),
                   jax.ShapeDtypeStruct((N, Cin, H * W), jnp.float32),
                   jax.ShapeDtypeStruct((N, 1, H * W), jnp.float32)),
        grid=(N, H // TH),
        in_specs=[
            pl.BlockSpec((1, Hp, Wp, Cin), lambda n, t: (n, 0, 0, 0)),
            pl.BlockSpec((1, Cin, THW), lambda n, t: (n, 0, t)),
            pl.BlockSpec((len(DILATIONS), 9 * Cin, hidden), lambda n, t: (0, 0, 0)),
            pl.BlockSpec((len(DILATIONS), 1, hidden), lambda n, t: (0, 0, 0)),
            pl.BlockSpec((n_head, fc_ch), lambda n, t: (0, 0)),
            pl.BlockSpec((n_head, 1), lambda n, t: (0, 0)),
            pl.BlockSpec((Cin, hidden), lambda n, t: (0, 0)),
            pl.BlockSpec((Cin, 1), lambda n, t: (0, 0)),
        ],
        out_specs=(
            pl.BlockSpec((1, Cin, THW), lambda n, t: (n, 0, t)),
            pl.BlockSpec((1, Cin, THW), lambda n, t: (n, 0, t)),
            pl.BlockSpec((1, 1, THW), lambda n, t: (n, 0, t)),
        ),
        scratch_shapes=[pltpu.VMEM((fc_ch, THW), jnp.float32)],
        compiler_params=pltpu.CompilerParams(
            dimension_semantics=("parallel", "parallel")),
    )(x_pad, x_flat, w_pyr, b_pyr, w_head_t, b_head_t, wr2_t, br2_t)

    # NCHW-flat -> NCHW is a free reshape (no transpose).
    return (y_sf.reshape(N, Cin, H, W),
            y_hat.reshape(N, Cin, H, W),
            z_hat.reshape(N, 1, H, W))


def desnow_forward_ref(params, x_nchw):
    """Pure-JAX reference for correctness checking."""
    x = jnp.transpose(x_nchw, (0, 2, 3, 1)).astype(jnp.float32)
    feats = []
    for d, (w, b) in zip(DILATIONS, params["pyr"]):
        y = lax.conv_general_dilated(
            x, w, window_strides=(1, 1), padding="SAME", rhs_dilation=(d, d),
            dimension_numbers=("NHWC", "HWIO", "NHWC"))
        feats.append(jax.nn.relu(y + b.reshape(1, 1, 1, -1)))
    fc = jnp.concatenate(feats, axis=-1)
    dot = lambda t, w, b: jnp.einsum("nhwc,cd->nhwd", t, w) + b.reshape(1, 1, 1, -1)
    z_hat = jax.nn.sigmoid(dot(fc, params["wz"], params["bz"]))
    a = dot(fc, params["wa"], params["ba"])
    r = dot(jax.nn.relu(dot(fc, params["wr1"], params["br1"])),
            params["wr2"], params["br2"])
    y_sf = z_hat * a + (1.0 - z_hat) * x
    y_hat = y_sf + r
    to_nchw = lambda t: jnp.transpose(t, (0, 3, 1, 2))
    return to_nchw(y_sf), to_nchw(y_hat), to_nchw(z_hat)


if __name__ == "__main__":
    key = jax.random.PRNGKey(0)
    kp, kx = jax.random.split(key)
    N, C, H, W = 2, 4, 16, 16
    params = init_params(kp, cin=C, hidden=8)
    x = jax.random.uniform(kx, (N, C, H, W), jnp.float32)

    y_sf, y_hat, z_hat = desnow_forward(params, x)
    jax.block_until_ready((y_sf, y_hat, z_hat))

    # sanity check against pure-JAX reference
    y_sf_r, y_hat_r, z_hat_r = desnow_forward_ref(params, x)
    assert y_sf.shape == (N, C, H, W) and y_hat.shape == (N, C, H, W)
    assert z_hat.shape == (N, 1, H, W)
    assert jnp.allclose(y_sf, y_sf_r, atol=1e-4, rtol=1e-4)
    assert jnp.allclose(y_hat, y_hat_r, atol=1e-4, rtol=1e-4)
    assert jnp.allclose(z_hat, z_hat_r, atol=1e-4, rtol=1e-4)

    print("KERNEL_OK")
</pallas_src>

<mosaic_0001>
module attributes {stable_mosaic.version = 11 : i64} {
  func.func @_desnow_kernel(%arg0: i32, %arg1: i32, %arg2: memref<1x24x24x4xf32, #tpu.memory_space<vmem>>, %arg3: memref<1x4x128xf32, #tpu.memory_space<vmem>>, %arg4: memref<3x36x8xf32, #tpu.memory_space<vmem>>, %arg5: memref<3x1x8xf32, #tpu.memory_space<vmem>>, %arg6: memref<13x24xf32, #tpu.memory_space<vmem>>, %arg7: memref<13x1xf32, #tpu.memory_space<vmem>>, %arg8: memref<4x8xf32, #tpu.memory_space<vmem>>, %arg9: memref<4x1xf32, #tpu.memory_space<vmem>>, %arg10: memref<1x4x128xf32, #tpu.memory_space<vmem>>, %arg11: memref<1x4x128xf32, #tpu.memory_space<vmem>>, %arg12: memref<1x1x128xf32, #tpu.memory_space<vmem>>, %arg13: memref<24x128xf32, #tpu.memory_space<vmem>>) attributes {dimension_semantics = [#tpu.dimension_semantics<parallel>, #tpu.dimension_semantics<parallel>], iteration_bounds = array<i64: 2, 2>, scalar_prefetch = 0 : i64, scratch_operands = 1 : i64, tpu.core_type = #tpu.core_type<tc>, window_params = [{transform_indices = @transform_0, window_bounds = array<i64: 1, 24, 24, 4>}, {transform_indices = @transform_1, window_bounds = array<i64: 1, 4, 128>}, {pipeline_mode = #tpu.pipeline_mode<synchronous>, transform_indices = @transform_2, window_bounds = array<i64: 3, 36, 8>}, {pipeline_mode = #tpu.pipeline_mode<synchronous>, transform_indices = @transform_3, window_bounds = array<i64: 3, 1, 8>}, {pipeline_mode = #tpu.pipeline_mode<synchronous>, transform_indices = @transform_4, window_bounds = array<i64: 13, 24>}, {pipeline_mode = #tpu.pipeline_mode<synchronous>, transform_indices = @transform_5, window_bounds = array<i64: 13, 1>}, {pipeline_mode = #tpu.pipeline_mode<synchronous>, transform_indices = @transform_6, window_bounds = array<i64: 4, 8>}, {pipeline_mode = #tpu.pipeline_mode<synchronous>, transform_indices = @transform_7, window_bounds = array<i64: 4, 1>}, {transform_indices = @transform_8, window_bounds = array<i64: 1, 4, 128>}, {transform_indices = @transform_9, window_bounds = array<i64: 1, 4, 128>}, {transform_indices = @transform_10, window_bounds = array<i64: 1, 1, 128>}]} {
    %c8_i32 = arith.constant 8 : i32
    %0 = arith.muli %arg1, %c8_i32 : i32
    %c3_i32 = arith.constant 3 : i32
    %1 = arith.addi %0, %c3_i32 : i32
    %c0 = arith.constant 0 : index
    %2 = arith.index_cast %1 : i32 to index
    %c3 = arith.constant 3 : index
    %c0_0 = arith.constant 0 : index
    %3 = vector.load %arg2[%c0, %2, %c3, %c0_0] : memref<1x24x24x4xf32, #tpu.memory_space<vmem>>, vector<1x8x16x4xf32>
    %4 = vector.shape_cast %3 : vector<1x8x16x4xf32> to vector<8x16x4xf32>
    %c3_i32_1 = arith.constant 3 : i32
    %5 = arith.addi %0, %c3_i32_1 : i32
    %c0_2 = arith.constant 0 : index
    %6 = arith.index_cast %5 : i32 to index
    %c4 = arith.constant 4 : index
    %c0_3 = arith.constant 0 : index
    %7 = vector.load %arg2[%c0_2, %6, %c4, %c0_3] : memref<1x24x24x4xf32, #tpu.memory_space<vmem>>, vector<1x8x16x4xf32>
    %8 = vector.shape_cast %7 : vector<1x8x16x4xf32> to vector<8x16x4xf32>
    %c3_i32_4 = arith.constant 3 : i32
    %9 = arith.addi %0, %c3_i32_4 : i32
    %c0_5 = arith.constant 0 : index
    %10 = arith.index_cast %9 : i32 to index
    %c5 = arith.constant 5 : index
    %c0_6 = arith.constant 0 : index
    %11 = vector.load %arg2[%c0_5, %10, %c5, %c0_6] : memref<1x24x24x4xf32, #tpu.memory_space<vmem>>, vector<1x8x16x4xf32>
    %12 = vector.shape_cast %11 : vector<1x8x16x4xf32> to vector<8x16x4xf32>
    %c4_i32 = arith.constant 4 : i32
    %13 = arith.addi %0, %c4_i32 : i32
    %c0_7 = arith.constant 0 : index
    %14 = arith.index_cast %13 : i32 to index
    %c3_8 = arith.constant 3 : index
    %c0_9 = arith.constant 0 : index
    %15 = vector.load %arg2[%c0_7, %14, %c3_8, %c0_9] : memref<1x24x24x4xf32, #tpu.memory_space<vmem>>, vector<1x8x16x4xf32>
    %16 = vector.shape_cast %15 : vector<1x8x16x4xf32> to vector<8x16x4xf32>
    %c4_i32_10 = arith.constant 4 : i32
    %17 = arith.addi %0, %c4_i32_10 : i32
    %c0_11 = arith.constant 0 : index
    %18 = arith.index_cast %17 : i32 to index
    %c4_12 = arith.constant 4 : index
    %c0_13 = arith.constant 0 : index
    %19 = vector.load %arg2[%c0_11, %18, %c4_12, %c0_13] : memref<1x24x24x4xf32, #tpu.memory_space<vmem>>, vector<1x8x16x4xf32>
    %20 = vector.shape_cast %19 : vector<1x8x16x4xf32> to vector<8x16x4xf32>
    %c4_i32_14 = arith.constant 4 : i32
    %21 = arith.addi %0, %c4_i32_14 : i32
    %c0_15 = arith.constant 0 : index
    %22 = arith.index_cast %21 : i32 to index
    %c5_16 = arith.constant 5 : index
    %c0_17 = arith.constant 0 : index
    %23 = vector.load %arg2[%c0_15, %22, %c5_16, %c0_17] : memref<1x24x24x4xf32, #tpu.memory_space<vmem>>, vector<1x8x16x4xf32>
    %24 = vector.shape_cast %23 : vector<1x8x16x4xf32> to vector<8x16x4xf32>
    %c5_i32 = arith.constant 5 : i32
    %25 = arith.addi %0, %c5_i32 : i32
    %c0_18 = arith.constant 0 : index
    %26 = arith.index_cast %25 : i32 to index
    %c3_19 = arith.constant 3 : index
    %c0_20 = arith.constant 0 : index
    %27 = vector.load %arg2[%c0_18, %26, %c3_19, %c0_20] : memref<1x24x24x4xf32, #tpu.memory_space<vmem>>, vector<1x8x16x4xf32>
    %28 = vector.shape_cast %27 : vector<1x8x16x4xf32> to vector<8x16x4xf32>
    %c5_i32_21 = arith.constant 5 : i32
    %29 = arith.addi %0, %c5_i32_21 : i32
    %c0_22 = arith.constant 0 : index
    %30 = arith.index_cast %29 : i32 to index
    %c4_23 = arith.constant 4 : index
    %c0_24 = arith.constant 0 : index
    %31 = vector.load %arg2[%c0_22, %30, %c4_23, %c0_24] : memref<1x24x24x4xf32, #tpu.memory_space<vmem>>, vector<1x8x16x4xf32>
    %32 = vector.shape_cast %31 : vector<1x8x16x4xf32> to vector<8x16x4xf32>
    %c5_i32_25 = arith.constant 5 : i32
    %33 = arith.addi %0, %c5_i32_25 : i32
    %c0_26 = arith.constant 0 : index
    %34 = arith.index_cast %33 : i32 to index
    %c5_27 = arith.constant 5 : index
    %c0_28 = arith.constant 0 : index
    %35 = vector.load %arg2[%c0_26, %34, %c5_27, %c0_28] : memref<1x24x24x4xf32, #tpu.memory_space<vmem>>, vector<1x8x16x4xf32>
    %36 = vector.shape_cast %35 : vector<1x8x16x4xf32> to vector<8x16x4xf32>
    %37 = tpu.concatenate %4, %8, %12, %16, %20, %24, %28, %32, %36 in 2 : vector<8x16x4xf32>, vector<8x16x4xf32>, vector<8x16x4xf32>, vector<8x16x4xf32>, vector<8x16x4xf32>, vector<8x16x4xf32>, vector<8x16x4xf32>, vector<8x16x4xf32>, vector<8x16x4xf32> -> vector<8x16x36xf32>
    %38 = vector.shape_cast %37 : vector<8x16x36xf32> to vector<128x36xf32>
    %c0_29 = arith.constant 0 : index
    %c0_30 = arith.constant 0 : index
    %c0_31 = arith.constant 0 : index
    %39 = vector.load %arg4[%c0_29, %c0_30, %c0_31] : memref<3x36x8xf32, #tpu.memory_space<vmem>>, vector<1x36x8xf32>
    %40 = vector.shape_cast %39 : vector<1x36x8xf32> to vector<36x8xf32>
    %cst = arith.constant dense<0.000000e+00> : vector<128x8xf32>
    %41 = tpu.matmul %38, %40, %cst {dimension_numbers = #tpu.dot_dimension_numbers<[1], [0], [0], [1], [0, 0, 1, 1], [], []>} : vector<128x36xf32>, vector<36x8xf32>, vector<128x8xf32> -> vector<128x8xf32>
    %c0_32 = arith.constant 0 : index
    %c0_33 = arith.constant 0 : index
    %c0_34 = arith.constant 0 : index
    %42 = vector.load %arg5[%c0_32, %c0_33, %c0_34] : memref<3x1x8xf32, #tpu.memory_space<vmem>>, vector<1x1x8xf32>
    %43 = vector.shape_cast %42 : vector<1x1x8xf32> to vector<1x8xf32>
    %44 = vector.broadcast %43 : vector<1x8xf32> to vector<128x8xf32>
    %45 = arith.addf %41, %44 : vector<128x8xf32>
    %cst_35 = arith.constant 0.000000e+00 : f32
    %46 = vector.broadcast %cst_35 : f32 to vector<128x8xf32>
    %47 = arith.maximumf %45, %46 : vector<128x8xf32>
    %48 = tpu.transpose %47, [1, 0] : vector<128x8xf32> -> vector<8x128xf32>
    %c0_36 = arith.constant 0 : index
    %c0_37 = arith.constant 0 : index
    %49 = vector.load %arg13[%c0_36, %c0_37] : memref<24x128xf32, #tpu.memory_space<vmem>>, vector<8x128xf32>
    tpu.vector_store %arg13[%c0_36, %c0_37], %48 {strides = array<i32>} : memref<24x128xf32, #tpu.memory_space<vmem>>, vector<8x128xf32>,
    %c2_i32 = arith.constant 2 : i32
    %50 = arith.addi %0, %c2_i32 : i32
    %c0_38 = arith.constant 0 : index
    %51 = arith.index_cast %50 : i32 to index
    %c2 = arith.constant 2 : index
    %c0_39 = arith.constant 0 : index
    %52 = vector.load %arg2[%c0_38, %51, %c2, %c0_39] : memref<1x24x24x4xf32, #tpu.memory_space<vmem>>, vector<1x8x16x4xf32>
    %53 = vector.shape_cast %52 : vector<1x8x16x4xf32> to vector<8x16x4xf32>
    %c2_i32_40 = arith.constant 2 : i32
    %54 = arith.addi %0, %c2_i32_40 : i32
    %c0_41 = arith.constant 0 : index
    %55 = arith.index_cast %54 : i32 to index
    %c4_42 = arith.constant 4 : index
    %c0_43 = arith.constant 0 : index
    %56 = vector.load %arg2[%c0_41, %55, %c4_42, %c0_43] : memref<1x24x24x4xf32, #tpu.memory_space<vmem>>, vector<1x8x16x4xf32>
    %57 = vector.shape_cast %56 : vector<1x8x16x4xf32> to vector<8x16x4xf32>
    %c2_i32_44 = arith.constant 2 : i32
    %58 = arith.addi %0, %c2_i32_44 : i32
    %c0_45 = arith.constant 0 : index
    %59 = arith.index_cast %58 : i32 to index
    %c6 = arith.constant 6 : index
    %c0_46 = arith.constant 0 : index
    %60 = vector.load %arg2[%c0_45, %59, %c6, %c0_46] : memref<1x24x24x4xf32, #tpu.memory_space<vmem>>, vector<1x8x16x4xf32>
    %61 = vector.shape_cast %60 : vector<1x8x16x4xf32> to vector<8x16x4xf32>
    %c4_i32_47 = arith.constant 4 : i32
    %62 = arith.addi %0, %c4_i32_47 : i32
    %c0_48 = arith.constant 0 : index
    %63 = arith.index_cast %62 : i32 to index
    %c2_49 = arith.constant 2 : index
    %c0_50 = arith.constant 0 : index
    %64 = vector.load %arg2[%c0_48, %63, %c2_49, %c0_50] : memref<1x24x24x4xf32, #tpu.memory_space<vmem>>, vector<1x8x16x4xf32>
    %65 = vector.shape_cast %64 : vector<1x8x16x4xf32> to vector<8x16x4xf32>
    %c4_i32_51 = arith.constant 4 : i32
    %66 = arith.addi %0, %c4_i32_51 : i32
    %c0_52 = arith.constant 0 : index
    %67 = arith.index_cast %66 : i32 to index
    %c4_53 = arith.constant 4 : index
    %c0_54 = arith.constant 0 : index
    %68 = vector.load %arg2[%c0_52, %67, %c4_53, %c0_54] : memref<1x24x24x4xf32, #tpu.memory_space<vmem>>, vector<1x8x16x4xf32>
    %69 = vector.shape_cast %68 : vector<1x8x16x4xf32> to vector<8x16x4xf32>
    %c4_i32_55 = arith.constant 4 : i32
    %70 = arith.addi %0, %c4_i32_55 : i32
    %c0_56 = arith.constant 0 : index
    %71 = arith.index_cast %70 : i32 to index
    %c6_57 = arith.constant 6 : index
    %c0_58 = arith.constant 0 : index
    %72 = vector.load %arg2[%c0_56, %71, %c6_57, %c0_58] : memref<1x24x24x4xf32, #tpu.memory_space<vmem>>, vector<1x8x16x4xf32>
    %73 = vector.shape_cast %72 : vector<1x8x16x4xf32> to vector<8x16x4xf32>
    %c6_i32 = arith.constant 6 : i32
    %74 = arith.addi %0, %c6_i32 : i32
    %c0_59 = arith.constant 0 : index
    %75 = arith.index_cast %74 : i32 to index
    %c2_60 = arith.constant 2 : index
    %c0_61 = arith.constant 0 : index
    %76 = vector.load %arg2[%c0_59, %75, %c2_60, %c0_61] : memref<1x24x24x4xf32, #tpu.memory_space<vmem>>, vector<1x8x16x4xf32>
    %77 = vector.shape_cast %76 : vector<1x8x16x4xf32> to vector<8x16x4xf32>
    %c6_i32_62 = arith.constant 6 : i32
    %78 = arith.addi %0, %c6_i32_62 : i32
    %c0_63 = arith.constant 0 : index
    %79 = arith.index_cast %78 : i32 to index
    %c4_64 = arith.constant 4 : index
    %c0_65 = arith.constant 0 : index
    %80 = vector.load %arg2[%c0_63, %79, %c4_64, %c0_65] : memref<1x24x24x4xf32, #tpu.memory_space<vmem>>, vector<1x8x16x4xf32>
    %81 = vector.shape_cast %80 : vector<1x8x16x4xf32> to vector<8x16x4xf32>
    %c6_i32_66 = arith.constant 6 : i32
    %82 = arith.addi %0, %c6_i32_66 : i32
    %c0_67 = arith.constant 0 : index
    %83 = arith.index_cast %82 : i32 to index
    %c6_68 = arith.constant 6 : index
    %c0_69 = arith.constant 0 : index
    %84 = vector.load %arg2[%c0_67, %83, %c6_68, %c0_69] : memref<1x24x24x4xf32, #tpu.memory_space<vmem>>, vector<1x8x16x4xf32>
    %85 = vector.shape_cast %84 : vector<1x8x16x4xf32> to vector<8x16x4xf32>
    %86 = tpu.concatenate %53, %57, %61, %65, %69, %73, %77, %81, %85 in 2 : vector<8x16x4xf32>, vector<8x16x4xf32>, vector<8x16x4xf32>, vector<8x16x4xf32>, vector<8x16x4xf32>, vector<8x16x4xf32>, vector<8x16x4xf32>, vector<8x16x4xf32>, vector<8x16x4xf32> -> vector<8x16x36xf32>
    %87 = vector.shape_cast %86 : vector<8x16x36xf32> to vector<128x36xf32>
    %c1 = arith.constant 1 : index
    %c0_70 = arith.constant 0 : index
    %c0_71 = arith.constant 0 : index
    %88 = vector.load %arg4[%c1, %c0_70, %c0_71] : memref<3x36x8xf32, #tpu.memory_space<vmem>>, vector<1x36x8xf32>
    %89 = vector.shape_cast %88 : vector<1x36x8xf32> to vector<36x8xf32>
    %cst_72 = arith.constant dense<0.000000e+00> : vector<128x8xf32>
    %90 = tpu.matmul %87, %89, %cst_72 {dimension_numbers = #tpu.dot_dimension_numbers<[1], [0], [0], [1], [0, 0, 1, 1], [], []>} : vector<128x36xf32>, vector<36x8xf32>, vector<128x8xf32> -> vector<128x8xf32>
    %c1_73 = arith.constant 1 : index
    %c0_74 = arith.constant 0 : index
    %c0_75 = arith.constant 0 : index
    %91 = vector.load %arg5[%c1_73, %c0_74, %c0_75] : memref<3x1x8xf32, #tpu.memory_space<vmem>>, vector<1x1x8xf32>
    %92 = vector.shape_cast %91 : vector<1x1x8xf32> to vector<1x8xf32>
    %93 = vector.broadcast %92 : vector<1x8xf32> to vector<128x8xf32>
    %94 = arith.addf %90, %93 : vector<128x8xf32>
    %cst_76 = arith.constant 0.000000e+00 : f32
    %95 = vector.broadcast %cst_76 : f32 to vector<128x8xf32>
    %96 = arith.maximumf %94, %95 : vector<128x8xf32>
    %97 = tpu.transpose %96, [1, 0] : vector<128x8xf32> -> vector<8x128xf32>
    %c8 = arith.constant 8 : index
    %c0_77 = arith.constant 0 : index
    %98 = vector.load %arg13[%c8, %c0_77] : memref<24x128xf32, #tpu.memory_space<vmem>>, vector<8x128xf32>
    tpu.vector_store %arg13[%c8, %c0_77], %97 {strides = array<i32>} : memref<24x128xf32, #tpu.memory_space<vmem>>, vector<8x128xf32>,
    %c0_i32 = arith.constant 0 : i32
    %99 = arith.addi %0, %c0_i32 : i32
    %c0_78 = arith.constant 0 : index
    %100 = arith.index_cast %99 : i32 to index
    %c0_79 = arith.constant 0 : index
    %c0_80 = arith.constant 0 : index
    %101 = vector.load %arg2[%c0_78, %100, %c0_79, %c0_80] : memref<1x24x24x4xf32, #tpu.memory_space<vmem>>, vector<1x8x16x4xf32>
    %102 = vector.shape_cast %101 : vector<1x8x16x4xf32> to vector<8x16x4xf32>
    %c0_i32_81 = arith.constant 0 : i32
    %103 = arith.addi %0, %c0_i32_81 : i32
    %c0_82 = arith.constant 0 : index
    %104 = arith.index_cast %103 : i32 to index
    %c4_83 = arith.constant 4 : index
    %c0_84 = arith.constant 0 : index
    %105 = vector.load %arg2[%c0_82, %104, %c4_83, %c0_84] : memref<1x24x24x4xf32, #tpu.memory_space<vmem>>, vector<1x8x16x4xf32>
    %106 = vector.shape_cast %105 : vector<1x8x16x4xf32> to vector<8x16x4xf32>
    %c0_i32_85 = arith.constant 0 : i32
    %107 = arith.addi %0, %c0_i32_85 : i32
    %c0_86 = arith.constant 0 : index
    %108 = arith.index_cast %107 : i32 to index
    %c8_87 = arith.constant 8 : index
    %c0_88 = arith.constant 0 : index
    %109 = vector.load %arg2[%c0_86, %108, %c8_87, %c0_88] : memref<1x24x24x4xf32, #tpu.memory_space<vmem>>, vector<1x8x16x4xf32>
    %110 = vector.shape_cast %109 : vector<1x8x16x4xf32> to vector<8x16x4xf32>
    %c4_i32_89 = arith.constant 4 : i32
    %111 = arith.addi %0, %c4_i32_89 : i32
    %c0_90 = arith.constant 0 : index
    %112 = arith.index_cast %111 : i32 to index
    %c0_91 = arith.constant 0 : index
    %c0_92 = arith.constant 0 : index
    %113 = vector.load %arg2[%c0_90, %112, %c0_91, %c0_92] : memref<1x24x24x4xf32, #tpu.memory_space<vmem>>, vector<1x8x16x4xf32>
    %114 = vector.shape_cast %113 : vector<1x8x16x4xf32> to vector<8x16x4xf32>
    %c4_i32_93 = arith.constant 4 : i32
    %115 = arith.addi %0, %c4_i32_93 : i32
    %c0_94 = arith.constant 0 : index
    %116 = arith.index_cast %115 : i32 to index
    %c4_95 = arith.constant 4 : index
    %c0_96 = arith.constant 0 : index
    %117 = vector.load %arg2[%c0_94, %116, %c4_95, %c0_96] : memref<1x24x24x4xf32, #tpu.memory_space<vmem>>, vector<1x8x16x4xf32>
    %118 = vector.shape_cast %117 : vector<1x8x16x4xf32> to vector<8x16x4xf32>
    %c4_i32_97 = arith.constant 4 : i32
    %119 = arith.addi %0, %c4_i32_97 : i32
    %c0_98 = arith.constant 0 : index
    %120 = arith.index_cast %119 : i32 to index
    %c8_99 = arith.constant 8 : index
    %c0_100 = arith.constant 0 : index
    %121 = vector.load %arg2[%c0_98, %120, %c8_99, %c0_100] : memref<1x24x24x4xf32, #tpu.memory_space<vmem>>, vector<1x8x16x4xf32>
    %122 = vector.shape_cast %121 : vector<1x8x16x4xf32> to vector<8x16x4xf32>
    %c8_i32_101 = arith.constant 8 : i32
    %123 = arith.addi %0, %c8_i32_101 : i32
    %c0_102 = arith.constant 0 : index
    %124 = arith.index_cast %123 : i32 to index
    %c0_103 = arith.constant 0 : index
    %c0_104 = arith.constant 0 : index
    %125 = vector.load %arg2[%c0_102, %124, %c0_103, %c0_104] : memref<1x24x24x4xf32, #tpu.memory_space<vmem>>, vector<1x8x16x4xf32>
    %126 = vector.shape_cast %125 : vector<1x8x16x4xf32> to vector<8x16x4xf32>
    %c8_i32_105 = arith.constant 8 : i32
    %127 = arith.addi %0, %c8_i32_105 : i32
    %c0_106 = arith.constant 0 : index
    %128 = arith.index_cast %127 : i32 to index
    %c4_107 = arith.constant 4 : index
    %c0_108 = arith.constant 0 : index
    %129 = vector.load %arg2[%c0_106, %128, %c4_107, %c0_108] : memref<1x24x24x4xf32, #tpu.memory_space<vmem>>, vector<1x8x16x4xf32>
    %130 = vector.shape_cast %129 : vector<1x8x16x4xf32> to vector<8x16x4xf32>
    %c8_i32_109 = arith.constant 8 : i32
    %131 = arith.addi %0, %c8_i32_109 : i32
    %c0_110 = arith.constant 0 : index
    %132 = arith.index_cast %131 : i32 to index
    %c8_111 = arith.constant 8 : index
    %c0_112 = arith.constant 0 : index
    %133 = vector.load %arg2[%c0_110, %132, %c8_111, %c0_112] : memref<1x24x24x4xf32, #tpu.memory_space<vmem>>, vector<1x8x16x4xf32>
    %134 = vector.shape_cast %133 : vector<1x8x16x4xf32> to vector<8x16x4xf32>
    %135 = tpu.concatenate %102, %106, %110, %114, %118, %122, %126, %130, %134 in 2 : vector<8x16x4xf32>, vector<8x16x4xf32>, vector<8x16x4xf32>, vector<8x16x4xf32>, vector<8x16x4xf32>, vector<8x16x4xf32>, vector<8x16x4xf32>, vector<8x16x4xf32>, vector<8x16x4xf32> -> vector<8x16x36xf32>
    %136 = vector.shape_cast %135 : vector<8x16x36xf32> to vector<128x36xf32>
    %c2_113 = arith.constant 2 : index
    %c0_114 = arith.constant 0 : index
    %c0_115 = arith.constant 0 : index
    %137 = vector.load %arg4[%c2_113, %c0_114, %c0_115] : memref<3x36x8xf32, #tpu.memory_space<vmem>>, vector<1x36x8xf32>
    %138 = vector.shape_cast %137 : vector<1x36x8xf32> to vector<36x8xf32>
    %cst_116 = arith.constant dense<0.000000e+00> : vector<128x8xf32>
    %139 = tpu.matmul %136, %138, %cst_116 {dimension_numbers = #tpu.dot_dimension_numbers<[1], [0], [0], [1], [0, 0, 1, 1], [], []>} : vector<128x36xf32>, vector<36x8xf32>, vector<128x8xf32> -> vector<128x8xf32>
    %c2_117 = arith.constant 2 : index
    %c0_118 = arith.constant 0 : index
    %c0_119 = arith.constant 0 : index
    %140 = vector.load %arg5[%c2_117, %c0_118, %c0_119] : memref<3x1x8xf32, #tpu.memory_space<vmem>>, vector<1x1x8xf32>
    %141 = vector.shape_cast %140 : vector<1x1x8xf32> to vector<1x8xf32>
    %142 = vector.broadcast %141 : vector<1x8xf32> to vector<128x8xf32>
    %143 = arith.addf %139, %142 : vector<128x8xf32>
    %cst_120 = arith.constant 0.000000e+00 : f32
    %144 = vector.broadcast %cst_120 : f32 to vector<128x8xf32>
    %145 = arith.maximumf %143, %144 : vector<128x8xf32>
    %146 = tpu.transpose %145, [1, 0] : vector<128x8xf32> -> vector<8x128xf32>
    %c16 = arith.constant 16 : index
    %c0_121 = arith.constant 0 : index
    %147 = vector.load %arg13[%c16, %c0_121] : memref<24x128xf32, #tpu.memory_space<vmem>>, vector<8x128xf32>
    tpu.vector_store %arg13[%c16, %c0_121], %146 {strides = array<i32>} : memref<24x128xf32, #tpu.memory_space<vmem>>, vector<8x128xf32>,
    %c0_122 = arith.constant 0 : index
    %c0_123 = arith.constant 0 : index
    %148 = vector.load %arg6[%c0_122, %c0_123] : memref<13x24xf32, #tpu.memory_space<vmem>>, vector<13x24xf32>
    %c0_124 = arith.constant 0 : index
    %c0_125 = arith.constant 0 : index
    %149 = vector.load %arg13[%c0_124, %c0_125] : memref<24x128xf32, #tpu.memory_space<vmem>>, vector<24x128xf32>
    %cst_126 = arith.constant dense<0.000000e+00> : vector<13x128xf32>
    %150 = tpu.matmul %148, %149, %cst_126 {dimension_numbers = #tpu.dot_dimension_numbers<[1], [0], [0], [1], [0, 0, 1, 1], [], []>} : vector<13x24xf32>, vector<24x128xf32>, vector<13x128xf32> -> vector<13x128xf32>
    %c0_127 = arith.constant 0 : index
    %c0_128 = arith.constant 0 : index
    %151 = vector.load %arg7[%c0_127, %c0_128] : memref<13x1xf32, #tpu.memory_space<vmem>>, vector<13x1xf32>
    %152 = vector.broadcast %151 : vector<13x1xf32> to vector<13x128xf32>
    %153 = arith.addf %150, %152 : vector<13x128xf32>
    %154 = vector.extract_strided_slice %153 {offsets = [0, 0], sizes = [1, 128], strides = [1, 1]} : vector<13x128xf32> to vector<1x128xf32>
    %155 = arith.negf %154 : vector<1x128xf32>
    %156 = math.exp %155 : vector<1x128xf32>
    %cst_129 = arith.constant 1.000000e+00 : f32
    %157 = vector.broadcast %cst_129 : f32 to vector<1x128xf32>
    %158 = arith.addf %157, %156 : vector<1x128xf32>
    %159 = arith.divf %157, %158 : vector<1x128xf32>
    %160 = vector.extract_strided_slice %153 {offsets = [1, 0], sizes = [4, 128], strides = [1, 1]} : vector<13x128xf32> to vector<4x128xf32>
    %161 = vector.extract_strided_slice %153 {offsets = [5, 0], sizes = [8, 128], strides = [1, 1]} : vector<13x128xf32> to vector<8x128xf32>
    %cst_130 = arith.constant 0.000000e+00 : f32
    %162 = vector.broadcast %cst_130 : f32 to vector<8x128xf32>
    %163 = arith.maximumf %161, %162 : vector<8x128xf32>
    %c0_131 = arith.constant 0 : index
    %c0_132 = arith.constant 0 : index
    %164 = vector.load %arg8[%c0_131, %c0_132] : memref<4x8xf32, #tpu.memory_space<vmem>>, vector<4x8xf32>
    %cst_133 = arith.constant dense<0.000000e+00> : vector<4x128xf32>
    %165 = tpu.matmul %164, %163, %cst_133 {dimension_numbers = #tpu.dot_dimension_numbers<[1], [0], [0], [1], [0, 0, 1, 1], [], []>} : vector<4x8xf32>, vector<8x128xf32>, vector<4x128xf32> -> vector<4x128xf32>
    %c0_134 = arith.constant 0 : index
    %c0_135 = arith.constant 0 : index
    %166 = vector.load %arg9[%c0_134, %c0_135] : memref<4x1xf32, #tpu.memory_space<vmem>>, vector<4x1xf32>
    %167 = vector.broadcast %166 : vector<4x1xf32> to vector<4x128xf32>
    %168 = arith.addf %165, %167 : vector<4x128xf32>
    %c0_136 = arith.constant 0 : index
    %c0_137 = arith.constant 0 : index
    %c0_138 = arith.constant 0 : index
    %169 = vector.load %arg3[%c0_136, %c0_137, %c0_138] : memref<1x4x128xf32, #tpu.memory_space<vmem>>, vector<1x4x128xf32>
    %170 = vector.shape_cast %169 : vector<1x4x128xf32> to vector<4x128xf32>
    %171 = vector.broadcast %159 : vector<1x128xf32> to vector<4x128xf32>
    %172 = arith.mulf %171, %160 : vector<4x128xf32>
    %cst_139 = arith.constant 1.000000e+00 : f32
    %173 = vector.broadcast %cst_139 : f32 to vector<1x128xf32>
    %174 = arith.subf %173, %159 : vector<1x128xf32>
    %175 = vector.broadcast %174 : vector<1x128xf32> to vector<4x128xf32>
    %176 = arith.mulf %175, %170 : vector<4x128xf32>
    %177 = arith.addf %172, %176 : vector<4x128xf32>
    %c0_140 = arith.constant 0 : index
    %c0_141 = arith.constant 0 : index
    %c0_142 = arith.constant 0 : index
    %178 = vector.load %arg10[%c0_140, %c0_141, %c0_142] : memref<1x4x128xf32, #tpu.memory_space<vmem>>, vector<1x4x128xf32>
    %179 = vector.shape_cast %178 : vector<1x4x128xf32> to vector<4x128xf32>
    %180 = vector.shape_cast %177 : vector<4x128xf32> to vector<1x4x128xf32>
    tpu.vector_store %arg10[%c0_140, %c0_141, %c0_142], %180 {strides = array<i32>} : memref<1x4x128xf32, #tpu.memory_space<vmem>>, vector<1x4x128xf32>,
    %181 = arith.addf %177, %168 : vector<4x128xf32>
    %c0_143 = arith.constant 0 : index
    %c0_144 = arith.constant 0 : index
    %c0_145 = arith.constant 0 : index
    %182 = vector.load %arg11[%c0_143, %c0_144, %c0_145] : memref<1x4x128xf32, #tpu.memory_space<vmem>>, vector<1x4x128xf32>
    %183 = vector.shape_cast %182 : vector<1x4x128xf32> to vector<4x128xf32>
    %184 = vector.shape_cast %181 : vector<4x128xf32> to vector<1x4x128xf32>
    tpu.vector_store %arg11[%c0_143, %c0_144, %c0_145], %184 {strides = array<i32>} : memref<1x4x128xf32, #tpu.memory_space<vmem>>, vector<1x4x128xf32>,
    %c0_146 = arith.constant 0 : index
    %c0_147 = arith.constant 0 : index
    %c0_148 = arith.constant 0 : index
    %185 = vector.load %arg12[%c0_146, %c0_147, %c0_148] : memref<1x1x128xf32, #tpu.memory_space<vmem>>, vector<1x1x128xf32>
    %186 = vector.shape_cast %185 : vector<1x1x128xf32> to vector<1x128xf32>
    %187 = vector.shape_cast %159 : vector<1x128xf32> to vector<1x1x128xf32>
    tpu.vector_store %arg12[%c0_146, %c0_147, %c0_148], %187 {strides = array<i32>} : memref<1x1x128xf32, #tpu.memory_space<vmem>>, vector<1x1x128xf32>,
    return
  }
  func.func @transform_0(%arg0: i32, %arg1: i32) -> (i32, i32, i32, i32) {
    %c0_i32 = arith.constant 0 : i32
    %c0_i32_0 = arith.constant 0 : i32
    %c0_i32_1 = arith.constant 0 : i32
    %c0_i32_2 = arith.constant 0 : i32
    return %arg0, %c0_i32, %c0_i32_0, %c0_i32_1 : i32, i32, i32, i32
  }
  func.func @transform_1(%arg0: i32, %arg1: i32) -> (i32, i32, i32) {
    %c0_i32 = arith.constant 0 : i32
    %c0_i32_0 = arith.constant 0 : i32
    return %arg0, %c0_i32, %arg1 : i32, i32, i32
  }
  func.func @transform_2(%arg0: i32, %arg1: i32) -> (i32, i32, i32) {
    %c0_i32 = arith.constant 0 : i32
    %c0_i32_0 = arith.constant 0 : i32
    %c0_i32_1 = arith.constant 0 : i32
    %c0_i32_2 = arith.constant 0 : i32
    return %c0_i32, %c0_i32_0, %c0_i32_1 : i32, i32, i32
  }
  func.func @transform_3(%arg0: i32, %arg1: i32) -> (i32, i32, i32) {
    %c0_i32 = arith.constant 0 : i32
    %c0_i32_0 = arith.constant 0 : i32
    %c0_i32_1 = arith.constant 0 : i32
    %c0_i32_2 = arith.constant 0 : i32
    return %c0_i32, %c0_i32_0, %c0_i32_1 : i32, i32, i32
  }
  func.func @transform_4(%arg0: i32, %arg1: i32) -> (i32, i32) {
    %c0_i32 = arith.constant 0 : i32
    %c0_i32_0 = arith.constant 0 : i32
    %c0_i32_1 = arith.constant 0 : i32
    return %c0_i32, %c0_i32_0 : i32, i32
  }
  func.func @transform_5(%arg0: i32, %arg1: i32) -> (i32, i32) {
    %c0_i32 = arith.constant 0 : i32
    %c0_i32_0 = arith.constant 0 : i32
    %c0_i32_1 = arith.constant 0 : i32
    return %c0_i32, %c0_i32_0 : i32, i32
  }
  func.func @transform_6(%arg0: i32, %arg1: i32) -> (i32, i32) {
    %c0_i32 = arith.constant 0 : i32
    %c0_i32_0 = arith.constant 0 : i32
    %c0_i32_1 = arith.constant 0 : i32
    return %c0_i32, %c0_i32_0 : i32, i32
  }
  func.func @transform_7(%arg0: i32, %arg1: i32) -> (i32, i32) {
    %c0_i32 = arith.constant 0 : i32
    %c0_i32_0 = arith.constant 0 : i32
    %c0_i32_1 = arith.constant 0 : i32
    return %c0_i32, %c0_i32_0 : i32, i32
  }
  func.func @transform_8(%arg0: i32, %arg1: i32) -> (i32, i32, i32) {
    %c0_i32 = arith.constant 0 : i32
    %c0_i32_0 = arith.constant 0 : i32
    return %arg0, %c0_i32, %arg1 : i32, i32, i32
  }
  func.func @transform_9(%arg0: i32, %arg1: i32) -> (i32, i32, i32) {
    %c0_i32 = arith.constant 0 : i32
    %c0_i32_0 = arith.constant 0 : i32
    return %arg0, %c0_i32, %arg1 : i32, i32, i32
  }
  func.func @transform_10(%arg0: i32, %arg1: i32) -> (i32, i32, i32) {
    %c0_i32 = arith.constant 0 : i32
    %c0_i32_0 = arith.constant 0 : i32
    return %arg0, %c0_i32, %arg1 : i32, i32, i32
  }
}

</mosaic_0001>

<bundles_post_ra>
// kernel: tpu_custom_call.1
= control target key start
LH: loop header
LB: loop body
LE: loop exit
PB: predicated region body
PF: predicated region fallthrough
CT: control target
= control target key end

     0   :  { %s7382_s0 = inlined_call_operand.vmem [shape: f32[2,24,24,4], index: 0, kind: input, shape index: {}]   ;;  %s7383_s1 = inlined_call_operand.vmem [shape: f32[2,4,256], index: 1, kind: input, shape index: {}]   ;;  %s7384_s2 = inlined_call_operand.vmem [shape: f32[3,36,8], index: 2, kind: input, shape index: {}]   ;;  %s7385_s3 = inlined_call_operand.vmem [shape: f32[3,1,8], index: 3, kind: input, shape index: {}]   ;;  %s7386_s4 = inlined_call_operand.vmem [shape: f32[13,24], index: 4, kind: input, shape index: {}]   ;;  %s7387_s5 = inlined_call_operand.vmem [shape: f32[13,1], index: 5, kind: input, shape index: {}]   ;;  %s7388_s6 = inlined_call_operand.vmem [shape: f32[4,8], index: 6, kind: input, shape index: {}]   ;;  %s7389_s7 = inlined_call_operand.vmem [shape: f32[4,1], index: 7, kind: input, shape index: {}]   ;;  %s7390_s8 = inlined_call_operand.hbm [shape: f32[2,4,256], index: 8, kind: output, shape index: {0}]   ;;  %s7391_s9 = inlined_call_operand.hbm [shape: f32[2,4,256], index: 9, kind: output, shape index: {1}]   ;;  %s7392_s10 = inlined_call_operand.hbm [shape: f32[2,1,256], index: 10, kind: output, shape index: {2}]  }
   0x1   :  { %7439 = sst [smem:[#allocation118_spill]] %s7382_s0 }
   0x2   :  { %7440 = sst [smem:[#allocation119_spill]] %s7383_s1 }
   0x3   :  { %16 = vsyncpa [#allocation4], 0 }
   0x4   :  { %18 = vsyncpa [#allocation4 + $0x1], 0 }
   0x5   :  { %19 = vsyncpa [#allocation6], 0 }
   0x6   :  { %21 = vsyncpa [#allocation6 + $0x1], 0  ;;  %s4507_s13 = smov 0   ;;  %s4509_s14 = smov 0  }
   0x7   :  { %s4511_s15 = smov 0   ;;  %s4513_s16 = smov 0  }
   0x8   :  { %s4515_s17 = smov 0   ;;  %s4517_s18 = smov 0  }
   0x9   :  { %s4519_s19 = smov 0   ;;  %s4521_s20 = smov 0  }
   0xa LB: > { %7441 = sst [smem:[#allocation10_spill]] %s4421_s15  ;;  %s7394_s21 = sadd.s32 4294967295, %s4441_s20   ;;  %s4441_s20 = sphi %s4521_s20, %s27_s20   ;;  %s4437_s19 = sphi %s4519_s19, %s7817_s19   ;;  %s4433_s18 = sphi %s4517_s18, %s7816_s18   ;;  %s4429_s17 = sphi %s4515_s17, %s7815_s17   ;;  %s4425_s16 = sphi %s4513_s16, %s7814_s16   ;;  %s4421_s15 = sphi %s4511_s15, %s7813_s15   ;;  %s4417_s14 = sphi %s4509_s14, %s7819_s14   ;;  %s4413_s13 = sphi %s4507_s13, %s7818_s13  }
   0xb   : > { %7442 = sst [smem:[#allocation11_spill]] %s4433_s18  ;;  %s7393_s22 = sadd.s32 4294967294, %s4441_s20  }
   0xc   : > { %7443 = sst [smem:[#allocation12_spill]] %s4437_s19  ;;  %s36_s23 = sadd.s32 1, %s4433_s18 }
   0xd   : > { %p37_p0 = scmp.ge.s32.totalorder %s36_s23, 2  ;;  %s39_s24 = sadd.s32 1, %s4437_s19 }
   0xe   : > { %p238_p1 = scmp.ne.s32.totalorder %s4421_s15, %s4417_s14  ;;  %p239_p2 = scmp.eq.s32.totalorder %s7394_s21, 3 }
   0xf   : > { %s7821_s23 = smov (%p37_p0, %s36_s23), 0  ;;  %s7823_s24 = smov (!%p37_p0, %s39_s24), %s4437_s19 }
  0x10   : > { %7444 = sst [smem:[#allocation13_spill]] %s7821_s23  ;;  %s224_s25 = ssub.s32 %s4433_s18, %s7821_s23 }
  0x11   : > { %p4560_p3 = por %p239_p2, %p238_p1  ;;  %p41_p4 = scmp.ge.s32.totalorder %s7823_s24, 2 }
  0x12   : > { %p244_p5 = scmp.ne.s32.totalorder %s4417_s14, %s4413_s13  ;;  %p245_p6 = scmp.eq.s32.totalorder %s7393_s22, 3 }
  0x13   : > { %p3654_p7 = scmp.ge.s32.totalorder %s4441_s20, 1  ;;  %s7825_s24 = smov (%p41_p4, %s7823_s24), 0 }
  0x14   : > { %7446 = sst [smem:[#allocation14_spill]] %s7825_s24  ;;  %p4571_p8 = por %p245_p6, %p244_p5 }
  0x15   : > { %p356_p9 = scmp.lt.s32.totalorder %s4441_s20, 5  ;;  %s223_s28 = ssub.s32 %s4437_s19, %s7825_s24 }
  0x16   : > { %s228_s29 = sadd.s32 1, %s4421_s15  ;;  %s225_s30 = sor.u32 %s224_s25, %s223_s28 }
  0x17   : > { %p357_p10 = pnand %p3654_p7, %p356_p9  ;;  %p226_p11 = scmp.eq.s32.totalorder %s225_s30, 0 }
  0x19   : > { %s4580_s11 = scalar_select %p226_p11, %s4421_s15, %s228_s29  }
  0x1a   : > { %360 = sbr.rel (%p357_p10) target bundleno = 1904 (0x770), region = 52 }
  0x1b   : > { %7448 = sst [smem:[#allocation15_spill]] %s4580_s11 }
  0x1f   : > { %p411_p12 = scmp.lt.s32.totalorder %s4429_s17, 1  ;;  %s3662_s22 = smul.u32 192, %s4425_s16  ;;  %vm1284_vm0 = vcmask 1043456   ;;  %vm1090_vm1 = vcmask 31744   ;;  %vm1124_vm2 = vcmask 97280   ;;  %vm1107_vm3 = vcmask 64512  }
  0x20   : > { %s7449_s0 = sld [smem:[#allocation118_spill]]  ;;  %s7426_s25 = smov 4   ;;  %vm1141_vm4 = vcmask 130048   ;;  %vm1175_vm5 = vcmask 195584   ;;  %vm1158_vm6 = vcmask 162816   ;;  %vm1192_vm7 = vcmask 228352  }
  0x21   : > { %s4584_s12 = scalar_select %p411_p12, %s4429_s17, 1  ;;  %vm1235_vm8 = vcmask 293888   ;;  %vm1209_vm9 = vcmask 261120   ;;  %vm3369_vm10 = vcmask 1042432  }
  0x22   : > { %s7428_s18 = smov 8   ;;  %s7415_s23 = smov 20  }
  0x23   : > { %s4133_s21 = smul.u32 576, %s4584_s12  ;;  %s7411_s28 = smov 28  }
  0x24   : > { %s7409_s29 = smov 32   ;;  %s7616_s30 = smov 20  }
  0x25   : > { %p418_p13 = scmp.lt.s32.totalorder %s4425_s16, 1  ;;  %s7808_s1 = sld [smem:[#allocation119_spill]] }
  0x26   : > { %s415_s24 = scalar_lea.vmem %s7449_s0, %s4133_s21  ;;  %s7430_s21 = smov 12  }
  0x27   : > { %s4591_s19 = scalar_lea.vmem %s415_s24, %s3662_s22  ;;  %s7417_s22 = smov 16  }
  0x28   : > { %v4594_v0 = vld [vmem:[%s4591_s19 + $0x7c] sm:$0xff]  ;;  %v4597_v1 = vld [vmem:[%s4591_s19 + $0x64] sm:$0xff]  ;;  %v4600_v2 = vld [vmem:[%s4591_s19 + $0x4c] sm:$0xff]  ;;  %s7413_s24 = smov 24   ;;  %s7690_s0 = smov 12  }
  0x29   : > { %602 = vrot.lane.b32.xlu2 %v4594_v0, %s7426_s25  ;;  %598 = vrot.lane.b32.xlu1 %v4597_v1, %s7426_s25  ;;  %v4609_v3 = vld [vmem:[%s4591_s19 + $0x84] sm:$0xff]  ;;  %v4612_v4 = vld [vmem:[%s4591_s19 + $0x6c] sm:$0xff]  ;;  %s4307_s11 = scalar_lea.hbm %s7390_s8, 16 }
  0x2a   : > { %594 = vrot.lane.b32.xlu0 %v4600_v2, %s7426_s25  ;;  %v4615_v5 = vld [vmem:[%s4591_s19 + $0x54] sm:$0xff]  ;;  %v4624_v6 = vld [vmem:[%s4591_s19 + $0xac] sm:$0xff]  ;;  %v4627_v7 = vld [vmem:[%s4591_s19 + $0x9c] sm:$0xff] }
  0x2b   : > { %v4630_v8 = vld [vmem:[%s4591_s19 + $0x94] sm:$0xff]  ;;  %v4639_v9 = vld [vmem:[%s4591_s19 + $0xcc] sm:$0xff]  ;;  %v4642_v10 = vld [vmem:[%s4591_s19 + $0xc4] sm:$0xff] }
  0x2c   : > { %v4645_v11 = vld [vmem:[%s4591_s19 + $0xb4] sm:$0xff]  ;;  %v4657_v13 = vld [vmem:[%s4591_s19 + $0xe4] sm:$0xff]  ;;  %v4660_v14 = vld [vmem:[%s4591_s19 + $0xdc] sm:$0xff] }
  0x2d   : > { %v4654_v12 = vld [vmem:[%s4591_s19 + $0xf4] sm:$0xff]  ;;  %v4671_v17 = vld [vmem:[%s4591_s19 + $0xfc] sm:$0xff]  ;;  %v4684_v20 = vld [vmem:[%s4591_s19 + $0x65] sm:$0xff] }
  0x2e   : > { %v3696_v15 = vld [vmem:[%s4591_s19 + $0x55] sm:$0xff]  ;;  %v3695_v16 = vld [vmem:[%s4591_s19 + $0x4d] sm:$0xff]  ;;  %v4678_v18 = vld [vmem:[%s4591_s19 + $0x7d] sm:$0xff] }
  0x2f   : > { %v4681_v19 = vld [vmem:[%s4591_s19 + $0x6d] sm:$0xff]  ;;  %v4693_v21 = vld [vmem:[%s4591_s19 + $0x9d] sm:$0xff]  ;;  %v4696_v22 = vld [vmem:[%s4591_s19 + $0x95] sm:$0xff] }
  0x30   : > { %v4699_v23 = vld [vmem:[%s4591_s19 + $0x85] sm:$0xff]  ;;  %v4711_v25 = vld [vmem:[%s4591_s19 + $0xb5] sm:$0xff]  ;;  %v4714_v26 = vld [vmem:[%s4591_s19 + $0xad] sm:$0xff] }
  0x31   : > { %604 = vrot.lane.b32.xlu2 %v4609_v3, %s7426_s25  ;;  %600 = vrot.lane.b32.xlu1 %v4612_v4, %s7426_s25  ;;  %v4708_v24 = vld [vmem:[%s4591_s19 + $0xc5] sm:$0xff]  ;;  %v4726_v28 = vld [vmem:[%s4591_s19 + $0xdd] sm:$0xff] }
  0x32   : > { %596 = vrot.lane.b32.xlu0 %v4615_v5, %s7426_s25  ;;  %v4723_v27 = vld [vmem:[%s4591_s19 + $0xe5] sm:$0xff]  ;;  %v4729_v29 = vld [vmem:[%s4591_s19 + $0xcd] sm:$0xff]  ;;  %v4741_v31 = vld [vmem:[%s4591_s19 + $0xfd] sm:$0xff] }
  0x33   : > { %v4738_v30 = vld [vmem:[%s4591_s19 + $0x63] sm:$0xff]  ;;  %v4744_v32 = vld [vmem:[%s4591_s19 + $0xf5] sm:$0xff]  ;;  %v4759_v35 = vld [vmem:[%s4591_s19 + $0x6b] sm:$0xff] }
  0x34   : > { %v4753_v33 = vld [vmem:[%s4591_s19 + $0x83] sm:$0xff]  ;;  %v4756_v34 = vld [vmem:[%s4591_s19 + $0x7b] sm:$0xff]  ;;  %7451 = vst [vmem:[#allocation17_spill] sm:$0xff] %v4759_v35  ;;  %v4770_v37 = vld [vmem:[%s4591_s19 + $0xab] sm:$0xff] }
  0x35   : > { %7450 = vst [vmem:[#allocation16_spill] sm:$0xff] %v4756_v34  ;;  %v4773_v38 = vld [vmem:[%s4591_s19 + $0x9b] sm:$0xff]  ;;  %v4776_v39 = vld [vmem:[%s4591_s19 + $0x93] sm:$0xff]  ;;  %v4787_v41 = vld [vmem:[%s4591_s19 + $0xcb] sm:$0xff] }
  0x36   : > { %7453 = vst [vmem:[#allocation19_spill] sm:$0xff] %v4770_v37  ;;  %v4790_v42 = vld [vmem:[%s4591_s19 + $0xc3] sm:$0xff]  ;;  %v4793_v43 = vld [vmem:[%s4591_s19 + $0xb3] sm:$0xff]  ;;  %v4810_v47 = vld [vmem:[%s4591_s19 + $0xdb] sm:$0xff] }
  0x37   : > { %7454 = vst [vmem:[#allocation20_spill] sm:$0xff] %v4773_v38  ;;  %v4804_v45 = vld [vmem:[%s4591_s19 + $0xf3] sm:$0xff]  ;;  %v4807_v46 = vld [vmem:[%s4591_s19 + $0xe3] sm:$0xff]  ;;  %v4828_v52 = vld [vmem:[%s4591_s19 + $0x10b] sm:$0xff] }
  0x38   : > { %7455 = vst [vmem:[#allocation21_spill] sm:$0xff] %v4776_v39  ;;  %v4825_v51 = vld [vmem:[%s4591_s19 + $0x113] sm:$0xff]  ;;  %v4831_v53 = vld [vmem:[%s4591_s19 + $0xfb] sm:$0xff] }
  0x39   : > { %610 = vrot.lane.b32.xlu2 %v4624_v6, %s7426_s25  ;;  %608 = vrot.lane.b32.xlu1 %v4627_v7, %s7426_s25  ;;  %7457 = vst [vmem:[#allocation23_spill] sm:$0xff] %v4787_v41 }
  0x3a   : > { %606 = vrot.lane.b32.xlu0 %v4630_v8, %s7426_s25  ;;  %7458 = vst [vmem:[#allocation24_spill] sm:$0xff] %v4790_v42 }
  0x3b   : > { %7459 = vst [vmem:[#allocation25_spill] sm:$0xff] %v4793_v43 }
  0x3c   : > { %7461 = vst [vmem:[#allocation27_spill] sm:$0xff] %v4810_v47 }
  0x3d   : > { %7463 = vst [vmem:[#allocation29_spill] sm:$0xff] %v4831_v53 }
  0x41   : > { %616 = vrot.lane.b32.xlu2 %v4639_v9, %s7426_s25  ;;  %614 = vrot.lane.b32.xlu1 %v4642_v10, %s7426_s25 }
  0x42   : > { %612 = vrot.lane.b32.xlu0 %v4645_v11, %s7426_s25 }
  0x49   : > { %622 = vrot.lane.b32.xlu2 %v4654_v12, %s7426_s25  ;;  %620 = vrot.lane.b32.xlu1 %v4657_v13, %s7426_s25 }
  0x4a   : > { %618 = vrot.lane.b32.xlu0 %v4660_v14, %s7426_s25 }
  0x51   : > { %660 = vrot.lane.b32.xlu2 %v3696_v15, %s7428_s18  ;;  %658 = vrot.lane.b32.xlu1 %v3695_v16, %s7428_s18 }
  0x52   : > { %624 = vrot.lane.b32.xlu0 %v4671_v17, %s7426_s25 }
  0x59   : > { %666 = vrot.lane.b32.xlu2 %v4678_v18, %s7428_s18  ;;  %664 = vrot.lane.b32.xlu1 %v4681_v19, %s7428_s18 }
  0x5a   : > { %662 = vrot.lane.b32.xlu0 %v4684_v20, %s7428_s18 }
  0x61   : > { %672 = vrot.lane.b32.xlu2 %v4693_v21, %s7428_s18  ;;  %670 = vrot.lane.b32.xlu1 %v4696_v22, %s7428_s18 }
  0x62   : > { %668 = vrot.lane.b32.xlu0 %v4699_v23, %s7428_s18 }
  0x69   : > { %678 = vrot.lane.b32.xlu2 %v4708_v24, %s7428_s18  ;;  %676 = vrot.lane.b32.xlu1 %v4711_v25, %s7428_s18 }
  0x6a   : > { %674 = vrot.lane.b32.xlu0 %v4714_v26, %s7428_s18 }
  0x71   : > { %684 = vrot.lane.b32.xlu2 %v4723_v27, %s7428_s18  ;;  %682 = vrot.lane.b32.xlu1 %v4726_v28, %s7428_s18 }
  0x72   : > { %680 = vrot.lane.b32.xlu0 %v4729_v29, %s7428_s18 }
  0x79   : > { %722 = vrot.lane.b32.xlu2 %v4738_v30, %s7430_s21  ;;  %688 = vrot.lane.b32.xlu1 %v4741_v31, %s7428_s18 }
  0x7a   : > { %686 = vrot.lane.b32.xlu0 %v4744_v32, %s7428_s18 }
  0x81   : > { %728 = vrot.lane.b32.xlu2 %v4753_v33, %s7430_s21  ;;  %726 = vrot.lane.b32.xlu1 %v4756_v34, %s7430_s21 }
  0x82   : > { %724 = vrot.lane.b32.xlu0 %v4759_v35, %s7430_s21 }
  0x83   : > { %v4767_v36 = vpop.permute.xlu2 %602 }
  0x84   : > { %7452 = vst [vmem:[#allocation18_spill] sm:$0xff] %v4767_v36 }
  0x89   : > { %734 = vrot.lane.b32.xlu2 %v4770_v37, %s7430_s21  ;;  %732 = vrot.lane.b32.xlu1 %v4773_v38, %s7430_s21 }
  0x8a   : > { %730 = vrot.lane.b32.xlu0 %v4776_v39, %s7430_s21 }
  0x8b   : > { %v4784_v40 = vpop.permute.xlu2 %604 }
  0x8c   : > { %7456 = vst [vmem:[#allocation22_spill] sm:$0xff] %v4784_v40 }
  0x91   : > { %740 = vrot.lane.b32.xlu2 %v4787_v41, %s7430_s21  ;;  %738 = vrot.lane.b32.xlu1 %v4790_v42, %s7430_s21 }
  0x92   : > { %736 = vrot.lane.b32.xlu0 %v4793_v43, %s7430_s21 }
  0x93   : > { %v4801_v44 = vpop.permute.xlu2 %610 }
  0x94   : > { %7460 = vst [vmem:[#allocation26_spill] sm:$0xff] %v4801_v44  ;;  %v4894_v44 = vld [vmem:[%s4591_s19 + $0x10c] sm:$0xff] }
  0x99   : > { %746 = vrot.lane.b32.xlu2 %v4804_v45, %s7430_s21  ;;  %744 = vrot.lane.b32.xlu1 %v4807_v46, %s7430_s21 }
  0x9a   : > { %742 = vrot.lane.b32.xlu0 %v4810_v47, %s7430_s21 }
  0x9b   : > { %v4818_v48 = vpop.permute.xlu2 %616  ;;  %v4820_v49 = vpop.permute.xlu1 %598 }
  0x9c   : > { %7462 = vst [vmem:[#allocation28_spill] sm:$0xff] %v4818_v48  ;;  %v4822_v50 = vpop.permute.xlu0 %594 }
  0xa1   : > { %752 = vrot.lane.b32.xlu2 %v4825_v51, %s7430_s21  ;;  %750 = vrot.lane.b32.xlu1 %v4828_v52, %s7430_s21 }
  0xa2   : > { %748 = vrot.lane.b32.xlu0 %v4831_v53, %s7430_s21 }
  0xa3   : > { %v4839_v54 = vpop.permute.xlu2 %622  ;;  %v4841_v55 = vpop.permute.xlu1 %600 }
  0xa4   : > { %7464 = vst [vmem:[#allocation30_spill] sm:$0xff] %v4839_v54  ;;  %v4843_v56 = vpop.permute.xlu0 %596 }
  0xa9   : > { %790 = vrot.lane.b32.xlu2 %v4594_v0, %s7417_s22  ;;  %788 = vrot.lane.b32.xlu1 %v4612_v4, %s7417_s22 }
  0xaa   : > { %786 = vrot.lane.b32.xlu0 %v4597_v1, %s7417_s22 }
  0xab   : > { %v4851_v57 = vpop.permute.xlu2 %660  ;;  %v4853_v58 = vpop.permute.xlu1 %608 }
  0xac   : > { %7465 = vst [vmem:[#allocation31_spill] sm:$0xff] %v4853_v58  ;;  %v4855_v59 = vpop.permute.xlu0 %606  ;;  %v4909_v58 = vld [vmem:[%s4591_s19 + $0x114] sm:$0xff] }
  0xad   : > { %7466 = vst [vmem:[#allocation32_spill] sm:$0xff] %v4855_v59 }
  0xb1   : > { %796 = vrot.lane.b32.xlu2 %v4627_v7, %s7417_s22  ;;  %794 = vrot.lane.b32.xlu1 %v4630_v8, %s7417_s22 }
  0xb2   : > { %792 = vrot.lane.b32.xlu0 %v4609_v3, %s7417_s22 }
  0xb3   : > { %v4863_v60 = vpop.permute.xlu2 %666  ;;  %v4865_v61 = vpop.permute.xlu1 %614 }
  0xb4   : > { %7467 = vst [vmem:[#allocation33_spill] sm:$0xff] %v4863_v60  ;;  %v4867_v62 = vpop.permute.xlu0 %612 }
  0xb5   : > { %7468 = vst [vmem:[#allocation34_spill] sm:$0xff] %v4865_v61 }
  0xb6   : > { %7469 = vst [vmem:[#allocation35_spill] sm:$0xff] %v4867_v62 }
  0xb9   : > { %802 = vrot.lane.b32.xlu2 %v4642_v10, %s7417_s22  ;;  %800 = vrot.lane.b32.xlu1 %v4645_v11, %s7417_s22 }
  0xba   : > { %798 = vrot.lane.b32.xlu0 %v4624_v6, %s7417_s22 }
  0xbb   : > { %v4875_v63 = vpop.permute.xlu2 %672  ;;  %v4877_v15 = vpop.permute.xlu1 %620 }
  0xbc   : > { %7470 = vst [vmem:[#allocation36_spill] sm:$0xff] %v4875_v63  ;;  %v4879_v16 = vpop.permute.xlu0 %618 }
  0xbd   : > { %7471 = vst [vmem:[#allocation37_spill] sm:$0xff] %v4879_v16 }
  0xc1   : > { %808 = vrot.lane.b32.xlu2 %v4657_v13, %s7417_s22  ;;  %806 = vrot.lane.b32.xlu1 %v4660_v14, %s7417_s22 }
  0xc2   : > { %804 = vrot.lane.b32.xlu0 %v4639_v9, %s7417_s22 }
  0xc3   : > { %v4887_v48 = vpop.permute.xlu2 %678  ;;  %v4889_v61 = vpop.permute.xlu1 %658 }
  0xc4   : > { %7472 = vst [vmem:[#allocation38_spill] sm:$0xff] %v4887_v48  ;;  %v4891_v62 = vpop.permute.xlu0 %624 }
  0xc5   : > { %7473 = vst [vmem:[#allocation39_spill] sm:$0xff] %v4891_v62 }
  0xc9   : > { %814 = vrot.lane.b32.xlu2 %v4894_v44, %s7417_s22  ;;  %812 = vrot.lane.b32.xlu1 %v4671_v17, %s7417_s22 }
  0xca   : > { %810 = vrot.lane.b32.xlu0 %v4654_v12, %s7417_s22 }
  0xcb   : > { %v4902_v16 = vpop.permute.xlu2 %684  ;;  %v4904_v63 = vpop.permute.xlu1 %664 }
  0xcc   : > { %7474 = vst [vmem:[#allocation40_spill] sm:$0xff] %v4904_v63  ;;  %v4906_v48 = vpop.permute.xlu0 %662 }
  0xd1   : > { %852 = vrot.lane.b32.xlu2 %v4681_v19, %s7415_s23  ;;  %850 = vrot.lane.b32.xlu1 %v4684_v20, %s7415_s23 }
  0xd2   : > { %816 = vrot.lane.b32.xlu0 %v4909_v58, %s7417_s22  ;;  %s7626_s22 = smov 24  }
  0xd3   : > { %v4917_v62 = vpop.permute.xlu2 %722  ;;  %v4919_v59 = vpop.permute.xlu1 %670 }
  0xd4   : > { %7475 = vst [vmem:[#allocation41_spill] sm:$0xff] %v4919_v59  ;;  %v4921_v54 = vpop.permute.xlu0 %668 }
  0xd5   : > { %7476 = vst [vmem:[#allocation42_spill] sm:$0xff] %v4921_v54 }
  0xd9   : > { %858 = vrot.lane.b32.xlu2 %v4696_v22, %s7415_s23  ;;  %856 = vrot.lane.b32.xlu1 %v4699_v23, %s7415_s23 }
  0xda   : > { %854 = vrot.lane.b32.xlu0 %v4678_v18, %s7415_s23 }
  0xdb   : > { %v4929_v19 = vpop.permute.xlu2 %728  ;;  %v4931_v20 = vpop.permute.xlu1 %676 }
  0xdc   : > { %7477 = vst [vmem:[#allocation43_spill] sm:$0xff] %v4929_v19  ;;  %v4933_v40 = vpop.permute.xlu0 %674 }
  0xdd   : > { %7478 = vst [vmem:[#allocation44_spill] sm:$0xff] %v4931_v20 }
  0xde   : > { %7479 = vst [vmem:[#allocation45_spill] sm:$0xff] %v4933_v40 }
  0xe1   : > { %864 = vrot.lane.b32.xlu2 %v4711_v25, %s7415_s23  ;;  %862 = vrot.lane.b32.xlu1 %v4714_v26, %s7415_s23 }
  0xe2   : > { %860 = vrot.lane.b32.xlu0 %v4693_v21, %s7415_s23 }
  0xe3   : > { %v4941_v59 = vpop.permute.xlu2 %734  ;;  %v4943_v54 = vpop.permute.xlu1 %682 }
  0xe4   : > { %7480 = vst [vmem:[#allocation46_spill] sm:$0xff] %v4941_v59  ;;  %v4945_v60 = vpop.permute.xlu0 %680 }
  0xe5   : > { %7481 = vst [vmem:[#allocation47_spill] sm:$0xff] %v4943_v54 }
  0xe6   : > { %7482 = vst [vmem:[#allocation48_spill] sm:$0xff] %v4945_v60 }
  0xe9   : > { %870 = vrot.lane.b32.xlu2 %v4726_v28, %s7415_s23  ;;  %868 = vrot.lane.b32.xlu1 %v4729_v29, %s7415_s23 }
  0xea   : > { %866 = vrot.lane.b32.xlu0 %v4708_v24, %s7415_s23 }
  0xeb   : > { %v4953_v20 = vpop.permute.xlu2 %740  ;;  %v4955_v40 = vpop.permute.xlu1 %688 }
  0xec   : > { %7483 = vst [vmem:[#allocation49_spill] sm:$0xff] %v4953_v20  ;;  %v4957_v36 = vpop.permute.xlu0 %686  ;;  %v4972_v20 = vld [vmem:[%s4591_s19 + $0x115] sm:$0xff] }
  0xed   : > { %7484 = vst [vmem:[#allocation50_spill] sm:$0xff] %v4955_v40  ;;  %v4975_v40 = vld [vmem:[%s4591_s19 + $0x10d] sm:$0xff] }
  0xee   : > { %7485 = vst [vmem:[#allocation51_spill] sm:$0xff] %v4957_v36 }
  0xf1   : > { %876 = vrot.lane.b32.xlu2 %v4741_v31, %s7415_s23  ;;  %874 = vrot.lane.b32.xlu1 %v4744_v32, %s7415_s23 }
  0xf2   : > { %872 = vrot.lane.b32.xlu0 %v4723_v27, %s7415_s23 }
  0xf3   : > { %v4965_v54 = vpop.permute.xlu2 %746  ;;  %v4967_v60 = vpop.permute.xlu1 %726 }
  0xf4   : > { %7486 = vst [vmem:[#allocation52_spill] sm:$0xff] %v4965_v54  ;;  %v4969_v59 = vpop.permute.xlu0 %724 }
  0xf9   : > { %914 = vrot.lane.b32.xlu2 %v4756_v34, %s7413_s24  ;;  %880 = vrot.lane.b32.xlu1 %v4972_v20, %s7415_s23 }
  0xfa   : > { %878 = vrot.lane.b32.xlu0 %v4975_v40, %s7415_s23  ;;  %s7632_s23 = smov 28  }
  0xfb   : > { %v4983_v36 = vpop.permute.xlu2 %752  ;;  %v4985_v54 = vpop.permute.xlu1 %732 }
  0xfc   : > { %7487 = vst [vmem:[#allocation53_spill] sm:$0xff] %v4983_v36  ;;  %v4987_v19 = vpop.permute.xlu0 %730 }
 0x101   : > { %920 = vrot.lane.b32.xlu2 %v4773_v38, %s7413_s24  ;;  %918 = vrot.lane.b32.xlu1 %v4776_v39, %s7413_s24 }
 0x102   : > { %916 = vrot.lane.b32.xlu0 %v4753_v33, %s7413_s24 }
 0x103   : > { %v4995_v34 = vpop.permute.xlu2 %790  ;;  %v4997_v63 = vpop.permute.xlu1 %738 }
 0x104   : > { %7488 = vst [vmem:[#allocation54_spill] sm:$0xff] %v4997_v63  ;;  %v4999_v35 = vpop.permute.xlu0 %736 }
 0x105   : > { %7489 = vst [vmem:[#allocation55_spill] sm:$0xff] %v4999_v35 }
 0x109   : > { %926 = vrot.lane.b32.xlu2 %v4790_v42, %s7413_s24  ;;  %924 = vrot.lane.b32.xlu1 %v4793_v43, %s7413_s24 }
 0x10a   : > { %922 = vrot.lane.b32.xlu0 %v4770_v37, %s7413_s24 }
 0x10b   : > { %v5007_v38 = vpop.permute.xlu2 %796  ;;  %v5009_v36 = vpop.permute.xlu1 %744 }
 0x10c   : > { %7490 = vst [vmem:[#allocation56_spill] sm:$0xff] %v5007_v38  ;;  %v5011_v39 = vpop.permute.xlu0 %742 }
 0x10d   : > { %7491 = vst [vmem:[#allocation57_spill] sm:$0xff] %v5009_v36 }
 0x10e   : > { %7492 = vst [vmem:[#allocation58_spill] sm:$0xff] %v5011_v39  ;;  %v3778_v39 = vld [vmem:[%s4591_s19 + $0x12b] sm:$0xff] }
 0x111   : > { %932 = vrot.lane.b32.xlu2 %v4807_v46, %s7413_s24  ;;  %930 = vrot.lane.b32.xlu1 %v4810_v47, %s7413_s24 }
 0x112   : > { %928 = vrot.lane.b32.xlu0 %v4787_v41, %s7413_s24 }
 0x113   : > { %v5019_v42 = vpop.permute.xlu2 %802  ;;  %v5021_v43 = vpop.permute.xlu1 %750 }
 0x114   : > { %7493 = vst [vmem:[#allocation59_spill] sm:$0xff] %v5019_v42  ;;  %v5023_v63 = vpop.permute.xlu0 %748  ;;  %v3777_v42 = vld [vmem:[%s4591_s19 + $0x123] sm:$0xff] }
 0x115   : > { %7494 = vst [vmem:[#allocation60_spill] sm:$0xff] %v5021_v43 }
 0x119   : > { %938 = vrot.lane.b32.xlu2 %v4828_v52, %s7413_s24  ;;  %936 = vrot.lane.b32.xlu1 %v4831_v53, %s7413_s24 }
 0x11a   : > { %934 = vrot.lane.b32.xlu0 %v4804_v45, %s7413_s24 }
 0x11b   : > { %v5031_v36 = vpop.permute.xlu2 %808  ;;  %v5033_v47 = vpop.permute.xlu1 %788 }
 0x11c   : > { %7495 = vst [vmem:[#allocation61_spill] sm:$0xff] %v5031_v36  ;;  %v5035_v41 = vpop.permute.xlu0 %786 }
 0x121   : > { %944 = vrot.lane.b32.xlu2 %v3778_v39, %s7413_s24  ;;  %942 = vrot.lane.b32.xlu1 %v3777_v42, %s7413_s24 }
 0x122   : > { %940 = vrot.lane.b32.xlu0 %v4825_v51, %s7413_s24  ;;  %s7605_s24 = smov 16  }
 0x123   : > { %v5043_v52 = vpop.permute.xlu2 %814  ;;  %v5045_v37 = vpop.permute.xlu1 %794 }
 0x124   : > { %7496 = vst [vmem:[#allocation62_spill] sm:$0xff] %v5043_v52  ;;  %v5047_v35 = vpop.permute.xlu0 %792 }
 0x129   : > { %982 = vrot.lane.b32.xlu2 %v4630_v8, %s7411_s28  ;;  %980 = vrot.lane.b32.xlu1 %v4609_v3, %s7411_s28 }
 0x12a   : > { %978 = vrot.lane.b32.xlu0 %v4594_v0, %s7411_s28 }
 0x12b   : > { %v5055_v39 = vpop.permute.xlu2 %852  ;;  %v5057_v42 = vpop.permute.xlu1 %800 }
 0x12c   : > { %7497 = vst [vmem:[#allocation63_spill] sm:$0xff] %v5057_v42  ;;  %v5059_v51 = vpop.permute.xlu0 %798 }
 0x12d   : > { %7498 = vst [vmem:[#allocation64_spill] sm:$0xff] %v5059_v51 }
 0x131   : > { %988 = vrot.lane.b32.xlu2 %v4645_v11, %s7411_s28  ;;  %986 = vrot.lane.b32.xlu1 %v4624_v6, %s7411_s28 }
 0x132   : > { %984 = vrot.lane.b32.xlu0 %v4627_v7, %s7411_s28 }
 0x133   : > { %v5067_v36 = vpop.permute.xlu2 %858  ;;  %v5069_v53 = vpop.permute.xlu1 %806 }
 0x134   : > { %7499 = vst [vmem:[#allocation65_spill] sm:$0xff] %v5069_v53  ;;  %v5071_v52 = vpop.permute.xlu0 %804 }
 0x135   : > { %7500 = vst [vmem:[#allocation66_spill] sm:$0xff] %v5071_v52 }
 0x139   : > { %994 = vrot.lane.b32.xlu2 %v4660_v14, %s7411_s28  ;;  %992 = vrot.lane.b32.xlu1 %v4639_v9, %s7411_s28 }
 0x13a   : > { %990 = vrot.lane.b32.xlu0 %v4642_v10, %s7411_s28 }
 0x13b   : > { %v5079_v42 = vpop.permute.xlu2 %864  ;;  %v5081_v51 = vpop.permute.xlu1 %812 }
 0x13c   : > { %7501 = vst [vmem:[#allocation67_spill] sm:$0xff] %v5079_v42  ;;  %v5083_v43 = vpop.permute.xlu0 %810  ;;  %v3793_v42 = vld [vmem:[%s4591_s19 + $0x124] sm:$0xff] }
 0x13d   : > { %7502 = vst [vmem:[#allocation68_spill] sm:$0xff] %v5083_v43 }
 0x141   : > { %1000 = vrot.lane.b32.xlu2 %v4671_v17, %s7411_s28  ;;  %998 = vrot.lane.b32.xlu1 %v4654_v12, %s7411_s28 }
 0x142   : > { %996 = vrot.lane.b32.xlu0 %v4657_v13, %s7411_s28 }
 0x143   : > { %v5091_v53 = vpop.permute.xlu2 %870  ;;  %v5093_v52 = vpop.permute.xlu1 %850 }
 0x144   : > { %7503 = vst [vmem:[#allocation69_spill] sm:$0xff] %v5091_v53  ;;  %v5095_v38 = vpop.permute.xlu0 %816  ;;  %v3794_v53 = vld [vmem:[%s4591_s19 + $0x12c] sm:$0xff] }
 0x149   : > { %1006 = vrot.lane.b32.xlu2 %v3793_v42, %s7411_s28  ;;  %1004 = vrot.lane.b32.xlu1 %v4909_v58, %s7411_s28 }
 0x14a   : > { %1002 = vrot.lane.b32.xlu0 %v4894_v44, %s7411_s28 }
 0x14b   : > { %v5103_v17 = vpop.permute.xlu2 %876  ;;  %v5105_v12 = vpop.permute.xlu1 %856 }
 0x14c   : > { %v5107_v43 = vpop.permute.xlu0 %854 }
 0x151   : > { %1044 = vrot.lane.b32.xlu2 %v4699_v23, %s7409_s29  ;;  %1042 = vrot.lane.b32.xlu1 %v4678_v18, %s7409_s29 }
 0x152   : > { %1008 = vrot.lane.b32.xlu0 %v3794_v53, %s7411_s28  ;;  %s7641_s28 = smov 32  }
 0x153   : > { %v5115_v58 = vpop.permute.xlu2 %914  ;;  %v5117_v42 = vpop.permute.xlu1 %862 }
 0x154   : > { %v5119_v44 = vpop.permute.xlu0 %860 }
 0x159   : > { %1050 = vrot.lane.b32.xlu2 %v4714_v26, %s7409_s29  ;;  %1048 = vrot.lane.b32.xlu1 %v4693_v21, %s7409_s29 }
 0x15a   : > { %1046 = vrot.lane.b32.xlu0 %v4696_v22, %s7409_s29 }
 0x15b   : > { %v5127_v23 = vpop.permute.xlu2 %920  ;;  %v5129_v18 = vpop.permute.xlu1 %868 }
 0x15c   : > { %7504 = vst [vmem:[#allocation70_spill] sm:$0xff] %v5129_v18  ;;  %v5131_v53 = vpop.permute.xlu0 %866  ;;  %v3847_v18 = vld [vmem:[%s4591_s19 + $0x3c] sm:$0xff] }
 0x15d   : > { %7505 = vst [vmem:[#allocation71_spill] sm:$0xff] %v5131_v53 }
 0x161   : > { %1056 = vrot.lane.b32.xlu2 %v4729_v29, %s7409_s29  ;;  %1054 = vrot.lane.b32.xlu1 %v4708_v24, %s7409_s29 }
 0x162   : > { %1052 = vrot.lane.b32.xlu0 %v4711_v25, %s7409_s29 }
 0x163   : > { %v5139_v21 = vpop.permute.xlu2 %926  ;;  %v5141_v22 = vpop.permute.xlu1 %874 }
 0x164   : > { %7506 = vst [vmem:[#allocation72_spill] sm:$0xff] %v5141_v22  ;;  %v5143_v26 = vpop.permute.xlu0 %872  ;;  %v3810_v22 = vld [vmem:[%s4591_s19 + $0x12d] sm:$0xff] }
 0x165   : > { %7507 = vst [vmem:[#allocation73_spill] sm:$0xff] %v5143_v26  ;;  %v3809_v26 = vld [vmem:[%s4591_s19 + $0x125] sm:$0xff] }
 0x169   : > { %1062 = vrot.lane.b32.xlu2 %v4744_v32, %s7409_s29  ;;  %1060 = vrot.lane.b32.xlu1 %v4723_v27, %s7409_s29 }
 0x16a   : > { %1058 = vrot.lane.b32.xlu0 %v4726_v28, %s7409_s29 }
 0x16b   : > { %v5151_v24 = vpop.permute.xlu2 %932  ;;  %v5153_v25 = vpop.permute.xlu1 %880 }
 0x16c   : > { %7508 = vst [vmem:[#allocation74_spill] sm:$0xff] %v5151_v24  ;;  %v5155_v29 = vpop.permute.xlu0 %878 }
 0x16d   : > { %7509 = vst [vmem:[#allocation75_spill] sm:$0xff] %v5153_v25 }
 0x171   : > { %1068 = vrot.lane.b32.xlu2 %v4972_v20, %s7409_s29  ;;  %1066 = vrot.lane.b32.xlu1 %v4975_v40, %s7409_s29 }
 0x172   : > { %1064 = vrot.lane.b32.xlu0 %v4741_v31, %s7409_s29  ;;  %v3846_v31 = vld [vmem:[%s4591_s19 + $0x34] sm:$0xff] }
 0x173   : > { %v5163_v27 = vpop.permute.xlu2 %938  ;;  %v5165_v28 = vpop.permute.xlu1 %918 }
 0x174   : > { %7510 = vst [vmem:[#allocation76_spill] sm:$0xff] %v5163_v27  ;;  %v5167_v32 = vpop.permute.xlu0 %916 }
 0x179   : > { %1072 = vrot.lane.b32.xlu1 %v3810_v22, %s7409_s29 }
 0x17a   : > { %1070 = vrot.lane.b32.xlu0 %v3809_v26, %s7409_s29  ;;  %s7683_s29 = smov 4  }
 0x17b   : > { %v5173_v24 = vpop.permute.xlu2 %944  ;;  %v5175_v20 = vpop.permute.xlu1 %924 }
 0x17c   : > { %7511 = vst [vmem:[#allocation77_spill] sm:$0xff] %v5173_v24  ;;  %v5177_v40 = vpop.permute.xlu0 %922 }
 0x181   : > { %1570 = vrot.lane.b32.xlu1 %v3847_v18, %s7426_s25 }
 0x182   : > { %1568 = vrot.lane.b32.xlu0 %v3846_v31, %s7426_s25 }
 0x183   : > { %v5183_v27 = vpop.permute.xlu2 %982  ;;  %v5185_v53 = vpop.permute.xlu1 %930 }
 0x184   : > { %7512 = vst [vmem:[#allocation78_spill] sm:$0xff] %v5185_v53  ;;  %v5187_v25 = vpop.permute.xlu0 %928 }
 0x185   : > { %7513 = vst [vmem:[#allocation79_spill] sm:$0xff] %v5187_v25 }
 0x189   : > { %1574 = vrot.lane.b32.xlu1 %v4615_v5, %s7426_s25 }
 0x18a   : > { %1572 = vrot.lane.b32.xlu0 %v4600_v2, %s7426_s25 }
 0x18b   : > { %v5193_v22 = vpop.permute.xlu2 %988  ;;  %v5195_v26 = vpop.permute.xlu1 %936 }
 0x18c   : > { %7514 = vst [vmem:[#allocation80_spill] sm:$0xff] %v5195_v26  ;;  %v5197_v24 = vpop.permute.xlu0 %934 }
 0x18d   : > { %7515 = vst [vmem:[#allocation81_spill] sm:$0xff] %v5197_v24  ;;  %v1229_v24 = vld [vmem:[%s7384_s2 + $0x18] sm:$0xff] }
 0x191   : > { %1578 = vrot.lane.b32.xlu1 %v4612_v4, %s7426_s25 }
 0x192   : > { %1576 = vrot.lane.b32.xlu0 %v4597_v1, %s7426_s25  ;;  %v1230_v1 = vld [vmem:[%s7384_s2 + $0x20] sm:$0xf] }
 0x193   : > { %v5203_v18 = vpop.permute.xlu2 %994  ;;  %v5205_v31 = vpop.permute.xlu1 %942  ;;  %3811 = vmatpush.msk.msra.mxu0 %vm1284_vm0, %v1230_v1  ;;  %4118 = vmatpush.msk.msra.mxu3 %vm1284_vm0, %v1230_v1 }
 0x194   : > { %7516 = vst [vmem:[#allocation82_spill] sm:$0xff] %v5203_v18  ;;  %v5207_v5 = vpop.permute.xlu0 %940 }
 0x195   : > { %1300 = vmatpush.msra.mxu0 %v1229_v24  ;;  %4119 = vmatpush.msra.mxu3 %v1229_v24 }
 0x199   : > { %1582 = vrot.lane.b32.xlu1 %v4609_v3, %s7426_s25  ;;  %v1227_v3 = vld [vmem:[%s7384_s2 + $0x8] sm:$0xff] }
 0x19a   : > { %1580 = vrot.lane.b32.xlu0 %v4594_v0, %s7426_s25  ;;  %v1228_v0 = vld [vmem:[%s7384_s2 + $0x10] sm:$0xff] }
 0x19b   : > { %v5213_v2 = vpop.permute.xlu2 %1000  ;;  %v5215_v26 = vpop.permute.xlu1 %980  ;;  %1301 = vmatpush.msra.mxu0 %v1228_v0  ;;  %4120 = vmatpush.msra.mxu3 %v1228_v0 }
 0x19c   : > { %7517 = vst [vmem:[#allocation83_spill] sm:$0xff] %v5213_v2  ;;  %v979_v4 = vpop.permute.xlu0 %978 }
 0x19d   : > { %1302 = vmatpush.msra.mxu0 %v1227_v3  ;;  %4121 = vmatpush.msra.mxu3 %v1227_v3 }
 0x1a1   : > { %1586 = vrot.lane.b32.xlu1 %v4627_v7, %s7426_s25  ;;  %v1226_v7 = vld [vmem:[%s7384_s2] sm:$0xff] }
 0x1a2   : > { %1584 = vrot.lane.b32.xlu0 %v4630_v8, %s7426_s25  ;;  %1303 = vmatpush.msra.mxu0 %v1226_v7 }
 0x1a3   : > { %v5235_v2 = vpop.permute.xlu2 %1006  ;;  %v5237_v1 = vpop.permute.xlu1 %986  ;;  %4122 = vmatpush.msra.mxu3 %v1226_v7 }
 0x1a4   : > { %v5239_v18 = vpop.permute.xlu0 %984 }
 0x1a9   : > { %1590 = vrot.lane.b32.xlu1 %v4645_v11, %s7426_s25 }
 0x1aa   : > { %1588 = vrot.lane.b32.xlu0 %v4624_v6, %s7426_s25  ;;  %v3663_v6 = vld [vmem:[%s4591_s19 + $0x4b] sm:$0xff] }
 0x1ab   : > { %v1045_v8 = vpop.permute.xlu2 %1044  ;;  %v5248_v24 = vpop.permute.xlu1 %992 }
 0x1ac   : > { %7518 = vst [vmem:[#allocation84_spill] sm:$0xff] %v5248_v24  ;;  %v5250_v0 = vpop.permute.xlu0 %990 }
 0x1b1   : > { %1594 = vrot.lane.b32.xlu1 %v4639_v9, %s7426_s25 }
 0x1b2   : > { %1592 = vrot.lane.b32.xlu0 %v4642_v10, %s7426_s25 }
 0x1b3   : > { %v5256_v3 = vpop.permute.xlu2 %1050  ;;  %v5258_v7 = vpop.permute.xlu1 %998 }
 0x1b4   : > { %7519 = vst [vmem:[#allocation85_spill] sm:$0xff] %v5258_v7  ;;  %v5260_v11 = vpop.permute.xlu0 %996  ;;  %v1091_v7 = vsel %vm1090_vm1, %v3663_v6, %v4822_v50 }
 0x1b5   : > { %7520 = vst [vmem:[#allocation86_spill] sm:$0xff] %v5260_v11  ;;  %v1108_v11 = vsel %vm1107_vm3, %v1091_v7, %v4889_v61 }
 0x1b6   : > { %v1125_v24 = vsel %vm1124_vm2, %v1108_v11, %v4917_v62 }
 0x1b7   : > { %v1142_v25 = vsel %vm1141_vm4, %v1125_v24, %v5035_v41 }
 0x1b9   : > { %1598 = vrot.lane.b32.xlu1 %v4657_v13, %s7426_s25  ;;  %v3863_v13 = vld [vmem:[%s4591_s19 + $0x3e] sm:$0xff] }
 0x1ba   : > { %1596 = vrot.lane.b32.xlu0 %v4660_v14, %s7426_s25  ;;  %v3862_v14 = vld [vmem:[%s4591_s19 + $0x36] sm:$0xff] }
 0x1bb   : > { %v5267_v9 = vpop.permute.xlu2 %1056  ;;  %v1005_v53 = vpop.permute.xlu1 %1004 }
 0x1bc   : > { %7521 = vst [vmem:[#allocation87_spill] sm:$0xff] %v5267_v9  ;;  %v5269_v10 = vpop.permute.xlu0 %1002  ;;  %v3664_v9 = vld [vmem:[%s4591_s19 + $0x53] sm:$0xff] }
 0x1bd   : > { %7522 = vst [vmem:[#allocation88_spill] sm:$0xff] %v5269_v10  ;;  %v1159_v10 = vsel %vm1158_vm6, %v1142_v25, %v5093_v52  ;;  %v1092_v61 = vsel %vm1090_vm1, %v3664_v9, %v4843_v56  ;;  %v3864_v9 = vld [vmem:[%s4591_s19 + $0x4e] sm:$0xff] }
 0x1be   : > { %v1176_v50 = vsel %vm1175_vm5, %v1159_v10, %v5115_v58  ;;  %v1104_v58 = vsel %vm1090_vm1, %v4807_v46, %v4877_v15  ;;  %v1109_v7 = vsel %vm1107_vm3, %v1092_v61, %v4851_v57 }
 0x1bf   : > { %v1193_v41 = vsel %vm1192_vm7, %v1176_v50, %v979_v4  ;;  %v1121_v56 = vsel %vm1107_vm3, %v1104_v58, %v4902_v16  ;;  %v3865_v4 = vld [vmem:[%s4591_s19 + $0x56] sm:$0xff]  ;;  %v1126_v11 = vsel %vm1124_vm2, %v1109_v7, %v4969_v59  ;;  %v7525_v58 = vld [vmem:[#allocation43_spill] sm:$0xff]  ;;  %v5371_v7 = vld [vmem:[%s4591_s19 + $0x7e] sm:$0xff] }
 0x1c0   : > { %v1138_v6 = vsel %vm1124_vm2, %v1121_v56, %v5023_v63  ;;  %v1143_v10 = vsel %vm1141_vm4, %v1126_v11, %v5033_v47 }
 0x1c1   : > { %1634 = vrot.lane.b32.xlu1 %v3863_v13, %s7428_s18  ;;  %v1155_v46 = vsel %vm1141_vm4, %v1138_v6, %v5081_v51  ;;  %v1160_v57 = vsel %vm1158_vm6, %v1143_v10, %v5055_v39  ;;  %v7526_v10 = vld [vmem:[#allocation18_spill] sm:$0xff] }
 0x1c2   : > { %1632 = vrot.lane.b32.xlu0 %v3862_v14, %s7428_s18  ;;  %v1172_v15 = vsel %vm1158_vm6, %v1155_v46, %v5103_v17  ;;  %v1177_v59 = vsel %vm1175_vm5, %v1160_v57, %v5167_v32  ;;  %v1093_v32 = vsel %vm1090_vm1, %v4738_v30, %v4820_v49  ;;  %v7528_v57 = vld [vmem:[#allocation33_spill] sm:$0xff] }
 0x1c3   : > { %v5291_v62 = vpop.permute.xlu2 %1062  ;;  %v1043_v24 = vpop.permute.xlu1 %1042  ;;  %v1189_v63 = vsel %vm1175_vm5, %v1172_v15, %v5207_v5  ;;  %v1194_v47 = vsel %vm1192_vm7, %v1177_v59, %v5215_v26  ;;  %v1110_v26 = vsel %vm1107_vm3, %v1093_v32, %v4906_v48  ;;  %v5397_v15 = vld [vmem:[%s4591_s19 + $0x9e] sm:$0xff]  ;;  %v5402_v59 = vld [vmem:[%s4591_s19 + $0x96] sm:$0xff] }
 0x1c4   : > { %v5293_v52 = vpop.permute.xlu0 %1008  ;;  %v1210_v25 = vsel %vm1209_vm9, %v1193_v41, %v1043_v24  ;;  %v1206_v16 = vsel %vm1192_vm7, %v1189_v63, %v1005_v53  ;;  %v1211_v13 = vsel %vm1209_vm9, %v1194_v47, %v1045_v8  ;;  %v5337_v53 = vld [vmem:[%s4591_s19 + $0x6e] sm:$0xff]  ;;  %v1127_v5 = vsel %vm1124_vm2, %v1110_v26, %v4967_v60  ;;  %v5342_v8 = vld [vmem:[%s4591_s19 + $0x66] sm:$0xff]  ;;  %v7523_v41 = vld [vmem:[#allocation17_spill] sm:$0xff] }
 0x1c5   : > { %3812 = vmatmul.msk.f32.vlgmr.msra.gmra.mxu0 %vm1235_vm8, %v1210_v25  ;;  %v1144_v50 = vsel %vm1141_vm4, %v1127_v5, %v4995_v34  ;;  %v7524_v24 = vld [vmem:[#allocation40_spill] sm:$0xff]  ;;  %v5366_v25 = vld [vmem:[%s4591_s19 + $0x86] sm:$0xff] }
 0x1c6   : > { %v1161_v30 = vsel %vm1158_vm6, %v1144_v50, %v5107_v43  ;;  %v1094_v43 = vsel %vm1090_vm1, %v7523_v41, %v4841_v55  ;;  %v5432_v32 = vld [vmem:[%s4591_s19 + $0xb6] sm:$0xff]  ;;  %v7532_v26 = vld [vmem:[#allocation51_spill] sm:$0xff] }
 0x1c7   : > { %v1178_v48 = vsel %vm1175_vm5, %v1161_v30, %v5165_v28  ;;  %v1111_v28 = vsel %vm1107_vm3, %v1094_v43, %v7524_v24  ;;  %v5439_v50 = vld [vmem:[%s4591_s19 + $0xae] sm:$0xff] }
 0x1c8   : > { %v1195_v49 = vsel %vm1192_vm7, %v1178_v48, %v5183_v27  ;;  %v1128_v27 = vsel %vm1124_vm2, %v1111_v28, %v7525_v58  ;;  %v7534_v48 = vld [vmem:[#allocation60_spill] sm:$0xff] }
 0x1c9   : > { %1638 = vrot.lane.b32.xlu1 %v3865_v4, %s7428_s18  ;;  %v1145_v56 = vsel %vm1141_vm4, %v1128_v27, %v5047_v35 }
 0x1ca   : > { %1636 = vrot.lane.b32.xlu0 %v3864_v9, %s7428_s18  ;;  %v1162_v55 = vsel %vm1158_vm6, %v1145_v56, %v5105_v12  ;;  %v7527_v12 = vld [vmem:[#allocation16_spill] sm:$0xff] }
 0x1cb   : > { %v1069_v39 = vpop.permute.xlu2 %1068  ;;  %v1049_v51 = vpop.permute.xlu1 %1048  ;;  %v1179_v4 = vsel %vm1175_vm5, %v1162_v55, %v5127_v23  ;;  %v1095_v46 = vsel %vm1090_vm1, %v7527_v12, %v7526_v10  ;;  %v7536_v56 = vld [vmem:[#allocation32_spill] sm:$0xff]  ;;  %v7537_v55 = vld [vmem:[#allocation21_spill] sm:$0xff] }
 0x1cc   : > { %v1047_v17 = vpop.permute.xlu0 %1046  ;;  %v1223_v14 = vsel %vm1209_vm9, %v1206_v16, %v1069_v39  ;;  %v1196_v11 = vsel %vm1192_vm7, %v1179_v4, %v5239_v18  ;;  %v1112_v23 = vsel %vm1107_vm3, %v1095_v46, %v7528_v57  ;;  %v7542_v46 = vld [vmem:[#allocation50_spill] sm:$0xff] }
 0x1cd   : > { %3813 = vmatmul.msk.f32.gmra.mxu0 %vm1235_vm8, %v1211_v13  ;;  %3825 = vmatmul.msk.f32.vlgmr.msra.gmra.mxu3 %vm1235_vm8, %v1223_v14  ;;  %v1212_v34 = vsel %vm1209_vm9, %v1195_v49, %v1047_v17  ;;  %v1213_v35 = vsel %vm1209_vm9, %v1196_v11, %v1049_v51  ;;  %v1129_v18 = vsel %vm1124_vm2, %v1112_v23, %v4987_v19  ;;  %v7531_v14 = vld [vmem:[#allocation42_spill] sm:$0xff]  ;;  %v7538_v11 = vld [vmem:[#allocation39_spill] sm:$0xff] }
 0x1ce   : > { %v1146_v63 = vsel %vm1141_vm4, %v1129_v18, %v5045_v37  ;;  %v5483_v23 = vld [vmem:[%s4591_s19 + $0xc6] sm:$0xff]  ;;  %v7543_v18 = vld [vmem:[#allocation53_spill] sm:$0xff] }
 0x1cf   : > { %v1163_v47 = vsel %vm1158_vm6, %v1146_v63, %v5067_v36  ;;  %v7529_v36 = vld [vmem:[#allocation22_spill] sm:$0xff] }
 0x1d0   : > { %v1180_v16 = vsel %vm1175_vm5, %v1163_v47, %v5177_v40  ;;  %v1096_v17 = vsel %vm1090_vm1, %v4753_v33, %v7529_v36  ;;  %v7530_v40 = vld [vmem:[#allocation30_spill] sm:$0xff]  ;;  %v7533_v33 = vld [vmem:[#allocation56_spill] sm:$0xff] }
 0x1d1   : > { %1642 = vrot.lane.b32.xlu1 %v5337_v53, %s7428_s18  ;;  %v1197_v19 = vsel %vm1192_vm7, %v1180_v16, %v5237_v1  ;;  %v1105_v13 = vsel %vm1090_vm1, %v4804_v45, %v7530_v40  ;;  %v1113_v1 = vsel %vm1107_vm3, %v1096_v17, %v7531_v14  ;;  %v7535_v45 = vld [vmem:[#allocation62_spill] sm:$0xff]  ;;  %v7544_v47 = vld [vmem:[#allocation64_spill] sm:$0xff]  ;;  %v7545_v17 = vld [vmem:[#allocation75_spill] sm:$0xff] }
 0x1d2   : > { %1640 = vrot.lane.b32.xlu0 %v5342_v8, %s7428_s18  ;;  %v1214_v37 = vsel %vm1209_vm9, %v1197_v19, %v5256_v3  ;;  %v1122_v5 = vsel %vm1107_vm3, %v1105_v13, %v7532_v26  ;;  %v1130_v3 = vsel %vm1124_vm2, %v1113_v1, %v4985_v54  ;;  %v7546_v13 = vld [vmem:[#allocation77_spill] sm:$0xff] }
 0x1d3   : > { %v5356_v60 = vpop.permute.xlu1 %1054  ;;  %v1147_v30 = vsel %vm1141_vm4, %v1130_v3, %v7533_v33  ;;  %v1139_v49 = vsel %vm1124_vm2, %v1122_v5, %v7534_v48  ;;  %v7547_v5 = vld [vmem:[#allocation31_spill] sm:$0xff]  ;;  %v7548_v3 = vld [vmem:[#allocation20_spill] sm:$0xff] }
 0x1d4   : > { %v1053_v61 = vpop.permute.xlu0 %1052  ;;  %v1164_v41 = vsel %vm1158_vm6, %v1147_v30, %v5119_v44  ;;  %v1098_v33 = vsel %vm1090_vm1, %v7548_v3, %v7547_v5  ;;  %v7549_v48 = vld [vmem:[#allocation36_spill] sm:$0xff]  ;;  %v3881_v5 = vld [vmem:[%s4591_s19 + $0x82] sm:$0xff]  ;;  %v7567_v3 = vld [vmem:[#allocation49_spill] sm:$0xff] }
 0x1d5   : > { %3814 = vmatmul.msk.f32.gmra.mxu0 %vm1235_vm8, %v1212_v34  ;;  %v1156_v34 = vsel %vm1141_vm4, %v1139_v49, %v7535_v45  ;;  %v1181_v43 = vsel %vm1175_vm5, %v1164_v41, %v5175_v20  ;;  %v1097_v20 = vsel %vm1090_vm1, %v7537_v55, %v7536_v56  ;;  %v7550_v49 = vld [vmem:[#allocation55_spill] sm:$0xff] }
 0x1d6   : > { %v1173_v54 = vsel %vm1158_vm6, %v1156_v34, %v5155_v29  ;;  %v1198_v24 = vsel %vm1192_vm7, %v1181_v43, %v5193_v22  ;;  %v7539_v22 = vld [vmem:[#allocation29_spill] sm:$0xff]  ;;  %v7551_v34 = vld [vmem:[#allocation63_spill] sm:$0xff] }
 0x1d7   : > { %v1190_v44 = vsel %vm1175_vm5, %v1173_v54, %v5205_v31  ;;  %v1215_v29 = vsel %vm1209_vm9, %v1198_v24, %v1053_v61  ;;  %v7540_v31 = vld [vmem:[#allocation41_spill] sm:$0xff]  ;;  %v7541_v61 = vld [vmem:[#allocation46_spill] sm:$0xff]  ;;  %v7552_v54 = vld [vmem:[#allocation67_spill] sm:$0xff] }
 0x1d8   : > { %v1207_v58 = vsel %vm1192_vm7, %v1190_v44, %v5235_v2  ;;  %v1114_v10 = vsel %vm1107_vm3, %v1097_v20, %v7540_v31  ;;  %v5476_v2 = vld [vmem:[%s4591_s19 + $0xce] sm:$0xff]  ;;  %v7556_v20 = vld [vmem:[#allocation26_spill] sm:$0xff] }
 0x1d9   : > { %1646 = vrot.lane.b32.xlu1 %v5366_v25, %s7428_s18  ;;  %v1131_v12 = vsel %vm1124_vm2, %v1114_v10, %v7541_v61  ;;  %v7553_v24 = vld [vmem:[#allocation79_spill] sm:$0xff]  ;;  %v7559_v10 = vld [vmem:[#allocation54_spill] sm:$0xff] }
 0x1da   : > { %1644 = vrot.lane.b32.xlu0 %v5371_v7, %s7428_s18  ;;  %v1148_v16 = vsel %vm1141_vm4, %v1131_v12, %v7544_v47  ;;  %v7555_v56 = vld [vmem:[#allocation87_spill] sm:$0xff]  ;;  %v3878_v12 = vld [vmem:[%s4591_s19 + $0x62] sm:$0xff] }
 0x1db   : > { %v5385_v6 = vpop.permute.xlu1 %1060  ;;  %v3879_v31 = vld [vmem:[%s4591_s19 + $0x6a] sm:$0xff]  ;;  %v7562_v47 = vld [vmem:[#allocation78_spill] sm:$0xff] }
 0x1dc   : > { %v5387_v9 = vpop.permute.xlu0 %1058 }
 0x1dd   : > { %3815 = vmatmul.msk.f32.gmra.mxu0 %vm1235_vm8, %v1213_v35  ;;  %v1106_v35 = vsel %vm1090_vm1, %v7539_v22, %v7538_v11  ;;  %v7558_v22 = vld [vmem:[#allocation45_spill] sm:$0xff] }
 0x1de   : > { %v1123_v57 = vsel %vm1107_vm3, %v1106_v35, %v7542_v46  ;;  %v7560_v46 = vld [vmem:[#allocation59_spill] sm:$0xff] }
 0x1df   : > { %v1140_v63 = vsel %vm1124_vm2, %v1123_v57, %v7543_v18  ;;  %v7561_v18 = vld [vmem:[#allocation71_spill] sm:$0xff] }
 0x1e0   : > { %v1157_v19 = vsel %vm1141_vm4, %v1140_v63, %v5095_v38 }
 0x1e1   : > { %1650 = vrot.lane.b32.xlu1 %v5397_v15, %s7428_s18  ;;  %v1174_v40 = vsel %vm1158_vm6, %v1157_v19, %v7545_v17  ;;  %v7563_v19 = vld [vmem:[#allocation82_spill] sm:$0xff] }
 0x1e2   : > { %1648 = vrot.lane.b32.xlu0 %v5402_v59, %s7428_s18  ;;  %v1191_v38 = vsel %vm1175_vm5, %v1174_v40, %v7546_v13  ;;  %v7564_v13 = vld [vmem:[#allocation35_spill] sm:$0xff] }
 0x1e3   : > { %v5416_v39 = vpop.permute.xlu1 %1066  ;;  %v1208_v1 = vsel %vm1192_vm7, %v1191_v38, %v5293_v52  ;;  %v5522_v52 = vld [vmem:[%s4591_s19 + $0xe6] sm:$0xff]  ;;  %v7565_v38 = vld [vmem:[#allocation25_spill] sm:$0xff] }
 0x1e4   : > { %v5418_v51 = vpop.permute.xlu0 %1064 }
 0x1e5   : > { %3816 = vmatmul.msk.f32.gmra.mxu0 %vm1235_vm8, %v1214_v37  ;;  %v1165_v37 = vsel %vm1158_vm6, %v1148_v16, %v5117_v42 }
 0x1e6   : > { %v1182_v36 = vsel %vm1175_vm5, %v1165_v37, %v5139_v21 }
 0x1e7   : > { %v1199_v42 = vsel %vm1192_vm7, %v1182_v36, %v5250_v0  ;;  %v1115_v0 = vsel %vm1107_vm3, %v1098_v33, %v7549_v48  ;;  %v7568_v48 = vld [vmem:[#allocation66_spill] sm:$0xff] }
 0x1e8   : > { %v1216_v21 = vsel %vm1209_vm9, %v1199_v42, %v5356_v60  ;;  %v1132_v45 = vsel %vm1124_vm2, %v1115_v0, %v7550_v49  ;;  %v5527_v60 = vld [vmem:[%s4591_s19 + $0xde] sm:$0xff]  ;;  %v1100_v42 = vsel %vm1090_vm1, %v7565_v38, %v7564_v13  ;;  %v7585_v13 = vld [vmem:[#allocation48_spill] sm:$0xff] }
 0x1e9   : > { %1654 = vrot.lane.b32.xlu1 %v5432_v32, %s7428_s18  ;;  %v1149_v41 = vsel %vm1141_vm4, %v1132_v45, %v7551_v34  ;;  %v7570_v45 = vld [vmem:[#allocation74_spill] sm:$0xff] }
 0x1ea   : > { %1652 = vrot.lane.b32.xlu0 %v5439_v50, %s7428_s18  ;;  %v1166_v43 = vsel %vm1158_vm6, %v1149_v41, %v7552_v54  ;;  %v7571_v41 = vld [vmem:[#allocation86_spill] sm:$0xff] }
 0x1eb   : > { %v1073_v28 = vpop.permute.xlu1 %1072  ;;  %v1183_v44 = vsel %vm1175_vm5, %v1166_v43, %v7553_v24 }
 0x1ec   : > { %v1071_v27 = vpop.permute.xlu0 %1070  ;;  %v1225_v30 = vsel %vm1209_vm9, %v1208_v1, %v1073_v28  ;;  %v7554_v28 = vld [vmem:[#allocation84_spill] sm:$0xff] }
 0x1ed   : > { %3817 = vmatmul.msk.f32.gmra.mxu0 %vm1235_vm8, %v1215_v29  ;;  %v1224_v4 = vsel %vm1209_vm9, %v1207_v58, %v1071_v27  ;;  %v1200_v58 = vsel %vm1192_vm7, %v1183_v44, %v7554_v28  ;;  %v7566_v1 = vld [vmem:[#allocation44_spill] sm:$0xff]  ;;  %v7573_v28 = vld [vmem:[#allocation34_spill] sm:$0xff] }
 0x1ee   : > { %3826 = vmatmul.msk.f32.gmra.mxu3 %vm1235_vm8, %v1224_v4  ;;  %v1217_v55 = vsel %vm1209_vm9, %v1200_v58, %v7555_v56  ;;  %v7557_v4 = vld [vmem:[#allocation19_spill] sm:$0xff]  ;;  %v7574_v58 = vld [vmem:[#allocation24_spill] sm:$0xff] }
 0x1ef   : > { %v1099_v11 = vsel %vm1090_vm1, %v7557_v4, %v7556_v20  ;;  %v1101_v56 = vsel %vm1090_vm1, %v7574_v58, %v7573_v28  ;;  %v5606_v4 = vld [vmem:[%s4591_s19 + $0x9a] sm:$0xff]  ;;  %v7595_v58 = vld [vmem:[#allocation47_spill] sm:$0xff] }
 0x1f0   : > { %v1116_v35 = vsel %vm1107_vm3, %v1099_v11, %v7558_v22  ;;  %v7576_v11 = vld [vmem:[#allocation58_spill] sm:$0xff] }
 0x1f1   : > { %1658 = vrot.lane.b32.xlu1 %v5476_v2, %s7428_s18  ;;  %v1133_v61 = vsel %vm1124_vm2, %v1116_v35, %v7559_v10  ;;  %v5611_v35 = vld [vmem:[%s4591_s19 + $0x92] sm:$0xff]  ;;  %v7578_v10 = vld [vmem:[#allocation69_spill] sm:$0xff] }
 0x1f2   : > { %1656 = vrot.lane.b32.xlu0 %v5483_v23, %s7428_s18  ;;  %v1150_v57 = vsel %vm1141_vm4, %v1133_v61, %v7560_v46 }
 0x1f3   : > { %v5505_v14 = vpop.permute.xlu1 %1570  ;;  %v1167_v63 = vsel %vm1158_vm6, %v1150_v57, %v7561_v18  ;;  %v7580_v57 = vld [vmem:[#allocation85_spill] sm:$0xff] }
 0x1f4   : > { %v5509_v26 = vpop.permute.xlu0 %1568  ;;  %v1184_v16 = vsel %vm1175_vm5, %v1167_v63, %v7562_v47 }
 0x1f5   : > { %3818 = vmatmul.msk.f32.gmra.mxu0 %vm1235_vm8, %v1216_v21  ;;  %v1201_v37 = vsel %vm1192_vm7, %v1184_v16, %v7563_v19  ;;  %v1117_v21 = vsel %vm1107_vm3, %v1100_v42, %v7566_v1  ;;  %v7583_v19 = vld [vmem:[#allocation28_spill] sm:$0xff]  ;;  %v5638_v42 = vld [vmem:[%s4591_s19 + $0xc2] sm:$0xff]  ;;  %v7586_v1 = vld [vmem:[#allocation57_spill] sm:$0xff] }
 0x1f6   : > { %3827 = vmatmul.msk.f32.gmra.mxu3 %vm1235_vm8, %v1225_v30  ;;  %v1218_v40 = vsel %vm1209_vm9, %v1201_v37, %v5387_v9  ;;  %v1134_v33 = vsel %vm1124_vm2, %v1117_v21, %v7567_v3  ;;  %v3880_v30 = vld [vmem:[%s4591_s19 + $0x7a] sm:$0xff]  ;;  %v7569_v9 = vld [vmem:[#allocation70_spill] sm:$0xff]  ;;  %v7584_v37 = vld [vmem:[#allocation23_spill] sm:$0xff] }
 0x1f7   : > { %v1151_v0 = vsel %vm1141_vm4, %v1134_v33, %v7568_v48  ;;  %v7587_v3 = vld [vmem:[#allocation61_spill] sm:$0xff]  ;;  %v7589_v48 = vld [vmem:[#allocation80_spill] sm:$0xff] }
 0x1f8   : > { %v1168_v49 = vsel %vm1158_vm6, %v1151_v0, %v7569_v9  ;;  %v7588_v33 = vld [vmem:[#allocation73_spill] sm:$0xff]  ;;  %v7590_v9 = vld [vmem:[#allocation83_spill] sm:$0xff] }
 0x1f9   : > { %1662 = vrot.lane.b32.xlu1 %v5522_v52, %s7428_s18  ;;  %v1185_v34 = vsel %vm1175_vm5, %v1168_v49, %v7570_v45 }
 0x1fa   : > { %1660 = vrot.lane.b32.xlu0 %v5527_v60, %s7428_s18  ;;  %v1202_v54 = vsel %vm1192_vm7, %v1185_v34, %v7571_v41 }
 0x1fb   : > { %v5541_v27 = vpop.permute.xlu1 %1574  ;;  %v1219_v44 = vsel %vm1209_vm9, %v1202_v54, %v5385_v6  ;;  %v7593_v54 = vld [vmem:[#allocation37_spill] sm:$0xff] }
 0x1fc   : > { %v5543_v29 = vpop.permute.xlu0 %1572 }
 0x1fd   : > { %3819 = vmatmul.msk.f32.gmra.mxu0 %vm1235_vm8, %v1217_v55  ;;  %v7575_v55 = vld [vmem:[#allocation38_spill] sm:$0xff] }
 0x1fe   : > { %v1118_v20 = vsel %vm1107_vm3, %v1101_v56, %v7575_v55  ;;  %v5670_v55 = vld [vmem:[%s4591_s19 + $0xda] sm:$0xff] }
 0x1ff   : > { %v1135_v22 = vsel %vm1124_vm2, %v1118_v20, %v7576_v11  ;;  %v7596_v20 = vld [vmem:[#allocation52_spill] sm:$0xff] }
 0x201   : > { %1698 = vrot.lane.b32.xlu1 %v3879_v31, %s7430_s21  ;;  %v7577_v31 = vld [vmem:[#allocation65_spill] sm:$0xff] }
 0x202   : > { %1696 = vrot.lane.b32.xlu0 %v3878_v12, %s7430_s21  ;;  %v1152_v6 = vsel %vm1141_vm4, %v1135_v22, %v7577_v31  ;;  %v7579_v12 = vld [vmem:[#allocation81_spill] sm:$0xff]  ;;  %v5675_v22 = vld [vmem:[%s4591_s19 + $0xca] sm:$0xff]  ;;  %v7597_v31 = vld [vmem:[#allocation68_spill] sm:$0xff] }
 0x203   : > { %v5567_v36 = vpop.permute.xlu1 %1578  ;;  %v1169_v61 = vsel %vm1158_vm6, %v1152_v6, %v7578_v10  ;;  %v7598_v6 = vld [vmem:[#allocation72_spill] sm:$0xff] }
 0x204   : > { %v5569_v17 = vpop.permute.xlu0 %1576  ;;  %v1186_v46 = vsel %vm1175_vm5, %v1169_v61, %v7579_v12  ;;  %v7599_v61 = vld [vmem:[#allocation76_spill] sm:$0xff] }
 0x205   : > { %3820 = vmatmul.msk.f32.gmra.mxu0 %vm1235_vm8, %v1218_v40  ;;  %v1203_v18 = vsel %vm1192_vm7, %v1186_v46, %v7580_v57  ;;  %v1102_v40 = vsel %vm1090_vm1, %v7584_v37, %v7583_v19  ;;  %v7600_v46 = vld [vmem:[#allocation88_spill] sm:$0xff] }
 0x206   : > { %v1220_v16 = vsel %vm1209_vm9, %v1203_v18, %v5291_v62  ;;  %v1119_v38 = vsel %vm1107_vm3, %v1102_v40, %v7585_v13  ;;  %v5697_v37 = vld [vmem:[%s4591_s19 + $0xf2] sm:$0xff]  ;;  %v5700_v40 = vld [vmem:[%s4591_s19 + $0xe2] sm:$0xff] }
 0x207   : > { %v1136_v21 = vsel %vm1124_vm2, %v1119_v38, %v7586_v1  ;;  %v5711_v1 = vld [vmem:[%s4591_s19 + $0x10a] sm:$0xff] }
 0x208   : > { %v1153_v62 = vsel %vm1141_vm4, %v1136_v21, %v7587_v3 }
 0x209   : > { %1702 = vrot.lane.b32.xlu1 %v3881_v5, %s7430_s21  ;;  %v5643_v5 = vld [vmem:[%s4591_s19 + $0xb2] sm:$0xff] }
 0x20a   : > { %1700 = vrot.lane.b32.xlu0 %v3880_v30, %s7430_s21  ;;  %v1170_v30 = vsel %vm1158_vm6, %v1153_v62, %v7588_v33  ;;  %v5725_v62 = vld [vmem:[%s4591_s19 + $0x64] sm:$0xff]  ;;  %v5728_v33 = vld [vmem:[%s4591_s19 + $0x112] sm:$0xff] }
 0x20b   : > { %v5593_v43 = vpop.permute.xlu1 %1582  ;;  %v1187_v0 = vsel %vm1175_vm5, %v1170_v30, %v7589_v48 }
 0x20c   : > { %7572 = vst [vmem:[#allocation17_spill] sm:$0xff] %v5593_v43  ;;  %v5595_v24 = vpop.permute.xlu0 %1580  ;;  %v1204_v49 = vsel %vm1192_vm7, %v1187_v0, %v7590_v9  ;;  %v5739_v0 = vld [vmem:[%s4591_s19 + $0x7c] sm:$0xff]  ;;  %v3895_v9 = vld [vmem:[%s4591_s19 + $0x6c] sm:$0xff] }
 0x20d   : > { %3821 = vmatmul.msk.f32.gmra.mxu0 %vm1235_vm8, %v1219_v44  ;;  %v1221_v41 = vsel %vm1209_vm9, %v1204_v49, %v5418_v51  ;;  %v7594_v44 = vld [vmem:[#allocation27_spill] sm:$0xff]  ;;  %v5745_v49 = vld [vmem:[%s7385_s3] ss:$0 sm:$0xff]  ;;  %v5885_v43 = vld [vmem:[%s4591_s19 + $0xf6] sm:$0xff] }
 0x20e   : > { %v1103_v28 = vsel %vm1090_vm1, %v7594_v44, %v7593_v54 }
 0x20f   : > { %v1120_v56 = vsel %vm1107_vm3, %v1103_v28, %v7595_v58 }
 0x210   : > { %v1137_v11 = vsel %vm1124_vm2, %v1120_v56, %v7596_v20  ;;  %v5756_v56 = vld [vmem:[%s4591_s19 + $0x94] sm:$0xff]  ;;  %v5759_v20 = vld [vmem:[%s4591_s19 + $0x84] sm:$0xff] }
 0x211   : > { %1706 = vrot.lane.b32.xlu1 %v5606_v4, %s7430_s21  ;;  %v1154_v51 = vsel %vm1141_vm4, %v1137_v11, %v7597_v31 }
 0x212   : > { %1704 = vrot.lane.b32.xlu0 %v5611_v35, %s7430_s21  ;;  %v1171_v10 = vsel %vm1158_vm6, %v1154_v51, %v7598_v6 }
 0x213   : > { %v5625_v63 = vpop.permute.xlu1 %1586  ;;  %v1188_v12 = vsel %vm1175_vm5, %v1171_v10, %v7599_v61  ;;  %v5771_v61 = vld [vmem:[%s4591_s19 + $0xac] sm:$0xff] }
 0x214   : > { %7581 = vst [vmem:[#allocation40_spill] sm:$0xff] %v5625_v63  ;;  %v5627_v47 = vpop.permute.xlu0 %1584  ;;  %v1205_v57 = vsel %vm1192_vm7, %v1188_v12, %v7600_v46  ;;  %v5774_v12 = vld [vmem:[%s4591_s19 + $0x9c] sm:$0xff] }
 0x215   : > { %7582 = vst [vmem:[#allocation43_spill] sm:$0xff] %v5627_v47  ;;  %3822 = vmatmul.msk.f32.gmra.mxu0 %vm1235_vm8, %v1220_v16  ;;  %v1222_v19 = vsel %vm1209_vm9, %v1205_v57, %v5416_v39  ;;  %v5714_v39 = vld [vmem:[%s4591_s19 + $0xfa] sm:$0xff] }
 0x219   : > { %1712 = vrot.lane.b32.xlu1 %v5638_v42, %s7430_s21 }
 0x21a   : > { %1710 = vrot.lane.b32.xlu0 %v5643_v5, %s7430_s21 }
 0x21b   : > { %v5657_v45 = vpop.permute.xlu1 %1590 }
 0x21c   : > { %7591 = vst [vmem:[#allocation18_spill] sm:$0xff] %v5657_v45  ;;  %v5659_v34 = vpop.permute.xlu0 %1588 }
 0x21d   : > { %7592 = vst [vmem:[#allocation16_spill] sm:$0xff] %v5659_v34  ;;  %3823 = vmatmul.msk.f32.gmra.mxu0 %vm1235_vm8, %v1221_v41 }
 0x221   : > { %1716 = vrot.lane.b32.xlu1 %v5670_v55, %s7430_s21 }
 0x222   : > { %1714 = vrot.lane.b32.xlu0 %v5675_v22, %s7430_s21 }
 0x223   : > { %v5689_v18 = vpop.permute.xlu1 %1594 }
 0x224   : > { %7601 = vst [vmem:[#allocation33_spill] sm:$0xff] %v5689_v18  ;;  %v5691_v16 = vpop.permute.xlu0 %1592 }
 0x225   : > { %7602 = vst [vmem:[#allocation22_spill] sm:$0xff] %v5691_v16  ;;  %3824 = vmatmul.msk.f32.gmra.mxu0 %vm1235_vm8, %v1222_v19  ;;  %v5801_v16 = vld [vmem:[%s4591_s19 + $0xdc] sm:$0xff] }
 0x229   : > { %1720 = vrot.lane.b32.xlu1 %v5697_v37, %s7430_s21 }
 0x22a   : > { %1718 = vrot.lane.b32.xlu0 %v5700_v40, %s7430_s21 }
 0x22b   : > { %v5706_v13 = vpop.permute.xlu1 %1598 }
 0x22c   : > { %7603 = vst [vmem:[#allocation30_spill] sm:$0xff] %v5706_v13  ;;  %v5708_v38 = vpop.permute.xlu0 %1596 }
 0x22d   : > { %7604 = vst [vmem:[#allocation42_spill] sm:$0xff] %v5708_v38  ;;  %v5816_v38 = vld [vmem:[%s4591_s19 + $0xf4] sm:$0xff] }
 0x231   : > { %1724 = vrot.lane.b32.xlu1 %v5711_v1, %s7430_s21 }
 0x232   : > { %1722 = vrot.lane.b32.xlu0 %v5714_v39, %s7430_s21 }
 0x233   : > { %v5720_v21 = vpop.permute.xlu1 %1634 }
 0x234   : > { %v5722_v3 = vpop.permute.xlu0 %1632 }
 0x239   : > { %1760 = vrot.lane.b32.xlu1 %v5725_v62, %s7605_s24 }
 0x23a   : > { %1726 = vrot.lane.b32.xlu0 %v5728_v33, %s7430_s21 }
 0x23b   : > { %v5734_v30 = vpop.permute.xlu1 %1638 }
 0x23c   : > { %v5736_v48 = vpop.permute.xlu0 %1636 }
 0x241   : > { %1764 = vrot.lane.b32.xlu1 %v5739_v0, %s7605_s24 }
 0x242   : > { %1762 = vrot.lane.b32.xlu0 %v3895_v9, %s7605_s24  ;;  %v1305_v41 = vpop.f32.mrf.mxu0 }
 0x243   : > { %v1306_v54 = vadd.f32 %v5745_v49, %v1305_v41  ;;  %v5751_v44 = vpop.permute.xlu1 %1642 }
 0x244   : > { %v5753_v28 = vpop.permute.xlu0 %1640 }
 0x245   : > { %v1353_v58 = vmax.f32 %v1306_v54, 0.0  ;;  %v5786_v54 = vld [vmem:[%s4591_s19 + $0xc4] sm:$0xff] }
 0x247   : > { %1369 = vxpose.xlu2.b32.start [1/16] (narrow) %v1353_v58, 8  ;;  %v5789_v58 = vld [vmem:[%s4591_s19 + $0xb4] sm:$0xff] }
 0x249   : > { %1768 = vrot.lane.b32.xlu1 %v5756_v56, %s7605_s24 }
 0x24a   : > { %1766 = vrot.lane.b32.xlu0 %v5759_v20, %s7605_s24  ;;  %v1308_v11 = vpop.f32.mrf.mxu0 }
 0x24b   : > { %v1309_v31 = vadd.f32 %v5745_v49, %v1308_v11  ;;  %v5766_v51 = vpop.permute.xlu1 %1646 }
 0x24c   : > { %7606 = vst [vmem:[#allocation51_spill] sm:$0xff] %v5766_v51  ;;  %v5768_v6 = vpop.permute.xlu0 %1644 }
 0x24d   : > { %7607 = vst [vmem:[#allocation56_spill] sm:$0xff] %v5768_v6  ;;  %v1354_v10 = vmax.f32 %v1309_v31, 0.0 }
 0x24f   : > { %1370 = vxpose.xlu2.b32.cont [2/16] (narrow) %v1354_v10, 8 }
 0x251   : > { %1772 = vrot.lane.b32.xlu1 %v5771_v61, %s7605_s24 }
 0x252   : > { %1770 = vrot.lane.b32.xlu0 %v5774_v12, %s7605_s24  ;;  %v1311_v46 = vpop.f32.mrf.mxu0 }
 0x253   : > { %v1312_v57 = vadd.f32 %v5745_v49, %v1311_v46  ;;  %v5781_v19 = vpop.permute.xlu1 %1650 }
 0x254   : > { %7608 = vst [vmem:[#allocation60_spill] sm:$0xff] %v5781_v19  ;;  %v5783_v9 = vpop.permute.xlu0 %1648 }
 0x255   : > { %7609 = vst [vmem:[#allocation62_spill] sm:$0xff] %v5783_v9  ;;  %v1355_v41 = vmax.f32 %v1312_v57, 0.0 }
 0x257   : > { %1371 = vxpose.xlu2.b32.cont [3/16] (narrow) %v1355_v41, 8  ;;  %v5804_v41 = vld [vmem:[%s4591_s19 + $0xcc] sm:$0xff] }
 0x259   : > { %1776 = vrot.lane.b32.xlu1 %v5786_v54, %s7605_s24 }
 0x25a   : > { %1774 = vrot.lane.b32.xlu0 %v5789_v58, %s7605_s24  ;;  %v1314_v11 = vpop.f32.mrf.mxu0 }
 0x25b   : > { %v1315_v31 = vadd.f32 %v5745_v49, %v1314_v11  ;;  %v5796_v10 = vpop.permute.xlu1 %1654 }
 0x25c   : > { %7610 = vst [vmem:[#allocation32_spill] sm:$0xff] %v5796_v10  ;;  %v5798_v46 = vpop.permute.xlu0 %1652 }
 0x25d   : > { %7611 = vst [vmem:[#allocation21_spill] sm:$0xff] %v5798_v46  ;;  %v1356_v57 = vmax.f32 %v1315_v31, 0.0 }
 0x25f   : > { %1372 = vxpose.xlu2.b32.cont [4/16] (narrow) %v1356_v57, 8  ;;  %v5819_v57 = vld [vmem:[%s4591_s19 + $0xe4] sm:$0xff] }
 0x261   : > { %1780 = vrot.lane.b32.xlu1 %v5801_v16, %s7605_s24 }
 0x262   : > { %1778 = vrot.lane.b32.xlu0 %v5804_v41, %s7605_s24  ;;  %v1317_v45 = vpop.f32.mrf.mxu0 }
 0x263   : > { %v1318_v11 = vadd.f32 %v5745_v49, %v1317_v45  ;;  %v5811_v10 = vpop.permute.xlu1 %1658 }
 0x264   : > { %7612 = vst [vmem:[#allocation39_spill] sm:$0xff] %v5811_v10  ;;  %v5813_v13 = vpop.permute.xlu0 %1656 }
 0x265   : > { %7613 = vst [vmem:[#allocation29_spill] sm:$0xff] %v5813_v13  ;;  %v1357_v31 = vmax.f32 %v1318_v11, 0.0  ;;  %v5831_v13 = vld [vmem:[%s4591_s19 + $0x10c] sm:$0xff] }
 0x267   : > { %1373 = vxpose.xlu2.b32.cont [5/16] (narrow) %v1357_v31, 8  ;;  %v5834_v31 = vld [vmem:[%s4591_s19 + $0xfc] sm:$0xff] }
 0x269   : > { %1784 = vrot.lane.b32.xlu1 %v5816_v38, %s7605_s24 }
 0x26a   : > { %1782 = vrot.lane.b32.xlu0 %v5819_v57, %s7605_s24  ;;  %v1320_v46 = vpop.f32.mrf.mxu0 }
 0x26b   : > { %v1321_v45 = vadd.f32 %v5745_v49, %v1320_v46  ;;  %v5826_v34 = vpop.permute.xlu1 %1662 }
 0x26c   : > { %7614 = vst [vmem:[#allocation41_spill] sm:$0xff] %v5826_v34  ;;  %v5828_v10 = vpop.permute.xlu0 %1660 }
 0x26d   : > { %7615 = vst [vmem:[#allocation46_spill] sm:$0xff] %v5828_v10  ;;  %v1358_v11 = vmax.f32 %v1321_v45, 0.0  ;;  %v5846_v45 = vld [vmem:[%s4591_s19 + $0x114] sm:$0xff] }
 0x26f   : > { %1374 = vxpose.xlu2.b32.cont [6/16] (narrow) %v1358_v11, 8 }
 0x271   : > { %1788 = vrot.lane.b32.xlu1 %v5831_v13, %s7605_s24 }
 0x272   : > { %1786 = vrot.lane.b32.xlu0 %v5834_v31, %s7605_s24  ;;  %v1323_v19 = vpop.f32.mrf.mxu0 }
 0x273   : > { %v1324_v18 = vadd.f32 %v5745_v49, %v1323_v19  ;;  %v5841_v46 = vpop.permute.xlu1 %1698 }
 0x274   : > { %v5843_v34 = vpop.permute.xlu0 %1696 }
 0x275   : > { %v1359_v10 = vmax.f32 %v1324_v18, 0.0 }
 0x277   : > { %1375 = vxpose.xlu2.b32.cont [7/16] (narrow) %v1359_v10, 8 }
 0x279   : > { %1824 = vrot.lane.b32.xlu1 %v5342_v8, %s7616_s30 }
 0x27a   : > { %1790 = vrot.lane.b32.xlu0 %v5846_v45, %s7605_s24  ;;  %v1326_v11 = vpop.f32.mrf.mxu0 }
 0x27b   : > { %v1327_v63 = vadd.f32 %v5745_v49, %v1326_v11  ;;  %v5853_v9 = vpop.permute.xlu1 %1702 }
 0x27c   : > { %v5855_v19 = vpop.permute.xlu0 %1700 }
 0x27d   : > { %v1360_v47 = vmax.f32 %v1327_v63, 0.0 }
 0x27f   : > { %1376 = vxpose.xlu2.b32.cont [8/16] (narrow) %v1360_v47, 8 }
 0x281   : > { %1830 = vrot.lane.b32.xlu1 %v5366_v25, %s7616_s30 }
 0x282   : > { %1828 = vrot.lane.b32.xlu0 %v5371_v7, %s7616_s30  ;;  %v1329_v18 = vpop.f32.mrf.mxu0 }
 0x283   : > { %v1330_v8 = vadd.f32 %v5745_v49, %v1329_v18  ;;  %v5862_v10 = vpop.permute.xlu1 %1706 }
 0x284   : > { %v5864_v51 = vpop.permute.xlu0 %1704 }
 0x285   : > { %v1361_v11 = vmax.f32 %v1330_v8, 0.0 }
 0x287   : > { %1377 = vxpose.xlu2.b32.cont [9/16] (narrow) %v1361_v11, 8 }
 0x289   : > { %1836 = vrot.lane.b32.xlu1 %v5439_v50, %s7616_s30 }
 0x28a   : > { %1834 = vrot.lane.b32.xlu0 %v5397_v15, %s7616_s30  ;;  %v1332_v25 = vpop.f32.mrf.mxu0 }
 0x28b   : > { %v1333_v63 = vadd.f32 %v5745_v49, %v1332_v25  ;;  %v5871_v7 = vpop.permute.xlu1 %1712 }
 0x28c   : > { %7617 = vst [vmem:[#allocation50_spill] sm:$0xff] %v5871_v7  ;;  %v5873_v47 = vpop.permute.xlu0 %1710 }
 0x28d   : > { %7618 = vst [vmem:[#allocation53_spill] sm:$0xff] %v5873_v47  ;;  %v1362_v18 = vmax.f32 %v1333_v63, 0.0 }
 0x28f   : > { %1378 = vxpose.xlu2.b32.cont [10/16] (narrow) %v1362_v18, 8 }
 0x291   : > { %1842 = vrot.lane.b32.xlu1 %v5476_v2, %s7616_s30 }
 0x292   : > { %1840 = vrot.lane.b32.xlu0 %v5483_v23, %s7616_s30  ;;  %v1335_v8 = vpop.f32.mrf.mxu0 }
 0x293   : > { %v1336_v15 = vadd.f32 %v5745_v49, %v1335_v8  ;;  %v5880_v11 = vpop.permute.xlu1 %1716 }
 0x294   : > { %7619 = vst [vmem:[#allocation64_spill] sm:$0xff] %v5880_v11  ;;  %v5882_v25 = vpop.permute.xlu0 %1714 }
 0x295   : > { %7620 = vst [vmem:[#allocation75_spill] sm:$0xff] %v5882_v25  ;;  %v1363_v7 = vmax.f32 %v1336_v15, 0.0  ;;  %v3925_v25 = vld [vmem:[%s4591_s19 + $0x116] sm:$0xff]  ;;  %v5898_v15 = vld [vmem:[%s4591_s19 + $0x10e] sm:$0xff] }
 0x297   : > { %1379 = vxpose.xlu2.b32.cont [11/16] (narrow) %v1363_v7, 8 }
 0x299   : > { %1848 = vrot.lane.b32.xlu1 %v5885_v43, %s7616_s30 }
 0x29a   : > { %1846 = vrot.lane.b32.xlu0 %v5522_v52, %s7616_s30  ;;  %v1338_v63 = vpop.f32.mrf.mxu0 }
 0x29b   : > { %v1339_v23 = vadd.f32 %v5745_v49, %v1338_v63  ;;  %v5892_v18 = vpop.permute.xlu1 %1720  ;;  %v1344_v63 = vpop.f32.mrf.mxu3 }
 0x29c   : > { %7621 = vst [vmem:[#allocation77_spill] sm:$0xff] %v5892_v18  ;;  %v5894_v8 = vpop.permute.xlu0 %1718 }
 0x29d   : > { %7622 = vst [vmem:[#allocation31_spill] sm:$0xff] %v5894_v8  ;;  %v1364_v11 = vmax.f32 %v1339_v23, 0.0  ;;  %v5909_v8 = vld [vmem:[%s4591_s19 + $0xaa] sm:$0xff] }
 0x29e   : > { %7625 = vst [vmem:[#allocation55_spill] sm:$0xff] %v5909_v8 }
 0x29f   : > { %1380 = vxpose.xlu2.b32.cont [12/16] (narrow) %v1364_v11, 8  ;;  %v1345_v11 = vadd.f32 %v5745_v49, %v1344_v63 }
 0x2a1   : > { %1854 = vrot.lane.b32.xlu1 %v3925_v25, %s7616_s30 }
 0x2a2   : > { %1852 = vrot.lane.b32.xlu0 %v5898_v15, %s7616_s30  ;;  %v1341_v7 = vpop.f32.mrf.mxu0 }
 0x2a3   : > { %v1342_v52 = vadd.f32 %v5745_v49, %v1341_v7  ;;  %v5904_v47 = vpop.permute.xlu1 %1724  ;;  %v1347_v23 = vpop.f32.mrf.mxu3 }
 0x2a4   : > { %7623 = vst [vmem:[#allocation20_spill] sm:$0xff] %v5904_v47  ;;  %v5906_v6 = vpop.permute.xlu0 %1722  ;;  %v1366_v47 = vmax.f32 %v1345_v11, 0.0 }
 0x2a5   : > { %7624 = vst [vmem:[#allocation36_spill] sm:$0xff] %v5906_v6  ;;  %v1365_v18 = vmax.f32 %v1342_v52, 0.0  ;;  %v1348_v52 = vadd.f32 %v5745_v49, %v1347_v23 }
 0x2a7   : > { %1381 = vxpose.xlu2.b32.cont [13/16] (narrow) %v1365_v18, 8 }
 0x2a9   : > { %1892 = vrot.lane.b32.xlu1 %v5909_v8, %s7626_s22 }
 0x2aa   : > { %1890 = vrot.lane.b32.xlu0 %v5606_v4, %s7626_s22  ;;  %v1367_v4 = vmax.f32 %v1348_v52, 0.0 }
 0x2ab   : > { %v5916_v25 = vpop.permute.xlu1 %1760  ;;  %v1350_v6 = vpop.f32.mrf.mxu3 }
 0x2ac   : > { %v5918_v7 = vpop.permute.xlu0 %1726  ;;  %v1351_v11 = vadd.f32 %v5745_v49, %v1350_v6  ;;  %v3941_v6 = vld [vmem:[%s4591_s19 + $0x12a] sm:$0xff] }
 0x2ad   : > { %7627 = vst [vmem:[#allocation63_spill] sm:$0xff] %v5918_v7 }
 0x2af   : > { %1382 = vxpose.xlu2.b32.cont [14/16] (narrow) %v1366_v47, 8  ;;  %v1368_v47 = vmax.f32 %v1351_v11, 0.0 }
 0x2b1   : > { %1898 = vrot.lane.b32.xlu1 %v5675_v22, %s7626_s22 }
 0x2b2   : > { %1896 = vrot.lane.b32.xlu0 %v5638_v42, %s7626_s22 }
 0x2b3   : > { %v5925_v18 = vpop.permute.xlu1 %1764 }
 0x2b4   : > { %v5927_v63 = vpop.permute.xlu0 %1762 }
 0x2b7   : > { %1383 = vxpose.xlu2.b32.cont [15/16] (narrow) %v1367_v4, 8 }
 0x2b9   : > { %1904 = vrot.lane.b32.xlu1 %v5697_v37, %s7626_s22  ;;  %v3942_v37 = vld [vmem:[%s4591_s19 + $0x13a] sm:$0xff] }
 0x2ba   : > { %1902 = vrot.lane.b32.xlu0 %v5700_v40, %s7626_s22 }
 0x2bb   : > { %v5934_v22 = vpop.permute.xlu1 %1768 }
 0x2bc   : > { %v5936_v42 = vpop.permute.xlu0 %1766 }
 0x2bf   : > { %1384 = vxpose.xlu2.b32.end [16/16] (narrow) %v1368_v47, 8 }
 0x2c1   : > { %1910 = vrot.lane.b32.xlu1 %v5728_v33, %s7626_s22 }
 0x2c2   : > { %1908 = vrot.lane.b32.xlu0 %v5711_v1, %s7626_s22 }
 0x2c3   : > { %v5942_v23 = vpop.permute.xlu1 %1772 }
 0x2c4   : > { %7628 = vst [vmem:[#allocation67_spill] sm:$0xff] %v5942_v23  ;;  %v5944_v49 = vpop.permute.xlu0 %1770  ;;  %v2402_v23 = vld [vmem:[%s4591_s19 + $0x10] sm:$0xff] }
 0x2c5   : > { %7629 = vst [vmem:[#allocation79_spill] sm:$0xff] %v5944_v49 }
 0x2c9   : > { %1916 = vrot.lane.b32.xlu1 %v3942_v37, %s7626_s22 }
 0x2ca   : > { %1914 = vrot.lane.b32.xlu0 %v3941_v6, %s7626_s22  ;;  %v5987_v6 = vld [vmem:[%s4591_s19 + $0x12c] sm:$0xff] }
 0x2cb   : > { %v5950_v40 = vpop.permute.xlu1 %1776 }
 0x2cc   : > { %7630 = vst [vmem:[#allocation84_spill] sm:$0xff] %v5950_v40  ;;  %v5952_v52 = vpop.permute.xlu0 %1774 }
 0x2cd   : > { %7631 = vst [vmem:[#allocation87_spill] sm:$0xff] %v5952_v52 }
 0x2d1   : > { %1954 = vrot.lane.b32.xlu1 %v5774_v12, %s7632_s23 }
 0x2d2   : > { %1952 = vrot.lane.b32.xlu0 %v5756_v56, %s7632_s23 }
 0x2d3   : > { %v5958_v1 = vpop.permute.xlu1 %1780 }
 0x2d4   : > { %7633 = vst [vmem:[#allocation26_spill] sm:$0xff] %v5958_v1  ;;  %v5960_v33 = vpop.permute.xlu0 %1778 }
 0x2d5   : > { %7634 = vst [vmem:[#allocation19_spill] sm:$0xff] %v5960_v33 }
 0x2d9   : > { %1960 = vrot.lane.b32.xlu1 %v5786_v54, %s7632_s23 }
 0x2da   : > { %1958 = vrot.lane.b32.xlu0 %v5789_v58, %s7632_s23 }
 0x2db   : > { %v5966_v4 = vpop.permute.xlu1 %1784 }
 0x2dc   : > { %7635 = vst [vmem:[#allocation45_spill] sm:$0xff] %v5966_v4  ;;  %v5968_v11 = vpop.permute.xlu0 %1782  ;;  %v5990_v4 = vld [vmem:[%s4591_s19 + $0x124] sm:$0xff] }
 0x2dd   : > { %7636 = vst [vmem:[#allocation54_spill] sm:$0xff] %v5968_v11 }
 0x2e1   : > { %1966 = vrot.lane.b32.xlu1 %v5819_v57, %s7632_s23 }
 0x2e2   : > { %1964 = vrot.lane.b32.xlu0 %v5801_v16, %s7632_s23 }
 0x2e3   : > { %v5974_v56 = vpop.permute.xlu1 %1788 }
 0x2e4   : > { %7637 = vst [vmem:[#allocation59_spill] sm:$0xff] %v5974_v56  ;;  %v5976_v47 = vpop.permute.xlu0 %1786  ;;  %v6001_v56 = vld [vmem:[%s4591_s19 + $0x144] sm:$0xff] }
 0x2e5   : > { %7638 = vst [vmem:[#allocation71_spill] sm:$0xff] %v5976_v47 }
 0x2e6   : > { %7640 = vst [vmem:[#allocation82_spill] sm:$0xff] %v6001_v56 }
 0x2e9   : > { %1972 = vrot.lane.b32.xlu1 %v5831_v13, %s7632_s23 }
 0x2ea   : > { %1970 = vrot.lane.b32.xlu0 %v5834_v31, %s7632_s23 }
 0x2eb   : > { %v5982_v58 = vpop.permute.xlu1 %1824 }
 0x2ec   : > { %v5984_v37 = vpop.permute.xlu0 %1790 }
 0x2ed   : > { %7639 = vst [vmem:[#allocation78_spill] sm:$0xff] %v5984_v37 }
 0x2f1   : > { %1978 = vrot.lane.b32.xlu1 %v5987_v6, %s7632_s23 }
 0x2f2   : > { %1976 = vrot.lane.b32.xlu0 %v5990_v4, %s7632_s23 }
 0x2f3   : > { %v5996_v11 = vpop.permute.xlu1 %1830 }
 0x2f4   : > { %v5998_v7 = vpop.permute.xlu0 %1828 }
 0x2f9   : > { %2016 = vrot.lane.b32.xlu1 %v5402_v59, %s7641_s28 }
 0x2fa   : > { %1982 = vrot.lane.b32.xlu0 %v6001_v56, %s7632_s23  ;;  %v2386_v56 = vld [vmem:[%s4591_s19 + $0x4] sm:$0xff] }
 0x2fb   : > { %v6007_v37 = vpop.permute.xlu1 %1836 }
 0x2fc   : > { %7642 = vst [vmem:[#allocation35_spill] sm:$0xff] %v6007_v37  ;;  %v6009_v1 = vpop.permute.xlu0 %1834  ;;  %v3969_v37 = vld [vmem:[%s4591_s19 + $0xfe] sm:$0xff] }
 0x2fd   : > { %7643 = vst [vmem:[#allocation25_spill] sm:$0xff] %v6009_v1  ;;  %v4032_v1 = vld [vmem:[%s4591_s19 + $0x70] sm:$0xff] }
 0x301   : > { %2022 = vrot.lane.b32.xlu1 %v5432_v32, %s7641_s28 }
 0x302   : > { %2020 = vrot.lane.b32.xlu0 %v5439_v50, %s7641_s28 }
 0x303   : > { %v6015_v47 = vpop.permute.xlu1 %1842 }
 0x304   : > { %7644 = vst [vmem:[#allocation44_spill] sm:$0xff] %v6015_v47  ;;  %v6017_v33 = vpop.permute.xlu0 %1840 }
 0x305   : > { %7645 = vst [vmem:[#allocation49_spill] sm:$0xff] %v6017_v33  ;;  %v6036_v33 = vld [vmem:[%s4591_s19 + $0x8] sm:$0xff] }
 0x306   : > { %7650 = vst [vmem:[#allocation34_spill] sm:$0xff] %v6036_v33 }
 0x309   : > { %2028 = vrot.lane.b32.xlu1 %v5527_v60, %s7641_s28 }
 0x30a   : > { %2026 = vrot.lane.b32.xlu0 %v5476_v2, %s7641_s28 }
 0x30b   : > { %v6023_v40 = vpop.permute.xlu1 %1848 }
 0x30c   : > { %7646 = vst [vmem:[#allocation66_spill] sm:$0xff] %v6023_v40  ;;  %v6025_v52 = vpop.permute.xlu0 %1846 }
 0x30d   : > { %7647 = vst [vmem:[#allocation70_spill] sm:$0xff] %v6025_v52  ;;  %v6047_v52 = vld [vmem:[%s4591_s19 + $0x68] sm:$0xff] }
 0x30e   : > { %7651 = vst [vmem:[#allocation24_spill] sm:$0xff] %v6047_v52 }
 0x311   : > { %2034 = vrot.lane.b32.xlu1 %v3969_v37, %s7641_s28 }
 0x312   : > { %2032 = vrot.lane.b32.xlu0 %v5885_v43, %s7641_s28 }
 0x313   : > { %v6031_v50 = vpop.permute.xlu1 %1854 }
 0x314   : > { %7648 = vst [vmem:[#allocation74_spill] sm:$0xff] %v6031_v50  ;;  %v6033_v47 = vpop.permute.xlu0 %1852 }
 0x315   : > { %7649 = vst [vmem:[#allocation86_spill] sm:$0xff] %v6033_v47  ;;  %v6058_v47 = vld [vmem:[%s4591_s19 + $0xc8] sm:$0xff] }
 0x316   : > { %7653 = vst [vmem:[#allocation58_spill] sm:$0xff] %v6058_v47 }
 0x319   : > { %2573 = vrot.lane.b32.xlu1 %v6036_v33, %s7428_s18 }
 0x31a   : > { %2509 = vrot.lane.b32.xlu0 %v2386_v56, %s7426_s25 }
 0x31b   : > { %v6042_v2 = vpop.permute.xlu1 %1892 }
 0x31c   : > { %v6044_v40 = vpop.permute.xlu0 %1890 }
 0x321   : > { %2757 = vrot.lane.b32.xlu1 %v6047_v52, %s7616_s30 }
 0x322   : > { %2701 = vrot.lane.b32.xlu0 %v5725_v62, %s7605_s24 }
 0x323   : > { %v6053_v43 = vpop.permute.xlu1 %1898 }
 0x324   : > { %7652 = vst [vmem:[#allocation38_spill] sm:$0xff] %v6053_v43  ;;  %v6055_v50 = vpop.permute.xlu0 %1896 }
 0x328   : > { %1708 = vrot.lane.b32.xlu2 %v5909_v8, %s7430_s21 }
 0x329   : > { %2941 = vrot.lane.b32.xlu1 %v6058_v47, %s7641_s28 }
 0x32a   : > { %2885 = vrot.lane.b32.xlu0 %v5786_v54, %s7632_s23 }
 0x32b   : > { %v6066_v56 = vpop.permute.xlu1 %1904 }
 0x32c   : > { %7654 = vst [vmem:[#allocation65_spill] sm:$0xff] %v6066_v56  ;;  %v6068_v33 = vpop.permute.xlu0 %1902  ;;  %v4074_v56 = vld [vmem:[%s4591_s19 + $0xd0] sm:$0xff] }
 0x32d   : > { %7655 = vst [vmem:[#allocation69_spill] sm:$0xff] %v6068_v33  ;;  %v2391_v33 = vld [vmem:[%s4591_s19 + $0x3c] sm:$0xff] }
 0x330   : > { %1826 = vrot.lane.b32.xlu2 %v5337_v53, %s7616_s30 }
 0x331   : > { %2639 = vrot.lane.b32.xlu1 %v6047_v52, %s7430_s21 }
 0x332   : > { %2575 = vrot.lane.b32.xlu0 %v2402_v23, %s7428_s18  ;;  %v2388_v23 = vld [vmem:[%s4591_s19 + $0x1c] sm:$0xff] }
 0x333   : > { %v6076_v8 = vpop.permute.xlu1 %1910 }
 0x334   : > { %7656 = vst [vmem:[#allocation81_spill] sm:$0xff] %v6076_v8  ;;  %v6078_v43 = vpop.permute.xlu0 %1908 }
 0x335   : > { %7657 = vst [vmem:[#allocation85_spill] sm:$0xff] %v6078_v43 }
 0x338   : > { %1832 = vrot.lane.b32.xlu2 %v5402_v59, %s7616_s30 }
 0x339   : > { %2823 = vrot.lane.b32.xlu1 %v6058_v47, %s7626_s22 }
 0x33a   : > { %2759 = vrot.lane.b32.xlu0 %v4032_v1, %s7616_s30  ;;  %v4002_v1 = vld [vmem:[%s4591_s19 + $0x78] sm:$0xff] }
 0x33b   : > { %v6086_v53 = vpop.permute.xlu1 %1916 }
 0x33c   : > { %7658 = vst [vmem:[#allocation28_spill] sm:$0xff] %v6086_v53  ;;  %v6088_v52 = vpop.permute.xlu0 %1914  ;;  %v2389_v53 = vld [vmem:[%s4591_s19 + $0x24] sm:$0xff] }
 0x33d   : > { %7659 = vst [vmem:[#allocation23_spill] sm:$0xff] %v6088_v52  ;;  %v6133_v52 = vld [vmem:[%s4591_s19 + $0x88] sm:$0xff] }
 0x340   : > { %1838 = vrot.lane.b32.xlu2 %v5432_v32, %s7616_s30 }
 0x341   : > { %2513 = vrot.lane.b32.xlu1 %v2388_v23, %s7426_s25 }
 0x342   : > { %2943 = vrot.lane.b32.xlu0 %v4074_v56, %s7641_s28  ;;  %v6111_v56 = vld [vmem:[%s4591_s19 + $0xd8] sm:$0xff] }
 0x343   : > { %v6096_v59 = vpop.permute.xlu1 %1954 }
 0x344   : > { %v6098_v8 = vpop.permute.xlu0 %1952 }
 0x348   : > { %1844 = vrot.lane.b32.xlu2 %v5527_v60, %s7616_s30 }
 0x349   : > { %2705 = vrot.lane.b32.xlu1 %v5739_v0, %s7605_s24 }
 0x34a   : > { %2641 = vrot.lane.b32.xlu0 %v4002_v1, %s7430_s21  ;;  %v2403_v1 = vld [vmem:[%s4591_s19 + $0x28] sm:$0xff] }
 0x34b   : > { %v6106_v32 = vpop.permute.xlu1 %1960 }
 0x34c   : > { %v6108_v23 = vpop.permute.xlu0 %1958 }
 0x350   : > { %1850 = vrot.lane.b32.xlu2 %v3969_v37, %s7616_s30 }
 0x351   : > { %2889 = vrot.lane.b32.xlu1 %v5801_v16, %s7632_s23 }
 0x352   : > { %2825 = vrot.lane.b32.xlu0 %v6111_v56, %s7626_s22 }
 0x353   : > { %v6118_v60 = vpop.permute.xlu1 %1966 }
 0x354   : > { %7660 = vst [vmem:[#allocation48_spill] sm:$0xff] %v6118_v60  ;;  %v6120_v0 = vpop.permute.xlu0 %1964  ;;  %v6182_v60 = vpop.trf.xlu2 }
 0x355   : > { %7661 = vst [vmem:[#allocation57_spill] sm:$0xff] %v6120_v0  ;;  %v6195_v0 = vld [vmem:[%s4591_s19 + $0xf8] sm:$0xff] }
 0x356   : > { %7671 = vst [vmem:[#allocation72_spill] sm:$0xff] %v6182_v60 }
 0x358   : > { %1888 = vrot.lane.b32.xlu2 %v5611_v35, %s7626_s22 }
 0x359   : > { %2579 = vrot.lane.b32.xlu1 %v2403_v1, %s7428_s18  ;;  %v6146_v1 = vld [vmem:[%s4591_s19 + $0xe8] sm:$0xff] }
 0x35a   : > { %2515 = vrot.lane.b32.xlu0 %v2389_v53, %s7426_s25 }
 0x35b   : > { %v6128_v37 = vpop.permute.xlu1 %1972 }
 0x35c   : > { %7662 = vst [vmem:[#allocation61_spill] sm:$0xff] %v6128_v37  ;;  %v6130_v43 = vpop.permute.xlu0 %1970  ;;  %v6159_v37 = vld [vmem:[%s4591_s19 + $0x90] sm:$0xff] }
 0x35d   : > { %7663 = vst [vmem:[#allocation73_spill] sm:$0xff] %v6130_v43  ;;  %v6179_v43 = vld [vmem:[%s4591_s19 + $0x98] sm:$0xff] }
 0x35e   : > { %7667 = vst [vmem:[#allocation27_spill] sm:$0xff] %v6159_v37 }
 0x35f   : > { %7670 = vst [vmem:[#allocation68_spill] sm:$0xff] %v6179_v43 }
 0x360   : > { %1894 = vrot.lane.b32.xlu2 %v5643_v5, %s7626_s22 }
 0x361   : > { %2763 = vrot.lane.b32.xlu1 %v6133_v52, %s7616_s30 }
 0x362   : > { %2707 = vrot.lane.b32.xlu0 %v5759_v20, %s7605_s24 }
 0x363   : > { %v6141_v35 = vpop.permute.xlu1 %1978 }
 0x364   : > { %7664 = vst [vmem:[#allocation80_spill] sm:$0xff] %v6141_v35  ;;  %v6143_v53 = vpop.permute.xlu0 %1976  ;;  %v6176_v35 = vld [vmem:[%s4591_s19 + $0xf0] sm:$0xff] }
 0x365   : > { %7665 = vst [vmem:[#allocation83_spill] sm:$0xff] %v6143_v53  ;;  %v6162_v53 = vld [vmem:[%s4591_s19 + $0x38] sm:$0xff] }
 0x366   : > { %7668 = vst [vmem:[#allocation47_spill] sm:$0xff] %v6162_v53 }
 0x367   : > { %7669 = vst [vmem:[#allocation52_spill] sm:$0xff] %v6176_v35 }
 0x368   : > { %1900 = vrot.lane.b32.xlu2 %v5670_v55, %s7626_s22 }
 0x369   : > { %2947 = vrot.lane.b32.xlu1 %v6146_v1, %s7641_s28 }
 0x36a   : > { %2891 = vrot.lane.b32.xlu0 %v5819_v57, %s7632_s23 }
 0x36b   : > { %v6154_v5 = vpop.permute.xlu1 %2016 }
 0x36c   : > { %v6156_v20 = vpop.permute.xlu0 %1982 }
 0x36d   : > { %7666 = vst [vmem:[#allocation37_spill] sm:$0xff] %v6156_v20  ;;  %v3940_v20 = vld [vmem:[%s4591_s19 + $0x122] sm:$0xff] }
 0x370   : > { %1906 = vrot.lane.b32.xlu2 %v5714_v39, %s7626_s22 }
 0x371   : > { %2645 = vrot.lane.b32.xlu1 %v6159_v37, %s7430_s21 }
 0x372   : > { %2581 = vrot.lane.b32.xlu0 %v6162_v53, %s7428_s18  ;;  %v3943_v53 = vld [vmem:[%s4591_s19 + $0x142] sm:$0xff] }
 0x373   : > { %v6170_v55 = vpop.permute.xlu1 %2022 }
 0x374   : > { %v6172_v57 = vpop.permute.xlu0 %2020 }
 0x378   : > { %1912 = vrot.lane.b32.xlu2 %v3940_v20, %s7626_s22 }
 0x379   : > { %2829 = vrot.lane.b32.xlu1 %v6176_v35, %s7626_s22 }
 0x37a   : > { %2765 = vrot.lane.b32.xlu0 %v6179_v43, %s7616_s30 }
 0x37b   : > { %v6188_v39 = vpop.permute.xlu1 %2028 }
 0x37c   : > { %7672 = vst [vmem:[#allocation76_spill] sm:$0xff] %v6188_v39  ;;  %v6190_v37 = vpop.permute.xlu0 %2026 }
 0x37d   : > { %7673 = vst [vmem:[#allocation88_spill] sm:$0xff] %v6190_v37 }
 0x380   : > { %1918 = vrot.lane.b32.xlu2 %v3943_v53, %s7626_s22 }
 0x381   : > { %2519 = vrot.lane.b32.xlu1 %v2391_v33, %s7426_s25  ;;  %s419_s25 = scalar_select %p418_p13, %s4425_s16, 1 }
 0x382   : > { %2949 = vrot.lane.b32.xlu0 %v6195_v0, %s7641_s28  ;;  %v6201_v20 = vpop.permute.xlu2 %1708 }
 0x383   : > { %7674 = vst [vmem:[#allocation89_spill] sm:$0xff] %v6201_v20  ;;  %v6203_v60 = vpop.permute.xlu1 %2034  ;;  %v2405_v20 = vld [vmem:[%s4591_s19 + $0x58] sm:$0xff] }
 0x384   : > { %7675 = vst [vmem:[#allocation90_spill] sm:$0xff] %v6203_v60  ;;  %v6205_v35 = vpop.permute.xlu0 %2032  ;;  %v3980_v60 = vld [vmem:[%s7384_s2 + $0x48] sm:$0xf] }
 0x385   : > { %7676 = vst [vmem:[#allocation91_spill] sm:$0xff] %v6205_v35  ;;  %v3979_v35 = vld [vmem:[%s7384_s2 + $0x40] sm:$0xff]  ;;  %3982 = vmatpush.msk.msra.mxu1 %vm1284_vm0, %v3980_v60  ;;  %4123 = vmatpush.msk.msrb.mxu3 %vm1284_vm0, %v3980_v60 }
 0x387   : > { %2266 = vmatpush.msra.mxu1 %v3979_v35  ;;  %4124 = vmatpush.msrb.mxu3 %v3979_v35  ;;  %v3977_v35 = vld [vmem:[%s7384_s2 + $0x30] sm:$0xff] }
 0x388   : > { %1956 = vrot.lane.b32.xlu2 %v5771_v61, %s7632_s23 }
 0x389   : > { %2711 = vrot.lane.b32.xlu1 %v5774_v12, %s7605_s24  ;;  %v3978_v12 = vld [vmem:[%s7384_s2 + $0x38] sm:$0xff] }
 0x38a   : > { %2647 = vrot.lane.b32.xlu0 %v6179_v43, %s7430_s21  ;;  %v6213_v53 = vpop.permute.xlu2 %1826  ;;  %2267 = vmatpush.msra.mxu1 %v3978_v12  ;;  %s7682_s21 = smov 8  }
 0x38b   : > { %v6215_v33 = vpop.permute.xlu1 %2573  ;;  %4125 = vmatpush.msrb.mxu3 %v3978_v12  ;;  %v2392_v12 = vld [vmem:[%s4591_s19 + $0x4c] sm:$0xff] }
 0x38c   : > { %7677 = vst [vmem:[#allocation92_spill] sm:$0xff] %v6215_v33  ;;  %v6217_v39 = vpop.permute.xlu0 %2509  ;;  %2268 = vmatpush.msra.mxu1 %v3977_v35  ;;  %v6249_v33 = vld [vmem:[%s4591_s19 + $0x50] sm:$0xff] }
 0x38d   : > { %7678 = vst [vmem:[#allocation93_spill] sm:$0xff] %v6217_v39  ;;  %4126 = vmatpush.msrb.mxu3 %v3977_v35  ;;  %v4007_v39 = vld [vmem:[%s4591_s19 + $0xb0] sm:$0xff] }
 0x38e   : > { %7681 = vst [vmem:[#allocation96_spill] sm:$0xff] %v6249_v33 }
 0x390   : > { %1962 = vrot.lane.b32.xlu2 %v5804_v41, %s7632_s23 }
 0x391   : > { %2895 = vrot.lane.b32.xlu1 %v5834_v31, %s7632_s23  ;;  %v3976_v31 = vld [vmem:[%s7384_s2 + $0x28] sm:$0xff] }
 0x392   : > { %2831 = vrot.lane.b32.xlu0 %v6195_v0, %s7626_s22  ;;  %v6236_v43 = vpop.permute.xlu2 %1832  ;;  %2269 = vmatpush.msra.mxu1 %v3976_v31 }
 0x393   : > { %v6238_v60 = vpop.permute.xlu1 %2757  ;;  %4127 = vmatpush.msrb.mxu3 %v3976_v31 }
 0x394   : > { %7679 = vst [vmem:[#allocation94_spill] sm:$0xff] %v6238_v60  ;;  %v6243_v37 = vpop.permute.xlu0 %2701 }
 0x395   : > { %7680 = vst [vmem:[#allocation95_spill] sm:$0xff] %v6243_v37 }
 0x398   : > { %1968 = vrot.lane.b32.xlu2 %v5816_v38, %s7632_s23 }
 0x399   : > { %2585 = vrot.lane.b32.xlu1 %v6249_v33, %s7682_s21  ;;  %v6276_v33 = vld [vmem:[%s4591_s19 + $0x13c] sm:$0xff] }
 0x39a   : > { %2521 = vrot.lane.b32.xlu0 %v2392_v12, %s7683_s29  ;;  %v6257_v60 = vpop.permute.xlu2 %1838 }
 0x39b   : > { %7684 = vst [vmem:[#allocation97_spill] sm:$0xff] %v6257_v60  ;;  %v6259_v37 = vpop.permute.xlu1 %2941  ;;  %v3961_v60 = vld [vmem:[%s4591_s19 + $0x9e] sm:$0xff] }
 0x39c   : > { %7685 = vst [vmem:[#allocation98_spill] sm:$0xff] %v6259_v37  ;;  %v6261_v35 = vpop.permute.xlu0 %2885  ;;  %v4049_v37 = vld [vmem:[%s4591_s19 + $0x110] sm:$0xff] }
 0x39d   : > { %7686 = vst [vmem:[#allocation99_spill] sm:$0xff] %v6261_v35  ;;  %v3830_v35 = vld [vmem:[%s4591_s19 + $0x32] sm:$0xff] }
 0x3a0   : > { %1974 = vrot.lane.b32.xlu2 %v5846_v45, %s7632_s23  ;;  %v2064_v45 = vsel %vm1090_vm1, %v3830_v35, %v5509_v26 }
 0x3a1   : > { %2769 = vrot.lane.b32.xlu1 %v4007_v39, %s7616_s30 }
 0x3a2   : > { %2713 = vrot.lane.b32.xlu0 %v5771_v61, %s7605_s24  ;;  %v6269_v38 = vpop.permute.xlu2 %1844 }
 0x3a3   : > { %7687 = vst [vmem:[#allocation100_spill] sm:$0xff] %v6269_v38  ;;  %v6271_v31 = vpop.permute.xlu1 %2639 }
 0x3a4   : > { %7688 = vst [vmem:[#allocation101_spill] sm:$0xff] %v6271_v31  ;;  %v6273_v12 = vpop.permute.xlu0 %2575 }
 0x3a5   : > { %7689 = vst [vmem:[#allocation102_spill] sm:$0xff] %v6273_v12  ;;  %v2080_v12 = vsel %vm1107_vm3, %v2064_v45, %v5722_v3 }
 0x3a6   : > { %v2096_v49 = vsel %vm1124_vm2, %v2080_v12, %v5843_v34  ;;  %v3967_v12 = vld [vmem:[%s4591_s19 + $0xe6] sm:$0xff] }
 0x3a7   : > { %v2112_v26 = vsel %vm1141_vm4, %v2096_v49, %v5916_v25  ;;  %v3964_v49 = vld [vmem:[%s4591_s19 + $0xc6] sm:$0xff] }
 0x3a8   : > { %1980 = vrot.lane.b32.xlu2 %v6276_v33, %s7632_s23 }
 0x3a9   : > { %2953 = vrot.lane.b32.xlu1 %v4049_v37, %s7641_s28 }
 0x3aa   : > { %2897 = vrot.lane.b32.xlu0 %v5831_v13, %s7632_s23  ;;  %v6287_v61 = vpop.permute.xlu2 %1850  ;;  %v2128_v13 = vsel %vm1158_vm6, %v2112_v26, %v5982_v58  ;;  %v4035_v58 = vld [vmem:[%s4591_s19 + $0xb8] sm:$0xff] }
 0x3ab   : > { %v6289_v38 = vpop.permute.xlu1 %2823 }
 0x3ac   : > { %v6291_v31 = vpop.permute.xlu0 %2759 }
 0x3b0   : > { %2018 = vrot.lane.b32.xlu2 %v3961_v60, %s7641_s28 }
 0x3b1   : > { %2651 = vrot.lane.b32.xlu1 %v4007_v39, %s7690_s0 }
 0x3b2   : > { %2587 = vrot.lane.b32.xlu0 %v2405_v20, %s7682_s21  ;;  %v1889_v3 = vpop.permute.xlu2 %1888 }
 0x3b3   : > { %v2144_v35 = vsel %vm1175_vm5, %v2128_v13, %v1889_v3  ;;  %v6307_v45 = vpop.permute.xlu1 %2513  ;;  %v4008_v3 = vld [vmem:[%s4591_s19 + $0xc0] sm:$0xff] }
 0x3b4   : > { %v6309_v34 = vpop.permute.xlu0 %2943  ;;  %v2160_v60 = vsel %vm1192_vm7, %v2144_v35, %v6098_v8 }
 0x3b5   : > { %v2176_v25 = vsel %vm1209_vm9, %v2160_v60, %v6154_v5  ;;  %v4077_v5 = vld [vmem:[%s4591_s19 + $0x118] sm:$0xff]  ;;  %v2373_v60 = vld [vmem:[%s4591_s19 + $0x20] sm:$0xff] }
 0x3b6   : > { %3983 = vmatmul.msk.f32.vlgmr.msra.gmra.mxu1 %vm1235_vm8, %v2176_v25 }
 0x3b8   : > { %2024 = vrot.lane.b32.xlu2 %v3964_v49, %s7641_s28 }
 0x3b9   : > { %2835 = vrot.lane.b32.xlu1 %v4049_v37, %s7626_s22 }
 0x3ba   : > { %2771 = vrot.lane.b32.xlu0 %v4035_v58, %s7616_s30  ;;  %v6321_v39 = vpop.permute.xlu2 %1894  ;;  %v6354_v58 = vld [vmem:[%s4591_s19 + $0x60] sm:$0xff] }
 0x3bb   : > { %v6323_v20 = vpop.permute.xlu1 %2705  ;;  %7692 = vst [vmem:[#allocation104_spill] sm:$0xff] %v6354_v58 }
 0x3bc   : > { %v6325_v8 = vpop.permute.xlu0 %2641 }
 0x3c0   : > { %2030 = vrot.lane.b32.xlu2 %v3967_v12, %s7641_s28 }
 0x3c1   : > { %2525 = vrot.lane.b32.xlu1 %v5725_v62, %s7683_s29 }
 0x3c2   : > { %2955 = vrot.lane.b32.xlu0 %v4077_v5, %s7641_s28  ;;  %v6333_v37 = vpop.permute.xlu2 %1900 }
 0x3c3   : > { %v6335_v26 = vpop.permute.xlu1 %2889 }
 0x3c4   : > { %v6337_v13 = vpop.permute.xlu0 %2825 }
 0x3c8   : > { %2036 = vrot.lane.b32.xlu2 %v5898_v15, %s7641_s28  ;;  %v4050_v15 = vld [vmem:[%s4591_s19 + $0x120] sm:$0xff] }
 0x3c9   : > { %2717 = vrot.lane.b32.xlu1 %v5786_v54, %s7605_s24 }
 0x3ca   : > { %2653 = vrot.lane.b32.xlu0 %v4008_v3, %s7690_s0  ;;  %v6345_v62 = vpop.permute.xlu2 %1906 }
 0x3cb   : > { %v6347_v35 = vpop.permute.xlu1 %2579 }
 0x3cc   : > { %v2516_v25 = vpop.permute.xlu0 %2515 }
 0x3cd   : > { %v6351_v49 = vsel %vm1090_vm1, %v2373_v60, %v2516_v25  ;;  %v2395_v25 = vld [vmem:[%s4591_s19 + $0x6c] sm:$0xff] }
 0x3ce   : > { %7691 = vst [vmem:[#allocation103_spill] sm:$0xff] %v6351_v49  ;;  %v3973_v49 = vld [vmem:[%s4591_s19 + $0x12e] sm:$0xff] }
 0x3d0   : > { %2637 = vrot.lane.b32.xlu2 %v6354_v58, %s7690_s0 }
 0x3d1   : > { %2901 = vrot.lane.b32.xlu1 %v5990_v4, %s7632_s23 }
 0x3d2   : > { %2837 = vrot.lane.b32.xlu0 %v4050_v15, %s7626_s22  ;;  %v6362_v54 = vpop.permute.xlu2 %1912 }
 0x3d3   : > { %7693 = vst [vmem:[#allocation105_spill] sm:$0xff] %v6362_v54  ;;  %v6364_v12 = vpop.permute.xlu1 %2763  ;;  %v2387_v54 = vld [vmem:[%s4591_s19 + $0xc] sm:$0xff] }
 0x3d4   : > { %v6366_v5 = vpop.permute.xlu0 %2707 }
 0x3d8   : > { %2821 = vrot.lane.b32.xlu2 %v4008_v3, %s7626_s22 }
 0x3d9   : > { %2527 = vrot.lane.b32.xlu1 %v2395_v25, %s7683_s29 }
 0x3da   : > { %2042 = vrot.lane.b32.xlu0 %v3973_v49, %s7641_s28  ;;  %v6373_v58 = vpop.permute.xlu2 %1918 }
 0x3db   : > { %7694 = vst [vmem:[#allocation106_spill] sm:$0xff] %v6373_v58  ;;  %v6375_v4 = vpop.permute.xlu1 %2947 }
 0x3dc   : > { %7695 = vst [vmem:[#allocation107_spill] sm:$0xff] %v6375_v4  ;;  %v6377_v15 = vpop.permute.xlu0 %2891  ;;  %v6392_v4 = vld [vmem:[%s4591_s19 + $0x128] sm:$0xff] }
 0x3dd   : > { %7696 = vst [vmem:[#allocation108_spill] sm:$0xff] %v6377_v15 }
 0x3de   : > { %7699 = vst [vmem:[#allocation111_spill] sm:$0xff] %v6392_v4 }
 0x3e0   : > { %2511 = vrot.lane.b32.xlu2 %v2387_v54, %s7683_s29 }
 0x3e1   : > { %2719 = vrot.lane.b32.xlu1 %v5804_v41, %s7605_s24 }
 0x3e2   : > { %2655 = vrot.lane.b32.xlu0 %v6058_v47, %s7690_s0  ;;  %v6385_v3 = vpop.permute.xlu2 %1956 }
 0x3e3   : > { %v6387_v49 = vpop.permute.xlu1 %2645 }
 0x3e4   : > { %7697 = vst [vmem:[#allocation109_spill] sm:$0xff] %v6387_v49  ;;  %v6389_v58 = vpop.permute.xlu0 %2581  ;;  %v2396_v49 = vld [vmem:[%s4591_s19 + $0x7c] sm:$0xff] }
 0x3e5   : > { %7698 = vst [vmem:[#allocation110_spill] sm:$0xff] %v6389_v58  ;;  %v3974_v58 = vld [vmem:[%s4591_s19 + $0x13e] sm:$0xff] }
 0x3e8   : > { %2703 = vrot.lane.b32.xlu2 %v2395_v25, %s7605_s24 }
 0x3e9   : > { %2903 = vrot.lane.b32.xlu1 %v5987_v6, %s7632_s23 }
 0x3ea   : > { %2839 = vrot.lane.b32.xlu0 %v6392_v4, %s7626_s22  ;;  %v6399_v54 = vpop.permute.xlu2 %1962 }
 0x3eb   : > { %v6401_v47 = vpop.permute.xlu1 %2829 }
 0x3ec   : > { %7700 = vst [vmem:[#allocation112_spill] sm:$0xff] %v6401_v47  ;;  %v6403_v15 = vpop.permute.xlu0 %2765  ;;  %v3831_v47 = vld [vmem:[%s4591_s19 + $0x3a] sm:$0xff] }
 0x3f0   : > { %2887 = vrot.lane.b32.xlu2 %v5804_v41, %s7632_s23 }
 0x3f1   : > { %2529 = vrot.lane.b32.xlu1 %v2396_v49, %s7683_s29 }
 0x3f2   : > { %2044 = vrot.lane.b32.xlu0 %v3974_v58, %s7641_s28  ;;  %v6411_v6 = vpop.permute.xlu2 %1968  ;;  %v2065_v58 = vsel %vm1090_vm1, %v3831_v47, %v5505_v14 }
 0x3f3   : > { %v6413_v25 = vpop.permute.xlu1 %2519 }
 0x3f4   : > { %7701 = vst [vmem:[#allocation113_spill] sm:$0xff] %v6413_v25  ;;  %v6415_v4 = vpop.permute.xlu0 %2949 }
 0x3f5   : > { %7702 = vst [vmem:[#allocation114_spill] sm:$0xff] %v6415_v4  ;;  %v2081_v4 = vsel %vm1107_vm3, %v2065_v58, %v5720_v21 }
 0x3f6   : > { %v2097_v14 = vsel %vm1124_vm2, %v2081_v4, %v5841_v46 }
 0x3f7   : > { %v2113_v21 = vsel %vm1141_vm4, %v2097_v14, %v5927_v63  ;;  %v3833_v63 = vld [vmem:[%s4591_s19 + $0x52] sm:$0xff] }
 0x3f8   : > { %2577 = vrot.lane.b32.xlu2 %v2373_v60, %s7682_s21  ;;  %v6432_v60 = vld [vmem:[%s4591_s19 + $0x80] sm:$0xff] }
 0x3f9   : > { %2721 = vrot.lane.b32.xlu1 %v5801_v16, %s7605_s24  ;;  %v4052_v16 = vld [vmem:[%s4591_s19 + $0x138] sm:$0xff] }
 0x3fa   : > { %2657 = vrot.lane.b32.xlu0 %v6111_v56, %s7690_s0  ;;  %v6423_v41 = vpop.permute.xlu2 %1974  ;;  %v3832_v56 = vld [vmem:[%s4591_s19 + $0x4a] sm:$0xff] }
 0x3fb   : > { %7703 = vst [vmem:[#allocation115_spill] sm:$0xff] %v6423_v41  ;;  %v6425_v49 = vpop.permute.xlu1 %2711  ;;  %v2129_v41 = vsel %vm1158_vm6, %v2113_v21, %v6213_v53  ;;  %v2066_v46 = vsel %vm1090_vm1, %v3832_v56, %v5543_v29 }
 0x3fc   : > { %7704 = vst [vmem:[#allocation116_spill] sm:$0xff] %v6425_v49  ;;  %v6429_v25 = vpop.permute.xlu0 %2647  ;;  %v2145_v4 = vsel %vm1175_vm5, %v2129_v41, %v6044_v40  ;;  %v2082_v14 = vsel %vm1107_vm3, %v2066_v46, %v5736_v48  ;;  %v2067_v41 = vsel %vm1090_vm1, %v3833_v63, %v5541_v27  ;;  %v4086_v46 = vld [vmem:[%s7384_s2 + $0x70] sm:$0xf] }
 0x3fd   : > { %7705 = vst [vmem:[#allocation117_spill] sm:$0xff] %v6429_v25  ;;  %v6456_v25 = vld [vmem:[%s4591_s19 + $0xe0] sm:$0xff]  ;;  %v2161_v29 = vsel %vm1192_vm7, %v2145_v4, %v6096_v59  ;;  %v2098_v21 = vsel %vm1124_vm2, %v2082_v14, %v5855_v19  ;;  %v4085_v59 = vld [vmem:[%s7384_s2 + $0x68] sm:$0xff]  ;;  %4088 = vmatpush.msk.msra.mxu2 %vm1284_vm0, %v4086_v46  ;;  %4128 = vmatpush.msk.msra.mxu3 %vm1284_vm0, %v4086_v46 }
 0x3fe   : > { %v6496_v19 = vld [vmem:[%s4591_s19 + $0xa0] sm:$0xff]  ;;  %v2083_v4 = vsel %vm1107_vm3, %v2067_v41, %v5734_v30 }
 0x3ff   : > { %3191 = vmatpush.msra.mxu2 %v4085_v59  ;;  %4129 = vmatpush.msra.mxu3 %v4085_v59  ;;  %v2099_v30 = vsel %vm1124_vm2, %v2083_v4, %v5853_v9  ;;  %v4027_v41 = vld [vmem:[%s4591_s19 + $0xe4] sm:$0xff] }
 0x400   : > { %2761 = vrot.lane.b32.xlu2 %v6432_v60, %s7616_s30 }
 0x401   : > { %2905 = vrot.lane.b32.xlu1 %v6276_v33, %s7632_s23  ;;  %v2397_v33 = vld [vmem:[%s4591_s19 + $0x84] sm:$0xff] }
 0x402   : > { %2841 = vrot.lane.b32.xlu0 %v4052_v16, %s7626_s22  ;;  %v6444_v47 = vpop.permute.xlu2 %1980  ;;  %v3975_v16 = vld [vmem:[%s4591_s19 + $0x146] sm:$0xff] }
 0x403   : > { %v6449_v58 = vpop.permute.xlu1 %2895 }
 0x404   : > { %v6453_v49 = vpop.permute.xlu0 %2831 }
 0x408   : > { %2945 = vrot.lane.b32.xlu2 %v6456_v25, %s7641_s28 }
 0x409   : > { %2531 = vrot.lane.b32.xlu1 %v2397_v33, %s7683_s29  ;;  %v2114_v33 = vsel %vm1141_vm4, %v2098_v21, %v5925_v18 }
 0x40a   : > { %2046 = vrot.lane.b32.xlu0 %v3975_v16, %s7641_s28  ;;  %v2019_v53 = vpop.permute.xlu2 %2018  ;;  %v2130_v27 = vsel %vm1158_vm6, %v2114_v33, %v5998_v7  ;;  %v4084_v7 = vld [vmem:[%s7384_s2 + $0x60] sm:$0xff] }
 0x40b   : > { %v6473_v56 = vpop.permute.xlu1 %2585  ;;  %v2177_v40 = vsel %vm1209_vm9, %v2161_v29, %v2019_v53  ;;  %v2146_v16 = vsel %vm1175_vm5, %v2130_v27, %v6042_v2  ;;  %3192 = vmatpush.msra.mxu2 %v4084_v7  ;;  %4130 = vmatpush.msra.mxu3 %v4084_v7  ;;  %v4083_v53 = vld [vmem:[%s7384_s2 + $0x58] sm:$0xff]  ;;  %v4270_v29 = vld [vmem:[%s4591_s19 + $0x62] sm:$0xff]  ;;  %v4271_v27 = vld [vmem:[%s4591_s19 + $0x6a] sm:$0xff] }
 0x40c   : > { %v6480_v48 = vpop.permute.xlu0 %2521  ;;  %3984 = vmatmul.msk.f32.gmra.mxu1 %vm1235_vm8, %v2177_v40  ;;  %v2162_v18 = vsel %vm1192_vm7, %v2146_v16, %v6385_v3  ;;  %v2115_v3 = vsel %vm1141_vm4, %v2099_v30, %v5936_v42  ;;  %v2068_v9 = vsel %vm1090_vm1, %v4270_v29, %v5569_v17  ;;  %v2069_v4 = vsel %vm1090_vm1, %v4271_v27, %v5567_v36  ;;  %v6567_v16 = vld [vmem:[%s4591_s19 + $0x100] sm:$0xff]  ;;  %v7714_v27 = vld [vmem:[#allocation92_spill] sm:$0xff] }
 0x40d   : > { %v2178_v14 = vsel %vm1209_vm9, %v2162_v18, %v6172_v57  ;;  %3193 = vmatpush.msra.mxu2 %v4083_v53  ;;  %v4082_v57 = vld [vmem:[%s7384_s2 + $0x50] sm:$0xff]  ;;  %4131 = vmatpush.msra.mxu3 %v4083_v53  ;;  %v2084_v17 = vsel %vm1107_vm3, %v2068_v9, %v5753_v28  ;;  %v2370_v29 = vld [vmem:[%s4591_s19] sm:$0xff] }
 0x40e   : > { %v7708_v9 = vld [vmem:[#allocation25_spill] sm:$0xff] }
 0x40f   : > { %3194 = vmatpush.msra.mxu2 %v4082_v57  ;;  %4132 = vmatpush.msra.mxu3 %v4082_v57 }
 0x410   : > { %2643 = vrot.lane.b32.xlu2 %v6432_v60, %s7690_s0 }
 0x411   : > { %2599 = vrot.lane.b32.xlu1 %v6496_v19, %s7682_s21 }
 0x412   : > { %2595 = vrot.lane.b32.xlu0 %v6133_v52, %s7682_s21  ;;  %v2025_v2 = vpop.permute.xlu2 %2024  ;;  %v2131_v52 = vsel %vm1158_vm6, %v2115_v3, %v5996_v11 }
 0x413   : > { %v6517_v63 = vpop.permute.xlu1 %2769  ;;  %v2147_v42 = vsel %vm1175_vm5, %v2131_v52, %v6321_v39  ;;  %v2100_v39 = vsel %vm1124_vm2, %v2084_v17, %v5864_v51  ;;  %v2390_v51 = vld [vmem:[%s4591_s19 + $0x34] sm:$0xff] }
 0x414   : > { %v6529_v40 = vpop.permute.xlu0 %2713  ;;  %3985 = vmatmul.msk.f32.gmra.mxu1 %vm1235_vm8, %v2178_v14  ;;  %v2163_v11 = vsel %vm1192_vm7, %v2147_v42, %v6108_v23  ;;  %v2116_v28 = vsel %vm1141_vm4, %v2100_v39, %v5934_v22  ;;  %v7711_v17 = vld [vmem:[#allocation93_spill] sm:$0xff] }
 0x415   : > { %v2179_v59 = vsel %vm1209_vm9, %v2163_v11, %v6170_v55  ;;  %v2132_v23 = vsel %vm1158_vm6, %v2116_v28, %v6236_v43  ;;  %v2085_v43 = vsel %vm1107_vm3, %v2069_v4, %v5751_v44  ;;  %v4272_v55 = vld [vmem:[%s4591_s19 + $0x7a] sm:$0xff]  ;;  %v2989_v11 = vsel %vm1090_vm1, %v2370_v29, %v7711_v17  ;;  %v7712_v28 = vld [vmem:[#allocation67_spill] sm:$0xff] }
 0x416   : > { %v2148_v22 = vsel %vm1175_vm5, %v2132_v23, %v6055_v50  ;;  %v2070_v18 = vsel %vm1090_vm1, %v4272_v55, %v5595_v24  ;;  %v2101_v30 = vsel %vm1124_vm2, %v2085_v43, %v5862_v10  ;;  %v7706_v24 = vld [vmem:[#allocation56_spill] sm:$0xff]  ;;  %v7710_v10 = vld [vmem:[#allocation38_spill] sm:$0xff]  ;;  %v3005_v4 = vsel %vm1107_vm3, %v2989_v11, %v7714_v27  ;;  %v7718_v29 = vld [vmem:[#allocation51_spill] sm:$0xff] }
 0x417   : > { %v2164_v50 = vsel %vm1192_vm7, %v2148_v22, %v6106_v32  ;;  %v2086_v14 = vsel %vm1107_vm3, %v2070_v18, %v7706_v24  ;;  %v4020_v32 = vld [vmem:[%s4591_s19 + $0x94] sm:$0xff]  ;;  %v7713_v23 = vld [vmem:[#allocation82_spill] sm:$0xff] }
 0x418   : > { %2827 = vrot.lane.b32.xlu2 %v6456_v25, %s7626_s22  ;;  %v2180_v44 = vsel %vm1209_vm9, %v2164_v50, %v2025_v2  ;;  %v7709_v2 = vld [vmem:[#allocation89_spill] sm:$0xff]  ;;  %v4273_v55 = vld [vmem:[%s4591_s19 + $0x82] sm:$0xff] }
 0x419   : > { %2723 = vrot.lane.b32.xlu1 %v4027_v41, %s7605_s24  ;;  %v2102_v42 = vsel %vm1124_vm2, %v2086_v14, %v7709_v2  ;;  %v6606_v41 = vld [vmem:[%s4591_s19 + $0x158] sm:$0xff]  ;;  %v7722_v11 = vld [vmem:[#allocation94_spill] sm:$0xff] }
 0x41a   : > { %2663 = vrot.lane.b32.xlu0 %v6195_v0, %s7690_s0  ;;  %v6549_v21 = vpop.permute.xlu2 %2030  ;;  %v7716_v18 = vld [vmem:[#allocation17_spill] sm:$0xff] }
 0x41b   : > { %v6553_v46 = vpop.permute.xlu1 %2953  ;;  %v2071_v50 = vsel %vm1090_vm1, %v4273_v55, %v7716_v18  ;;  %v7726_v18 = vld [vmem:[#allocation99_spill] sm:$0xff] }
 0x41c   : > { %v6559_v33 = vpop.permute.xlu0 %2897  ;;  %3986 = vmatmul.msk.f32.gmra.mxu1 %vm1235_vm8, %v2179_v59  ;;  %v2118_v59 = vsel %vm1141_vm4, %v2102_v42, %v7712_v28  ;;  %v4079_v42 = vld [vmem:[%s4591_s19 + $0x148] sm:$0xff] }
 0x420   : > { %2517 = vrot.lane.b32.xlu2 %v2390_v51, %s7683_s29 }
 0x421   : > { %2783 = vrot.lane.b32.xlu1 %v6567_v16, %s7616_s30 }
 0x422   : > { %2779 = vrot.lane.b32.xlu0 %v6146_v1, %s7616_s30  ;;  %v6581_v36 = vpop.permute.xlu2 %2036  ;;  %v7707_v1 = vld [vmem:[#allocation79_spill] sm:$0xff] }
 0x423   : > { %v6585_v7 = vpop.permute.xlu1 %2651  ;;  %v2117_v53 = vsel %vm1141_vm4, %v2101_v30, %v7707_v1 }
 0x424   : > { %v6590_v3 = vpop.permute.xlu0 %2587  ;;  %3987 = vmatmul.msk.f32.gmra.mxu1 %vm1235_vm8, %v2180_v44  ;;  %v2133_v52 = vsel %vm1158_vm6, %v2117_v53, %v7708_v9  ;;  %v7717_v44 = vld [vmem:[#allocation35_spill] sm:$0xff]  ;;  %v6637_v53 = vld [vmem:[%s4591_s19 + $0xf4] sm:$0xff]  ;;  %v2087_v9 = vsel %vm1107_vm3, %v2071_v50, %v7718_v29 }
 0x425   : > { %v2149_v57 = vsel %vm1175_vm5, %v2133_v52, %v7710_v10  ;;  %v2134_v30 = vsel %vm1158_vm6, %v2118_v59, %v7717_v44  ;;  %v7719_v52 = vld [vmem:[#allocation95_spill] sm:$0xff]  ;;  %v7720_v10 = vld [vmem:[#allocation57_spill] sm:$0xff]  ;;  %v7727_v44 = vld [vmem:[#allocation98_spill] sm:$0xff] }
 0x426   : > { %v2165_v39 = vsel %vm1192_vm7, %v2149_v57, %v6399_v54  ;;  %v7715_v54 = vld [vmem:[#allocation88_spill] sm:$0xff]  ;;  %v2150_v1 = vsel %vm1175_vm5, %v2134_v30, %v6333_v37  ;;  %v7721_v37 = vld [vmem:[#allocation53_spill] sm:$0xff]  ;;  %v7723_v59 = vld [vmem:[#allocation87_spill] sm:$0xff] }
 0x427   : > { %v2181_v43 = vsel %vm1209_vm9, %v2165_v39, %v7715_v54  ;;  %v2166_v57 = vsel %vm1192_vm7, %v2150_v1, %v7720_v10  ;;  %v2103_v17 = vsel %vm1124_vm2, %v2087_v9, %v7721_v37  ;;  %v7725_v54 = vld [vmem:[#allocation97_spill] sm:$0xff]  ;;  %v4274_v1 = vld [vmem:[%s4591_s19 + $0x92] sm:$0xff]  ;;  %v7728_v29 = vld [vmem:[#allocation43_spill] sm:$0xff] }
 0x428   : > { %2709 = vrot.lane.b32.xlu2 %v4020_v32, %s7605_s24  ;;  %v2072_v9 = vsel %vm1090_vm1, %v4274_v1, %v7728_v29  ;;  %v7730_v10 = vld [vmem:[#allocation62_spill] sm:$0xff]  ;;  %v7731_v37 = vld [vmem:[#allocation68_spill] sm:$0xff]  ;;  %v7737_v1 = vld [vmem:[#allocation33_spill] sm:$0xff] }
 0x429   : > { %2907 = vrot.lane.b32.xlu1 %v7713_v23, %s7632_s23  ;;  %v2119_v23 = vsel %vm1141_vm4, %v2103_v17, %v7723_v59  ;;  %v7738_v29 = vld [vmem:[#allocation49_spill] sm:$0xff] }
 0x42a   : > { %2847 = vrot.lane.b32.xlu0 %v6606_v41, %s7626_s22  ;;  %v2638_v51 = vpop.permute.xlu2 %2637 }
 0x42b   : > { %v6621_v22 = vpop.permute.xlu1 %2835  ;;  %v3021_v24 = vsel %vm1124_vm2, %v3005_v4, %v2638_v51  ;;  %v7724_v4 = vld [vmem:[#allocation76_spill] sm:$0xff] }
 0x42c   : > { %v6631_v14 = vpop.permute.xlu0 %2771  ;;  %3988 = vmatmul.msk.f32.gmra.mxu1 %vm1235_vm8, %v2181_v43  ;;  %v3037_v2 = vsel %vm1141_vm4, %v3021_v24, %v7719_v52  ;;  %v2135_v43 = vsel %vm1158_vm6, %v2119_v23, %v7725_v54  ;;  %v2404_v24 = vld [vmem:[%s4591_s19 + $0x40] sm:$0xff] }
 0x42d   : > { %v3053_v39 = vsel %vm1158_vm6, %v3037_v2, %v7722_v11  ;;  %v7729_v52 = vld [vmem:[#allocation69_spill] sm:$0xff]  ;;  %v7732_v11 = vld [vmem:[#allocation48_spill] sm:$0xff] }
 0x42e   : > { %v2151_v2 = vsel %vm1175_vm5, %v2135_v43, %v7729_v52  ;;  %v4275_v23 = vld [vmem:[%s4591_s19 + $0x9a] sm:$0xff]  ;;  %v6708_v52 = vld [vmem:[%s4591_s19 + $0x108] sm:$0xff] }
 0x430   : > { %2893 = vrot.lane.b32.xlu2 %v6637_v53, %s7632_s23 }
 0x431   : > { %2533 = vrot.lane.b32.xlu1 %v4020_v32, %s7683_s29  ;;  %v2182_v32 = vsel %vm1209_vm9, %v2166_v57, %v7724_v4  ;;  %v2088_v57 = vsel %vm1107_vm3, %v2072_v9, %v7730_v10  ;;  %v7740_v10 = vld [vmem:[#allocation65_spill] sm:$0xff] }
 0x432   : > { %2963 = vrot.lane.b32.xlu0 %v4079_v42, %s7641_s28  ;;  %v2822_v28 = vpop.permute.xlu2 %2821  ;;  %v2400_v42 = vld [vmem:[%s4591_s19 + $0xac] sm:$0xff] }
 0x433   : > { %v3069_v51 = vsel %vm1175_vm5, %v3053_v39, %v2822_v28  ;;  %v6657_v27 = vpop.permute.xlu1 %2525  ;;  %v2167_v39 = vsel %vm1192_vm7, %v2151_v2, %v7732_v11  ;;  %v7739_v2 = vld [vmem:[#allocation60_spill] sm:$0xff]  ;;  %v7741_v11 = vld [vmem:[#allocation102_spill] sm:$0xff] }
 0x434   : > { %v6663_v55 = vpop.permute.xlu0 %2955  ;;  %3989 = vmatmul.msk.f32.gmra.mxu1 %vm1235_vm8, %v2182_v32  ;;  %v3085_v50 = vsel %vm1192_vm7, %v3069_v51, %v7726_v18  ;;  %v2183_v59 = vsel %vm1209_vm9, %v2167_v39, %v6549_v21  ;;  %v7733_v51 = vld [vmem:[#allocation40_spill] sm:$0xff]  ;;  %v7734_v32 = vld [vmem:[#allocation50_spill] sm:$0xff]  ;;  %v7742_v39 = vld [vmem:[#allocation39_spill] sm:$0xff] }
 0x435   : > { %v3101_v30 = vsel %vm1209_vm9, %v3085_v50, %v7727_v44  ;;  %v2073_v4 = vsel %vm1090_vm1, %v4275_v23, %v7733_v51  ;;  %v2104_v54 = vsel %vm1124_vm2, %v2088_v57, %v7734_v32  ;;  %v7735_v18 = vld [vmem:[#allocation84_spill] sm:$0xff]  ;;  %v7736_v44 = vld [vmem:[#allocation34_spill] sm:$0xff]  ;;  %v7743_v23 = vld [vmem:[#allocation75_spill] sm:$0xff] }
 0x436   : > { %4089 = vmatmul.msk.f32.vlgmr.msra.gmra.mxu2 %vm1235_vm8, %v3101_v30  ;;  %v2120_v50 = vsel %vm1141_vm4, %v2104_v54, %v7735_v18  ;;  %v7746_v18 = vld [vmem:[#allocation101_spill] sm:$0xff] }
 0x437   : > { %v2136_v9 = vsel %vm1158_vm6, %v2120_v50, %v7738_v29  ;;  %v7750_v29 = vld [vmem:[#allocation36_spill] sm:$0xff] }
 0x438   : > { %2583 = vrot.lane.b32.xlu2 %v2404_v24, %s7682_s21  ;;  %v4276_v24 = vld [vmem:[%s4591_s19 + $0xca] sm:$0xff]  ;;  %v2152_v57 = vsel %vm1175_vm5, %v2136_v9, %v7740_v10 }
 0x439   : > { %2597 = vrot.lane.b32.xlu1 %v7731_v37, %s7682_s21  ;;  %v2077_v21 = vsel %vm1090_vm1, %v4276_v24, %v7737_v1  ;;  %v2168_v37 = vsel %vm1192_vm7, %v2152_v57, %v6411_v6  ;;  %v7745_v6 = vld [vmem:[#allocation19_spill] sm:$0xff]  ;;  %v7748_v24 = vld [vmem:[#allocation16_spill] sm:$0xff] }
 0x43a   : > { %2537 = vrot.lane.b32.xlu0 %v2400_v42, %s7683_s29  ;;  %v2512_v17 = vpop.permute.xlu2 %2511  ;;  %v2089_v42 = vsel %vm1107_vm3, %v2073_v4, %v7739_v2  ;;  %v7744_v4 = vld [vmem:[#allocation52_spill] sm:$0xff]  ;;  %v7749_v1 = vld [vmem:[#allocation55_spill] sm:$0xff] }
 0x43b   : > { %v6686_v28 = vpop.permute.xlu1 %2717  ;;  %v2990_v30 = vsel %vm1090_vm1, %v7736_v44, %v2512_v17  ;;  %v2105_v51 = vsel %vm1124_vm2, %v2089_v42, %v7743_v23  ;;  %v7747_v44 = vld [vmem:[#allocation91_spill] sm:$0xff]  ;;  %v7751_v2 = vld [vmem:[#allocation44_spill] sm:$0xff]  ;;  %v7753_v23 = vld [vmem:[#allocation21_spill] sm:$0xff] }
 0x43c   : > { %v6695_v43 = vpop.permute.xlu0 %2653  ;;  %3990 = vmatmul.msk.f32.gmra.mxu1 %vm1235_vm8, %v2183_v59  ;;  %v3006_v17 = vsel %vm1107_vm3, %v2990_v30, %v7741_v11  ;;  %v2093_v59 = vsel %vm1107_vm3, %v2077_v21, %v7742_v39  ;;  %v2121_v54 = vsel %vm1141_vm4, %v2105_v51, %v7745_v6  ;;  %v2184_v30 = vsel %vm1209_vm9, %v2168_v37, %v7747_v44  ;;  %v7752_v11 = vld [vmem:[#allocation71_spill] sm:$0xff] }
 0x43d   : > { %v2074_v21 = vsel %vm1090_vm1, %v7749_v1, %v7748_v24  ;;  %v2109_v9 = vsel %vm1124_vm2, %v2093_v59, %v7750_v29  ;;  %v2137_v42 = vsel %vm1158_vm6, %v2121_v54, %v7751_v2  ;;  %v7755_v54 = vld [vmem:[#allocation23_spill] sm:$0xff]  ;;  %v7760_v2 = vld [vmem:[#allocation80_spill] sm:$0xff] }
 0x43e   : > { %v2153_v37 = vsel %vm1175_vm5, %v2137_v42, %v6345_v62  ;;  %v2090_v59 = vsel %vm1107_vm3, %v2074_v21, %v7753_v23  ;;  %v7759_v21 = vld [vmem:[#allocation100_spill] sm:$0xff] }
 0x43f   : > { %v4054_v23 = vld [vmem:[%s4591_s19 + $0x150] sm:$0xff] }
 0x440   : > { %2767 = vrot.lane.b32.xlu2 %v6496_v19, %s7616_s30  ;;  %v3022_v19 = vsel %vm1124_vm2, %v3006_v17, %v7746_v18  ;;  %v2125_v17 = vsel %vm1141_vm4, %v2109_v9, %v7752_v11  ;;  %v6788_v11 = vld [vmem:[%s4591_s19 + $0xa8] sm:$0xff] }
 0x441   : > { %2665 = vrot.lane.b32.xlu1 %v6708_v52, %s7690_s0  ;;  %v2141_v39 = vsel %vm1158_vm6, %v2125_v17, %v6287_v61  ;;  %v7756_v61 = vld [vmem:[#allocation64_spill] sm:$0xff]  ;;  %v4056_v17 = vld [vmem:[%s4591_s19 + $0x168] sm:$0xff] }
 0x442   : > { %2661 = vrot.lane.b32.xlu0 %v7744_v4, %s7690_s0  ;;  %v2704_v32 = vpop.permute.xlu2 %2703  ;;  %v4030_v4 = vld [vmem:[%s4591_s19 + $0x10c] sm:$0xff]  ;;  %v2157_v18 = vsel %vm1175_vm5, %v2141_v39, %v7755_v54  ;;  %v2106_v62 = vsel %vm1124_vm2, %v2090_v59, %v7756_v61  ;;  %v2372_v59 = vld [vmem:[%s4591_s19 + $0x18] sm:$0xff] }
 0x443   : > { %v6732_v50 = vpop.permute.xlu1 %2901  ;;  %v3038_v10 = vsel %vm1141_vm4, %v3022_v19, %v2704_v32  ;;  %v7754_v32 = vld [vmem:[#allocation73_spill] sm:$0xff]  ;;  %v7757_v19 = vld [vmem:[#allocation26_spill] sm:$0xff]  ;;  %v2991_v54 = vsel %vm1090_vm1, %v2372_v59, %v6307_v45  ;;  %v7768_v59 = vld [vmem:[#allocation28_spill] sm:$0xff] }
 0x444   : > { %v6744_v57 = vpop.permute.xlu0 %2837  ;;  %3991 = vmatmul.msk.f32.gmra.mxu1 %vm1235_vm8, %v2184_v30  ;;  %v3054_v51 = vsel %vm1158_vm6, %v3038_v10, %v6291_v31  ;;  %v2169_v6 = vsel %vm1192_vm7, %v2153_v37, %v7754_v32  ;;  %v2122_v44 = vsel %vm1141_vm4, %v2106_v62, %v7757_v19  ;;  %v7761_v37 = vld [vmem:[#allocation85_spill] sm:$0xff]  ;;  %v4072_v62 = vld [vmem:[%s4591_s19 + $0x16c] sm:$0xff]  ;;  %v7763_v45 = vld [vmem:[#allocation42_spill] sm:$0xff] }
 0x445   : > { %v3070_v31 = vsel %vm1175_vm5, %v3054_v51, %v6289_v38  ;;  %v2138_v29 = vsel %vm1158_vm6, %v2122_v44, %v7759_v21  ;;  %v2173_v38 = vsel %vm1192_vm7, %v2157_v18, %v7760_v2  ;;  %v7762_v51 = vld [vmem:[#allocation61_spill] sm:$0xff]  ;;  %v7764_v21 = vld [vmem:[#allocation46_spill] sm:$0xff] }
 0x446   : > { %v2154_v39 = vsel %vm1175_vm5, %v2138_v29, %v7761_v37  ;;  %v2393_v29 = vld [vmem:[%s4591_s19 + $0x54] sm:$0xff] }
 0x448   : > { %2951 = vrot.lane.b32.xlu2 %v6567_v16, %s7641_s28 }
 0x449   : > { %2781 = vrot.lane.b32.xlu1 %v6195_v0, %s7616_s30  ;;  %v7758_v0 = vld [vmem:[#allocation90_spill] sm:$0xff] }
 0x44a   : > { %2729 = vrot.lane.b32.xlu0 %v4030_v4, %s7605_s24  ;;  %v2888_v16 = vpop.permute.xlu2 %2887  ;;  %v2185_v1 = vsel %vm1209_vm9, %v2169_v6, %v7758_v0  ;;  %v2170_v4 = vsel %vm1192_vm7, %v2154_v39, %v7762_v51 }
 0x44b   : > { %v3086_v30 = vsel %vm1192_vm7, %v3070_v31, %v2888_v16  ;;  %v6774_v24 = vpop.permute.xlu1 %2527  ;;  %v2186_v6 = vsel %vm1209_vm9, %v2170_v4, %v6581_v36  ;;  %v3971_v31 = vld [vmem:[%s4591_s19 + $0x116] sm:$0xff] }
 0x44c   : > { %v2043_v9 = vpop.permute.xlu0 %2042  ;;  %3992 = vmatmul.msk.f32.gmra.mxu1 %vm1235_vm8, %v2185_v1  ;;  %v3102_v42 = vsel %vm1209_vm9, %v3086_v30, %v6309_v34  ;;  %v4277_v36 = vld [vmem:[%s4591_s19 + $0xda] sm:$0xff] }
 0x44d   : > { %v2189_v10 = vsel %vm1209_vm9, %v2173_v38, %v2043_v9  ;;  %4090 = vmatmul.msk.f32.gmra.mxu2 %vm1235_vm8, %v3102_v42  ;;  %v2078_v19 = vsel %vm1090_vm1, %v4277_v36, %v7763_v45  ;;  %v2401_v9 = vld [vmem:[%s4591_s19 + $0xb4] sm:$0xff]  ;;  %v3972_v45 = vld [vmem:[%s4591_s19 + $0x126] sm:$0xff] }
 0x44e   : > { %3996 = vmatmul.msk.f32.vlgmr.msrb.gmra.mxu3 %vm1235_vm8, %v2189_v10  ;;  %v7765_v38 = vld [vmem:[#allocation20_spill] sm:$0xff] }
 0x450   : > { %2649 = vrot.lane.b32.xlu2 %v6788_v11, %s7690_s0 }
 0x451   : > { %2849 = vrot.lane.b32.xlu1 %v4056_v17, %s7626_s22  ;;  %v7767_v17 = vld [vmem:[#allocation86_spill] sm:$0xff] }
 0x452   : > { %2845 = vrot.lane.b32.xlu0 %v4054_v23, %s7626_s22  ;;  %v2578_v34 = vpop.permute.xlu2 %2577 }
 0x453   : > { %v6802_v32 = vpop.permute.xlu1 %2719  ;;  %v3007_v61 = vsel %vm1107_vm3, %v2991_v54, %v2578_v34 }
 0x454   : > { %v6808_v18 = vpop.permute.xlu0 %2655  ;;  %3993 = vmatmul.msk.f32.gmra.mxu1 %vm1235_vm8, %v2186_v6  ;;  %v3023_v16 = vsel %vm1124_vm2, %v3007_v61, %v6325_v8 }
 0x455   : > { %v3039_v30 = vsel %vm1141_vm4, %v3023_v16, %v6323_v20  ;;  %v7766_v20 = vld [vmem:[#allocation59_spill] sm:$0xff] }
 0x458   : > { %2833 = vrot.lane.b32.xlu2 %v6708_v52, %s7626_s22  ;;  %v2094_v52 = vsel %vm1107_vm3, %v2078_v19, %v7764_v21 }
 0x459   : > { %2913 = vrot.lane.b32.xlu1 %v4072_v62, %s7632_s23  ;;  %v2110_v42 = vsel %vm1124_vm2, %v2094_v52, %v7765_v38  ;;  %v7769_v62 = vld [vmem:[#allocation103_spill] sm:$0xff]  ;;  %v7771_v52 = vld [vmem:[#allocation41_spill] sm:$0xff]  ;;  %v7772_v38 = vld [vmem:[#allocation108_spill] sm:$0xff] }
 0x45a   : > { %2038 = vrot.lane.b32.xlu0 %v3971_v31, %s7641_s28  ;;  %v2762_v44 = vpop.permute.xlu2 %2761  ;;  %v2126_v10 = vsel %vm1141_vm4, %v2110_v42, %v7766_v20  ;;  %v3008_v31 = vsel %vm1107_vm3, %v7769_v62, %v6347_v35  ;;  %v7773_v20 = vld [vmem:[#allocation107_spill] sm:$0xff]  ;;  %v7779_v62 = vld [vmem:[#allocation37_spill] sm:$0xff] }
 0x45b   : > { %v6825_v0 = vpop.permute.xlu1 %2903  ;;  %v3055_v1 = vsel %vm1158_vm6, %v3039_v30, %v2762_v44  ;;  %v2142_v37 = vsel %vm1158_vm6, %v2126_v10, %v7767_v17  ;;  %v4278_v44 = vld [vmem:[%s4591_s19 + $0xe2] sm:$0xff]  ;;  %v7774_v17 = vld [vmem:[#allocation63_spill] sm:$0xff] }
 0x45c   : > { %v6828_v8 = vpop.permute.xlu0 %2839  ;;  %v3071_v2 = vsel %vm1175_vm5, %v3055_v1, %v6337_v13  ;;  %v2158_v13 = vsel %vm1175_vm5, %v2142_v37, %v7768_v59  ;;  %v7770_v30 = vld [vmem:[#allocation30_spill] sm:$0xff] }
 0x45d   : > { %v3087_v23 = vsel %vm1192_vm7, %v3071_v2, %v6335_v26  ;;  %v2174_v4 = vsel %vm1192_vm7, %v2158_v13, %v6444_v47  ;;  %v4031_v26 = vld [vmem:[%s4591_s19 + $0x114] sm:$0xff]  ;;  %v2079_v1 = vsel %vm1090_vm1, %v4278_v44, %v7770_v30  ;;  %v7781_v30 = vld [vmem:[#allocation58_spill] sm:$0xff] }
 0x45e   : > { %v7777_v13 = vld [vmem:[#allocation24_spill] sm:$0xff] }
 0x460   : > { %2523 = vrot.lane.b32.xlu2 %v2393_v29, %s7683_s29  ;;  %v2095_v29 = vsel %vm1107_vm3, %v2079_v1, %v7771_v52 }
 0x461   : > { %2539 = vrot.lane.b32.xlu1 %v2401_v9, %s7683_s29  ;;  %v2111_v37 = vsel %vm1124_vm2, %v2095_v29, %v7774_v17  ;;  %v7784_v17 = vld [vmem:[#allocation112_spill] sm:$0xff] }
 0x462   : > { %v2946_v39 = vpop.permute.xlu2 %2945 }
 0x463   : > { %v6848_v34 = vpop.permute.xlu1 %2529  ;;  %v3103_v51 = vsel %vm1209_vm9, %v3087_v23, %v2946_v39  ;;  %v7776_v23 = vld [vmem:[#allocation74_spill] sm:$0xff] }
 0x464   : > { %v2045_v6 = vpop.permute.xlu0 %2044  ;;  %4091 = vmatmul.msk.f32.gmra.mxu2 %vm1235_vm8, %v3103_v51  ;;  %v7778_v51 = vld [vmem:[#allocation106_spill] sm:$0xff] }
 0x465   : > { %v2190_v54 = vsel %vm1209_vm9, %v2174_v4, %v2045_v6  ;;  %v2374_v6 = vld [vmem:[%s4591_s19 + $0x30] sm:$0xff] }
 0x466   : > { %3997 = vmatmul.msk.f32.gmra.mxu3 %vm1235_vm8, %v2190_v54 }
 0x468   : > { %2715 = vrot.lane.b32.xlu2 %v2401_v9, %s7605_s24 }
 0x469   : > { %2731 = vrot.lane.b32.xlu1 %v4031_v26, %s7605_s24 }
 0x46a   : > { %v2644_v61 = vpop.permute.xlu2 %2643 }
 0x46b   : > { %v6862_v16 = vpop.permute.xlu1 %2721  ;;  %v3024_v47 = vsel %vm1124_vm2, %v3008_v31, %v2644_v61 }
 0x46c   : > { %v6865_v36 = vpop.permute.xlu0 %2657  ;;  %v3040_v19 = vsel %vm1141_vm4, %v3024_v47, %v6366_v5 }
 0x46d   : > { %v3056_v35 = vsel %vm1158_vm6, %v3040_v19, %v6364_v12  ;;  %v7775_v12 = vld [vmem:[#allocation78_spill] sm:$0xff] }
 0x46e   : > { %v2127_v39 = vsel %vm1141_vm4, %v2111_v37, %v7775_v12  ;;  %v7780_v19 = vld [vmem:[#allocation110_spill] sm:$0xff] }
 0x46f   : > { %v2143_v59 = vsel %vm1158_vm6, %v2127_v39, %v7776_v23 }
 0x470   : > { %2899 = vrot.lane.b32.xlu2 %v4031_v26, %s7632_s23  ;;  %v2159_v4 = vsel %vm1175_vm5, %v2143_v59, %v7778_v51 }
 0x471   : > { %2040 = vrot.lane.b32.xlu1 %v3972_v45, %s7641_s28  ;;  %v2175_v31 = vsel %vm1192_vm7, %v2159_v4, %v7779_v62 }
 0x472   : > { %v2828_v21 = vpop.permute.xlu2 %2827 }
 0x473   : > { %v3072_v9 = vsel %vm1175_vm5, %v3056_v35, %v2828_v21  ;;  %v6880_v2 = vpop.permute.xlu1 %2905  ;;  %v7782_v21 = vld [vmem:[#allocation109_spill] sm:$0xff] }
 0x474   : > { %v6882_v5 = vpop.permute.xlu0 %2841  ;;  %v3088_v42 = vsel %vm1192_vm7, %v3072_v9, %v7772_v38 }
 0x475   : > { %v3104_v10 = vsel %vm1209_vm9, %v3088_v42, %v7773_v20 }
 0x476   : > { %4092 = vmatmul.msk.f32.gmra.mxu2 %vm1235_vm8, %v3104_v10  ;;  %v7783_v10 = vld [vmem:[#allocation111_spill] sm:$0xff] }
 0x478   : > { %2589 = vrot.lane.b32.xlu2 %v7777_v13, %s7682_s21  ;;  %v7785_v13 = vld [vmem:[#allocation114_spill] sm:$0xff] }
 0x47a   : > { %v2518_v54 = vpop.permute.xlu2 %2517 }
 0x47b   : > { %v2532_v26 = vpop.permute.xlu1 %2531  ;;  %v2993_v47 = vsel %vm1090_vm1, %v2374_v6, %v2518_v54  ;;  %v7786_v54 = vld [vmem:[#allocation113_spill] sm:$0xff] }
 0x47c   : > { %v2047_v61 = vpop.permute.xlu0 %2046  ;;  %v3009_v44 = vsel %vm1107_vm3, %v2993_v47, %v7780_v19  ;;  %v3000_v1 = vsel %vm1090_vm1, %v6432_v60, %v2532_v26  ;;  %v7787_v26 = vld [vmem:[#allocation47_spill] sm:$0xff]  ;;  %v7788_v47 = vld [vmem:[#allocation117_spill] sm:$0xff] }
 0x47d   : > { %v2191_v45 = vsel %vm1209_vm9, %v2175_v31, %v2047_v61  ;;  %v3025_v52 = vsel %vm1124_vm2, %v3009_v44, %v7782_v21  ;;  %v2994_v61 = vsel %vm1090_vm1, %v7787_v26, %v7786_v54  ;;  %v4280_v19 = vld [vmem:[%s4591_s19 + $0xd0] sm:$0xff] }
 0x47e   : > { %3998 = vmatmul.msk.f32.gmra.mxu3 %vm1235_vm8, %v2191_v45 }
 0x480   : > { %2773 = vrot.lane.b32.xlu2 %v7781_v30, %s7616_s30  ;;  %v7789_v30 = vld [vmem:[#allocation116_spill] sm:$0xff] }
 0x482   : > { %v2710_v35 = vpop.permute.xlu2 %2709 }
 0x483   : > { %v6913_v29 = vpop.permute.xlu1 %2599  ;;  %v3041_v9 = vsel %vm1141_vm4, %v3025_v52, %v2710_v35 }
 0x484   : > { %v2596_v38 = vpop.permute.xlu0 %2595  ;;  %v3057_v20 = vsel %vm1158_vm6, %v3041_v9, %v6403_v15  ;;  %v4279_v15 = vld [vmem:[%s4591_s19 + $0x70] sm:$0xff] }
 0x485   : > { %v6917_v42 = vsel %vm1107_vm3, %v3000_v1, %v2596_v38  ;;  %v3073_v37 = vsel %vm1175_vm5, %v3057_v20, %v7784_v17  ;;  %v4078_v9 = vld [vmem:[%s4591_s19 + $0x130] sm:$0xff] }
 0x488   : > { %2957 = vrot.lane.b32.xlu2 %v7783_v10, %s7641_s28 }
 0x48a   : > { %v2894_v12 = vpop.permute.xlu2 %2893 }
 0x48b   : > { %v3089_v39 = vsel %vm1192_vm7, %v3073_v37, %v2894_v12  ;;  %v6926_v23 = vpop.permute.xlu1 %2723 }
 0x48c   : > { %v6928_v59 = vpop.permute.xlu0 %2663  ;;  %v3105_v51 = vsel %vm1209_vm9, %v3089_v39, %v7785_v13  ;;  %v2376_v39 = vld [vmem:[%s4591_s19 + $0x48] sm:$0xff] }
 0x48d   : > { %4093 = vmatmul.msk.f32.gmra.mxu2 %vm1235_vm8, %v3105_v51  ;;  %v2995_v13 = vsel %vm1090_vm1, %v2376_v39, %v6480_v48  ;;  %v7791_v39 = vld [vmem:[#allocation96_spill] sm:$0xff] }
 0x490   : > { %2591 = vrot.lane.b32.xlu2 %v4279_v15, %s7682_s21 }
 0x492   : > { %v2584_v4 = vpop.permute.xlu2 %2583 }
 0x493   : > { %v6935_v6 = vpop.permute.xlu1 %2783  ;;  %v3010_v31 = vsel %vm1107_vm3, %v2994_v61, %v2584_v4 }
 0x494   : > { %v6940_v62 = vpop.permute.xlu0 %2779  ;;  %v3026_v45 = vsel %vm1124_vm2, %v3010_v31, %v7788_v47 }
 0x495   : > { %v3042_v1 = vsel %vm1141_vm4, %v3026_v45, %v7789_v30  ;;  %v6989_v45 = vld [vmem:[%s7385_s3 + $0x1] ss:$0 sm:$0xff] }
 0x498   : > { %2775 = vrot.lane.b32.xlu2 %v4280_v19, %s7616_s30 }
 0x49a   : > { %v2768_v44 = vpop.permute.xlu2 %2767 }
 0x49b   : > { %v6949_v35 = vpop.permute.xlu1 %2907  ;;  %v3058_v21 = vsel %vm1158_vm6, %v3042_v1, %v2768_v44  ;;  %v2271_v44 = vpop.f32.mrf.mxu1  ;;  %v4053_v1 = vld [vmem:[%s4591_s19 + $0x140] sm:$0xff] }
 0x49c   : > { %v6952_v52 = vpop.permute.xlu0 %2847  ;;  %v3074_v38 = vsel %vm1175_vm5, %v3058_v21, %v6453_v49  ;;  %v7790_v49 = vld [vmem:[#allocation27_spill] sm:$0xff]  ;;  %v7003_v21 = vld [vmem:[%s7385_s3 + $0x2] ss:$0 sm:$0xff] }
 0x49d   : > { %v3090_v10 = vsel %vm1192_vm7, %v3074_v38, %v6449_v58  ;;  %v3011_v58 = vsel %vm1107_vm3, %v2995_v13, %v6473_v56 }
 0x4a0   : > { %2959 = vrot.lane.b32.xlu2 %v4078_v9, %s7641_s28  ;;  %v2272_v9 = vadd.f32 %v6989_v45, %v2271_v44  ;;  %v7794_v44 = vld [vmem:[#allocation31_spill] sm:$0xff] }
 0x4a2   : > { %v2952_v20 = vpop.permute.xlu2 %2951 }
 0x4a3   : > { %v2534_v17 = vpop.permute.xlu1 %2533  ;;  %v3106_v37 = vsel %vm1209_vm9, %v3090_v10, %v2952_v20 }
 0x4a4   : > { %v6961_v12 = vpop.permute.xlu0 %2963  ;;  %4094 = vmatmul.msk.f32.gmra.mxu2 %vm1235_vm8, %v3106_v37  ;;  %v3001_v51 = vsel %vm1090_vm1, %v7790_v49, %v2534_v17  ;;  %v2399_v49 = vld [vmem:[%s4591_s19 + $0x9c] sm:$0xff] }
 0x4a8   : > { %2593 = vrot.lane.b32.xlu2 %v6432_v60, %s7682_s21 }
 0x4aa   : > { %v2650_v15 = vpop.permute.xlu2 %2649 }
 0x4ab   : > { %v2598_v4 = vpop.permute.xlu1 %2597  ;;  %v3027_v54 = vsel %vm1124_vm2, %v3011_v58, %v2650_v15  ;;  %v4281_v58 = vld [vmem:[%s4591_s19 + $0xb2] sm:$0xff] }
 0x4ac   : > { %v3017_v26 = vsel %vm1107_vm3, %v3001_v51, %v2598_v4  ;;  %v6975_v61 = vpop.permute.xlu0 %2537  ;;  %v3043_v48 = vsel %vm1141_vm4, %v3027_v54, %v6529_v40  ;;  %v7792_v4 = vld [vmem:[#allocation18_spill] sm:$0xff] }
 0x4ad   : > { %v3059_v60 = vsel %vm1158_vm6, %v3043_v48, %v6517_v63  ;;  %v2075_v54 = vsel %vm1090_vm1, %v4281_v58, %v7792_v4 }
 0x4b0   : > { %2777 = vrot.lane.b32.xlu2 %v6456_v25, %s7616_s30 }
 0x4b2   : > { %v2834_v31 = vpop.permute.xlu2 %2833 }
 0x4b3   : > { %v3075_v56 = vsel %vm1175_vm5, %v3059_v60, %v2834_v31  ;;  %v6984_v47 = vpop.permute.xlu1 %2665 }
 0x4b4   : > { %v2662_v19 = vpop.permute.xlu0 %2661  ;;  %v3091_v40 = vsel %vm1192_vm7, %v3075_v56, %v6559_v33 }
 0x4b5   : > { %v6994_v30 = vsel %vm1124_vm2, %v3017_v26, %v2662_v19  ;;  %v3107_v63 = vsel %vm1209_vm9, %v3091_v40, %v6553_v46  ;;  %v2319_v46 = vmax.f32 %v2272_v9, 0.0  ;;  %v7793_v19 = vld [vmem:[#allocation32_spill] sm:$0xff]  ;;  %v7795_v9 = vld [vmem:[#allocation54_spill] sm:$0xff] }
 0x4b6   : > { %4095 = vmatmul.msk.f32.gmra.mxu2 %vm1235_vm8, %v3107_v63 }
 0x4b8   : > { %2961 = vrot.lane.b32.xlu2 %v4053_v1, %s7641_s28 }
 0x4b9   : > { %v3196_v33 = vpop.f32.mrf.mxu2 }
 0x4ba   : > { %v3197_v38 = vadd.f32 %v7003_v21, %v3196_v33  ;;  %v2524_v20 = vpop.permute.xlu2 %2523  ;;  %v7796_v33 = vld [vmem:[#allocation70_spill] sm:$0xff] }
 0x4bb   : > { %v7008_v10 = vpop.permute.xlu1 %2781  ;;  %v2996_v13 = vsel %vm1090_vm1, %v7791_v39, %v2524_v20 }
 0x4bc   : > { %v3244_v17 = vmax.f32 %v3197_v38, 0.0  ;;  %v7010_v37 = vpop.permute.xlu0 %2729  ;;  %v3012_v15 = vsel %vm1107_vm3, %v2996_v13, %v6590_v3  ;;  %v2091_v3 = vsel %vm1107_vm3, %v2075_v54, %v7793_v19  ;;  %v4029_v54 = vld [vmem:[%s4591_s19 + $0xfc] sm:$0xff] }
 0x4bd   : > { %v3028_v48 = vsel %vm1124_vm2, %v3012_v15, %v6585_v7  ;;  %v2107_v63 = vsel %vm1124_vm2, %v2091_v3, %v7794_v44  ;;  %v2274_v15 = vpop.f32.mrf.mxu1  ;;  %v7799_v44 = vld [vmem:[#allocation104_spill] sm:$0xff] }
 0x4be   : > { %v4224_v51 = vpack.i.bf16 %v2319_v46, %v3244_v17  ;;  %v2123_v7 = vsel %vm1141_vm4, %v2107_v63, %v7795_v9  ;;  %v7797_v17 = vld [vmem:[#allocation81_spill] sm:$0xff]  ;;  %v2997_v63 = vsel %vm1090_vm1, %v7799_v44, %v6657_v27 }
 0x4bf   : > { %v2139_v38 = vsel %vm1158_vm6, %v2123_v7, %v7796_v33  ;;  %v4282_v33 = vld [vmem:[%s4591_s19 + $0xc2] sm:$0xff] }
 0x4c0   : > { %2535 = vrot.lane.b32.xlu2 %v2399_v49, %s7683_s29  ;;  %4225 = vxpose.xlu1.b32.start [1/16] (narrow) %v4224_v51, 8  ;;  %v4057_v49 = vld [vmem:[%s4591_s19 + $0x170] sm:$0xff] }
 0x4c1   : > { %2969 = vrot.lane.b32.xlu0 %v4057_v49, %s7641_s28 }
 0x4c2   : > { %v2716_v26 = vpop.permute.xlu2 %2715 }
 0x4c3   : > { %v7023_v60 = vpop.permute.xlu1 %2849  ;;  %v3044_v31 = vsel %vm1141_vm4, %v3028_v48, %v2716_v26  ;;  %v2275_v26 = vadd.f32 %v6989_v45, %v2274_v15  ;;  %v7802_v15 = vld [vmem:[#allocation77_spill] sm:$0xff] }
 0x4c4   : > { %v7026_v56 = vpop.permute.xlu0 %2845  ;;  %v3060_v40 = vsel %vm1158_vm6, %v3044_v31, %v6631_v14  ;;  %v2155_v14 = vsel %vm1175_vm5, %v2139_v38, %v7797_v17  ;;  %v7800_v38 = vld [vmem:[#allocation22_spill] sm:$0xff]  ;;  %v7801_v17 = vld [vmem:[#allocation29_spill] sm:$0xff] }
 0x4c5   : > { %v3076_v20 = vsel %vm1175_vm5, %v3060_v40, %v6621_v22  ;;  %v2320_v3 = vmax.f32 %v2275_v26, 0.0 }
 0x4c8   : > { %2659 = vrot.lane.b32.xlu2 %v6456_v25, %s7690_s0  ;;  %v7798_v25 = vld [vmem:[#allocation115_spill] sm:$0xff] }
 0x4c9   : > { %v2171_v51 = vsel %vm1192_vm7, %v2155_v14, %v7798_v25 }
 0x4ca   : > { %v2900_v46 = vpop.permute.xlu2 %2899 }
 0x4cb   : > { %v3092_v39 = vsel %vm1192_vm7, %v3076_v20, %v2900_v46  ;;  %v7045_v13 = vpop.permute.xlu1 %2913  ;;  %v2076_v20 = vsel %vm1090_vm1, %v4282_v33, %v7800_v38  ;;  %v4080_v33 = vld [vmem:[%s4591_s19 + $0x160] sm:$0xff] }
 0x4cc   : > { %v2039_v58 = vpop.permute.xlu0 %2038  ;;  %v3108_v4 = vsel %vm1209_vm9, %v3092_v39, %v6663_v55  ;;  %v2092_v14 = vsel %vm1107_vm3, %v2076_v20, %v7801_v17 }
 0x4cd   : > { %v2187_v22 = vsel %vm1209_vm9, %v2171_v51, %v2039_v58  ;;  %4096 = vmatmul.msk.f32.gmra.mxu2 %vm1235_vm8, %v3108_v4  ;;  %v2108_v58 = vsel %vm1124_vm2, %v2092_v14, %v7802_v15  ;;  %v4071_v4 = vld [vmem:[%s4591_s19 + $0x15c] sm:$0xff] }
 0x4ce   : > { %3994 = vmatmul.msk.f32.gmra.mxu1 %vm1235_vm8, %v2187_v22  ;;  %v7803_v22 = vld [vmem:[#allocation45_spill] sm:$0xff] }
 0x4d0   : > { %2727 = vrot.lane.b32.xlu2 %v4029_v54, %s7605_s24  ;;  %v3199_v48 = vpop.f32.mrf.mxu2  ;;  %v7804_v54 = vld [vmem:[#allocation66_spill] sm:$0xff] }
 0x4d1   : > { %v3200_v31 = vadd.f32 %v7003_v21, %v3199_v48 }
 0x4d2   : > { %v2590_v19 = vpop.permute.xlu2 %2589 }
 0x4d3   : > { %v3245_v55 = vmax.f32 %v3200_v31, 0.0  ;;  %v7060_v40 = vpop.permute.xlu1 %2539  ;;  %v3013_v7 = vsel %vm1107_vm3, %v2997_v63, %v2590_v19 }
 0x4d4   : > { %v3029_v46 = vsel %vm1124_vm2, %v3013_v7, %v6695_v43  ;;  %v2124_v43 = vsel %vm1141_vm4, %v2108_v58, %v7803_v22 }
 0x4d5   : > { %v4226_v9 = vpack.i.bf16 %v2320_v3, %v3245_v55  ;;  %v3045_v27 = vsel %vm1141_vm4, %v3029_v46, %v6686_v28  ;;  %v2140_v26 = vsel %vm1158_vm6, %v2124_v43, %v7804_v54  ;;  %v7805_v28 = vld [vmem:[#allocation105_spill] sm:$0xff]  ;;  %v2277_v55 = vpop.f32.mrf.mxu1 }
 0x4d6   : > { %v2156_v31 = vsel %vm1175_vm5, %v2140_v26, %v7805_v28  ;;  %v2278_v38 = vadd.f32 %v6989_v45, %v2277_v55 }
 0x4d7   : > { %4227 = vxpose.xlu1.b32.cont [2/16] (narrow) %v4226_v9, 8  ;;  %v7806_v9 = vld [vmem:[#allocation83_spill] sm:$0xff] }
 0x4d8   : > { %2843 = vrot.lane.b32.xlu2 %v4053_v1, %s7626_s22  ;;  %v4015_v1 = vld [vmem:[%s4591_s19 + $0x110] sm:$0xff]  ;;  %v2172_v7 = vsel %vm1192_vm7, %v2156_v31, %v7806_v9  ;;  %v2321_v46 = vmax.f32 %v2278_v38, 0.0 }
 0x4d9   : > { %2667 = vrot.lane.b32.xlu0 %v4015_v1, %s7690_s0 }
 0x4da   : > { %v2774_v39 = vpop.permute.xlu2 %2773 }
 0x4db   : > { %v7076_v25 = vpop.permute.xlu1 %2731  ;;  %v3061_v51 = vsel %vm1158_vm6, %v3045_v27, %v2774_v39  ;;  %v4283_v39 = vld [vmem:[%s4591_s19 + $0x68] sm:$0xff] }
 0x4dc   : > { %v3077_v48 = vsel %vm1175_vm5, %v3061_v51, %v6744_v57  ;;  %v2998_v27 = vsel %vm1090_vm1, %v4283_v39, %v6774_v24 }
 0x4dd   : > { %v3093_v3 = vsel %vm1192_vm7, %v3077_v48, %v6732_v50  ;;  %v2280_v54 = vpop.f32.mrf.mxu1 }
 0x4e0   : > { %2911 = vrot.lane.b32.xlu2 %v4071_v4, %s7632_s23  ;;  %v7113_v4 = vld [vmem:[%s4591_s19 + $0xb0] sm:$0xff] }
 0x4e1   : > { %2851 = vrot.lane.b32.xlu0 %v4057_v49, %s7626_s22  ;;  %v4081_v49 = vld [vmem:[%s4591_s19 + $0x178] sm:$0xff]  ;;  %s7271_s22 = sand.u32 1, %s4417_s14  }
 0x4e2   : > { %v2958_v19 = vpop.permute.xlu2 %2957  ;;  %s7438_s0 = scalar_lea.vmem [#allocation7], %s7271_s22 }
 0x4e3   : > { %v2041_v44 = vpop.permute.xlu1 %2040  ;;  %v3109_v63 = vsel %vm1209_vm9, %v3093_v3, %v2958_v19 }
 0x4e4   : > { %4097 = vmatmul.msk.f32.gmra.mxu2 %vm1235_vm8, %v3109_v63  ;;  %v2188_v57 = vsel %vm1209_vm9, %v2172_v7, %v2041_v44  ;;  %v4070_v7 = vld [vmem:[%s4591_s19 + $0x154] sm:$0xff] }
 0x4e5   : > { %3995 = vmatmul.msk.f32.gmra.mxu1 %vm1235_vm8, %v2188_v57 }
 0x4e7   : > { %v3202_v50 = vpop.f32.mrf.mxu2 }
 0x4e8   : > { %v3203_v20 = vadd.f32 %v7003_v21, %v3202_v50  ;;  %2967 = vrot.lane.b32.xlu2 %v4080_v33, %s7641_s28 }
 0x4e9   : > { %2971 = vrot.lane.b32.xlu0 %v4081_v49, %s7641_s28  ;;  %v4073_v49 = vld [vmem:[%s4591_s19 + $0x174] sm:$0xff] }
 0x4ea   : > { %v3246_v17 = vmax.f32 %v3203_v20, 0.0  ;;  %v2592_v14 = vpop.permute.xlu2 %2591 }
 0x4eb   : > { %v3014_v15 = vsel %vm1107_vm3, %v2998_v27, %v2592_v14 }
 0x4ec   : > { %v4228_v51 = vpack.i.bf16 %v2321_v46, %v3246_v17  ;;  %v3030_v58 = vsel %vm1124_vm2, %v3014_v15, %v6808_v18  ;;  %v2281_v18 = vadd.f32 %v6989_v45, %v2280_v54 }
 0x4ed   : > { %v3046_v43 = vsel %vm1141_vm4, %v3030_v58, %v6802_v32 }
 0x4ee   : > { %4229 = vxpose.xlu1.b32.cont [3/16] (narrow) %v4228_v51, 8  ;;  %v2322_v3 = vmax.f32 %v2281_v18, 0.0  ;;  %v2409_v51 = vld [vmem:[%s4591_s19 + $0xb8] sm:$0xff] }
 0x4f0   : > { %2601 = vrot.lane.b32.xlu2 %v7113_v4, %s7682_s21 }
 0x4f2   : > { %v2776_v22 = vpop.permute.xlu2 %2775 }
 0x4f3   : > { %v3062_v24 = vsel %vm1158_vm6, %v3046_v43, %v2776_v22 }
 0x4f4   : > { %v3078_v26 = vsel %vm1175_vm5, %v3062_v24, %v6828_v8 }
 0x4f5   : > { %v3094_v32 = vsel %vm1192_vm7, %v3078_v26, %v6825_v0 }
 0x4f8   : > { %2725 = vrot.lane.b32.xlu2 %v6637_v53, %s7605_s24  ;;  %v4285_v53 = vld [vmem:[%s4591_s19 + $0x78] sm:$0xff] }
 0x4f9   : > { %v3205_v48 = vpop.f32.mrf.mxu2  ;;  %v2999_v63 = vsel %vm1090_vm1, %v4285_v53, %v6848_v34 }
 0x4fa   : > { %v3206_v28 = vadd.f32 %v7003_v21, %v3205_v48  ;;  %v2960_v31 = vpop.permute.xlu2 %2959 }
 0x4fb   : > { %v3110_v19 = vsel %vm1209_vm9, %v3094_v32, %v2960_v31 }
 0x4fc   : > { %v3247_v55 = vmax.f32 %v3206_v28, 0.0  ;;  %4098 = vmatmul.msk.f32.gmra.mxu2 %vm1235_vm8, %v3110_v19 }
 0x4fe   : > { %v4230_v8 = vpack.i.bf16 %v2322_v3, %v3247_v55  ;;  %v4286_v3 = vld [vmem:[%s4591_s19 + $0x98] sm:$0xff] }
 0x500   : > { %2785 = vrot.lane.b32.xlu2 %v4015_v1, %s7616_s30  ;;  %4231 = vxpose.xlu1.b32.cont [4/16] (narrow) %v4230_v8, 8  ;;  %v2283_v1 = vpop.f32.mrf.mxu1 }
 0x501   : > { %v2284_v50 = vadd.f32 %v6989_v45, %v2283_v1 }
 0x502   : > { %v2594_v44 = vpop.permute.xlu2 %2593 }
 0x503   : > { %v3015_v9 = vsel %vm1107_vm3, %v2999_v63, %v2594_v44  ;;  %v2323_v17 = vmax.f32 %v2284_v50, 0.0 }
 0x504   : > { %v3031_v0 = vsel %vm1124_vm2, %v3015_v9, %v6865_v36 }
 0x505   : > { %v3047_v33 = vsel %vm1141_vm4, %v3031_v0, %v6862_v16 }
 0x508   : > { %2909 = vrot.lane.b32.xlu2 %v4070_v7, %s7632_s23  ;;  %v2286_v58 = vpop.f32.mrf.mxu1 }
 0x50a   : > { %v2778_v57 = vpop.permute.xlu2 %2777 }
 0x50b   : > { %v3063_v38 = vsel %vm1158_vm6, %v3047_v33, %v2778_v57 }
 0x50c   : > { %v3079_v34 = vsel %vm1175_vm5, %v3063_v38, %v6882_v5  ;;  %v4039_v5 = vld [vmem:[%s4591_s19 + $0x118] sm:$0xff]  ;;  %s3658_s19 = sshll.u32 %s4584_s12, 1 }
 0x50d   : > { %v3095_v16 = vsel %vm1192_vm7, %v3079_v34, %v6880_v2  ;;  %v2287_v2 = vadd.f32 %v6989_v45, %v2286_v58  ;;  %s421_s24 = sadd.s32 %s3658_s19, %s419_s25 }
 0x50f   : > { %v2324_v24 = vmax.f32 %v2287_v2, 0.0 }
 0x510   : > { %2965 = vrot.lane.b32.xlu2 %v6606_v41, %s7641_s28  ;;  %v3208_v36 = vpop.f32.mrf.mxu2  ;;  %v2289_v44 = vpop.f32.mrf.mxu1 }
 0x511   : > { %v3209_v20 = vadd.f32 %v7003_v21, %v3208_v36 }
 0x512   : > { %v2962_v46 = vpop.permute.xlu2 %2961 }
 0x513   : > { %v3248_v14 = vmax.f32 %v3209_v20, 0.0  ;;  %v3111_v39 = vsel %vm1209_vm9, %v3095_v16, %v2962_v46  ;;  %v3003_v16 = vsel %vm1090_vm1, %v6788_v11, %v6975_v61 }
 0x514   : > { %4099 = vmatmul.msk.f32.gmra.mxu2 %vm1235_vm8, %v3111_v39 }
 0x515   : > { %v4232_v27 = vpack.i.bf16 %v2323_v17, %v3248_v14 }
 0x517   : > { %4233 = vxpose.xlu1.b32.cont [5/16] (narrow) %v4232_v27, 8 }
 0x518   : > { %2603 = vrot.lane.b32.xlu2 %v2409_v51, %s7682_s21  ;;  %v2292_v34 = vpop.f32.mrf.mxu1 }
 0x519   : > { %v2293_v36 = vadd.f32 %v6989_v45, %v2292_v34 }
 0x51a   : > { %v2536_v41 = vpop.permute.xlu2 %2535 }
 0x51b   : > { %v3002_v55 = vsel %vm1090_vm1, %v4286_v3, %v2536_v41 }
 0x520   : > { %2787 = vrot.lane.b32.xlu2 %v4039_v5, %s7616_s30  ;;  %s4111_s30 = sshll.u32 %s4429_s17, 1 }
 0x521   : > { %s7274_s28 = sadd.s32 %s4425_s16, %s4111_s30  ;;  %s3655_s16 = sshll.u32 %s7271_s22, 2 }
 0x522   : > { %v2660_v15 = vpop.permute.xlu2 %2659  ;;  %s4112_s29 = sshll.u32 %s7274_s28, 2  ;;  %s397_s25 = scalar_lea.vmem [#allocation3], %s3655_s16 }
 0x523   : > { %v3032_v18 = vsel %vm1124_vm2, %v6917_v42, %v2660_v15  ;;  %s3436_s15 = scalar_lea.hbm %s7390_s8, %s4112_s29  ;;  %s3438_s19 = sshll.u32 %s397_s25, 4  ;;  %s3439_s19 = int_to_ptr.vmem [resolvable:$true] %s3438_s19 }
 0x524   : > { %v3048_v28 = vsel %vm1141_vm4, %v3032_v18, %v6926_v23  ;;  %v3018_v23 = vsel %vm1107_vm3, %v3002_v55, %v6913_v29  ;;  %s3415_s30 = scalar_lea.sflag [#allocation4], %s7271_s22 }
 0x525   : > { %v3064_v31 = vsel %vm1158_vm6, %v3048_v28, %v6940_v62  ;;  %v2290_v62 = vadd.f32 %v6989_v45, %v2289_v44  ;;  %v3034_v63 = vsel %vm1124_vm2, %v3018_v23, %v6928_v59 }
 0x527   : > { %v3211_v22 = vpop.f32.mrf.mxu2  ;;  %v2325_v0 = vmax.f32 %v2290_v62, 0.0 }
 0x528   : > { %v3212_v43 = vadd.f32 %v7003_v21, %v3211_v22  ;;  %2915 = vrot.lane.b32.xlu2 %v4073_v49, %s7632_s23  ;;  %s3659_s23 = sshll.u32 %s421_s24, 2  ;;  %s3440_s24 = sshll.u32 %s3436_s15, 4  ;;  %s3441_s24 = int_to_ptr.hbm [resolvable:$true] %s3440_s24 }
 0x529   : > { %s423_s21 = scalar_lea.vmem %s7808_s1, %s3659_s23  ;;  %s4301_s23 = sshra.s32 %s3441_s24, 4  ;;  %s4302_s23 = int_to_ptr.hbm [resolvable:$true] %s4301_s23 }
 0x52a   : > { %v3249_v54 = vmax.f32 %v3212_v43, 0.0  ;;  %v2728_v26 = vpop.permute.xlu2 %2727  ;;  %s4303_s17 = scalar_lea.hbm %s4302_s23, 4  ;;  %p4308_p4 = scmp.lt.s32.totalorder %s4302_s23, %s7390_s8 }
 0x52b   : > { %p4304_p0 = scmp.ne.s32.totalorder %s4302_s23, %s4303_s17  ;;  %p4309_p5 = scmp.lt.s32.totalorder %s4307_s11, %s4303_s17 }
 0x52c   : > { %v4234_v48 = vpack.i.bf16 %v2324_v24, %v3249_v54 }
 0x52d   : > { %p4305_p1 = pnand %p4304_p0, %p4560_p3  ;;  %p4310_p6 = por %p4309_p5, %p4308_p4 }
 0x52e   : > { %4235 = vxpose.xlu1.b32.cont [6/16] (narrow) %v4234_v48, 8 }
 0x52f   : > { %p4306_p2 = pneg %p4305_p1 }
 0x531   : > { %p4311_p7 = pnand %p4310_p6, %p4306_p2 }
 0x532   : > { %v2844_v32 = vpop.permute.xlu2 %2843 }
 0x533   : > { %v3080_v19 = vsel %vm1175_vm5, %v3064_v31, %v2844_v32  ;;  %v2970_v15 = vpop.permute.xlu0 %2969 }
 0x534   : > { %v3096_v8 = vsel %vm1192_vm7, %v3080_v19, %v6949_v35  ;;  %v3050_v35 = vsel %vm1141_vm4, %v3034_v63, %v2728_v26 }
 0x535   : > { %v3112_v42 = vsel %vm1209_vm9, %v3096_v8, %v6961_v12  ;;  %v3066_v12 = vsel %vm1158_vm6, %v3050_v35, %v6935_v6 }
 0x536   : > { %4100 = vmatmul.msk.f32.gmra.mxu2 %vm1235_vm8, %v3112_v42  ;;  %v3082_v29 = vsel %vm1175_vm5, %v3066_v12, %v6952_v52  ;;  %v2326_v52 = vmax.f32 %v2293_v36, 0.0 }
 0x539   : > { %v3214_v53 = vpop.f32.mrf.mxu2 }
 0x53a   : > { %v3215_v9 = vadd.f32 %v7003_v21, %v3214_v53  ;;  %v2912_v7 = vpop.permute.xlu2 %2911 }
 0x53b   : > { %v3098_v1 = vsel %vm1192_vm7, %v3082_v29, %v2912_v7 }
 0x53c   : > { %v3250_v57 = vmax.f32 %v3215_v9, 0.0 }
 0x53e   : > { %v4236_v33 = vpack.i.bf16 %v2325_v0, %v3250_v57 }
 0x540   : > { %4237 = vxpose.xlu1.b32.cont [7/16] (narrow) %v4236_v33, 8 }
 0x542   : > { %v2968_v38 = vpop.permute.xlu2 %2967 }
 0x543   : > { %v3114_v59 = vsel %vm1209_vm9, %v3098_v1, %v2968_v38 }
 0x544   : > { %4102 = vmatmul.msk.f32.vlgmr.msra.gmra.mxu3 %vm1235_vm8, %v3114_v59 }
 0x54a   : > { %v2602_v50 = vpop.permute.xlu2 %2601 }
 0x54b   : > { %v3019_v14 = vsel %vm1107_vm3, %v3003_v16, %v2602_v50  ;;  %v2310_v16 = vpop.f32.mrf.mxu3 }
 0x54c   : > { %v3035_v27 = vsel %vm1124_vm2, %v3019_v14, %v6984_v47  ;;  %v2295_v47 = vpop.f32.mrf.mxu1 }
 0x54d   : > { %v3051_v51 = vsel %vm1141_vm4, %v3035_v27, %v7010_v37  ;;  %v2296_v37 = vadd.f32 %v6989_v45, %v2295_v47 }
 0x54f   : > { %v2327_v24 = vmax.f32 %v2296_v37, 0.0 }
 0x550   : > { %v3217_v20 = vpop.f32.mrf.mxu2 }
 0x551   : > { %v3218_v46 = vadd.f32 %v7003_v21, %v3217_v20 }
 0x552   : > { %v2726_v6 = vpop.permute.xlu2 %2725 }
 0x553   : > { %v3251_v17 = vmax.f32 %v3218_v46, 0.0  ;;  %v3049_v2 = vsel %vm1141_vm4, %v6994_v30, %v2726_v6  ;;  %v2668_v30 = vpop.permute.xlu0 %2667 }
 0x554   : > { %v3065_v22 = vsel %vm1158_vm6, %v3049_v2, %v7008_v10  ;;  %v3004_v10 = vsel %vm1090_vm1, %v7113_v4, %v7060_v40  ;;  %v2298_v3 = vpop.f32.mrf.mxu1 }
 0x555   : > { %v4238_v39 = vpack.i.bf16 %v2326_v52, %v3251_v17  ;;  %v2299_v8 = vadd.f32 %v6989_v45, %v2298_v3  ;;  %v2313_v52 = vpop.f32.mrf.mxu3  ;;  %v3293_v3 = vld [vmem:[%s7386_s4] sm:$0xff] }
 0x557   : > { %4239 = vxpose.xlu1.b32.cont [8/16] (narrow) %v4238_v39, 8  ;;  %v2328_v63 = vmax.f32 %v2299_v8, 0.0  ;;  %v3294_v8 = vld [vmem:[%s7386_s4 + $0x8] sm:$0x1f] }
 0x55a   : > { %v2786_v41 = vpop.permute.xlu2 %2785 }
 0x55b   : > { %v3067_v5 = vsel %vm1158_vm6, %v3051_v51, %v2786_v41  ;;  %v2852_v32 = vpop.permute.xlu0 %2851 }
 0x55c   : > { %v3083_v58 = vsel %vm1175_vm5, %v3067_v5, %v7023_v60 }
 0x55d   : > { %v3099_v11 = vsel %vm1192_vm7, %v3083_v58, %v7045_v13  ;;  %v3081_v13 = vsel %vm1175_vm5, %v3065_v22, %v7026_v56  ;;  %v2316_v17 = vpop.f32.mrf.mxu3 }
 0x55e   : > { %v3115_v61 = vsel %vm1209_vm9, %v3099_v11, %v2970_v15 }
 0x55f   : > { %4103 = vmatmul.msk.f32.gmra.mxu3 %vm1235_vm8, %v3115_v61  ;;  %v2311_v61 = vadd.f32 %v6989_v45, %v2310_v16  ;;  %v3397_v16 = vld [vmem:[%s423_s21] sm:$0xf] }
 0x561   : > { %v2332_v2 = vmax.f32 %v2311_v61, 0.0 }
 0x562   : > { %v2910_v49 = vpop.permute.xlu2 %2909 }
 0x563   : > { %v3097_v54 = vsel %vm1192_vm7, %v3081_v13, %v2910_v49  ;;  %v2972_v53 = vpop.permute.xlu0 %2971 }
 0x567   : > { %v3220_v43 = vpop.f32.mrf.mxu2 }
 0x568   : > { %v3221_v60 = vadd.f32 %v7003_v21, %v3220_v43  ;;  %v2314_v43 = vadd.f32 %v6989_v45, %v2313_v52 }
 0x56a   : > { %v3252_v26 = vmax.f32 %v3221_v60, 0.0  ;;  %v2966_v18 = vpop.permute.xlu2 %2965  ;;  %v2333_v13 = vmax.f32 %v2314_v43, 0.0 }
 0x56b   : > { %v3113_v48 = vsel %vm1209_vm9, %v3097_v54, %v2966_v18  ;;  %v2317_v54 = vadd.f32 %v6989_v45, %v2316_v17 }
 0x56c   : > { %v4240_v28 = vpack.i.bf16 %v2327_v24, %v3252_v26  ;;  %4101 = vmatmul.msk.f32.gmra.mxu2 %vm1235_vm8, %v3113_v48 }
 0x56d   : > { %v2334_v48 = vmax.f32 %v2317_v54, 0.0 }
 0x56e   : > { %4241 = vxpose.xlu1.b32.cont [9/16] (narrow) %v4240_v28, 8 }
 0x572   : > { %v2604_v31 = vpop.permute.xlu2 %2603 }
 0x573   : > { %v3020_v56 = vsel %vm1107_vm3, %v3004_v10, %v2604_v31  ;;  %v3299_v31 = vld [vmem:[%s7387_s5 + $0x8] sm:$0x1f]  ;;  %v3298_v10 = vld [vmem:[%s7387_s5] sm:$0xff] }
 0x574   : > { %v3036_v55 = vsel %vm1124_vm2, %v3020_v56, %v2668_v30 }
 0x575   : > { %v3052_v44 = vsel %vm1141_vm4, %v3036_v55, %v7076_v25  ;;  %v2301_v25 = vpop.f32.mrf.mxu1  ;;  %v7807_v55 = vld [vmem:[#allocation72_spill] sm:$0xff] }
 0x576   : > { %v2302_v57 = vadd.f32 %v6989_v45, %v2301_v25 }
 0x578   : > { %v2329_v29 = vmax.f32 %v2302_v57, 0.0  ;;  %v3360_v57 = vld [vmem:[%s7388_s6] sm:$0xf] }
 0x57a   : > { %v2788_v19 = vpop.permute.xlu2 %2787 }
 0x57b   : > { %v3068_v42 = vsel %vm1158_vm6, %v3052_v44, %v2788_v19 }
 0x57c   : > { %v3084_v40 = vsel %vm1175_vm5, %v3068_v42, %v2852_v32  ;;  %v4451_v32 = vmov 0  }
 0x57d   : > { %v2304_v59 = vpop.f32.mrf.mxu1  ;;  %4262 = vset.pattern.permute.xlu0 %v4451_v32  ;;  %4261 = vset.pattern.permute.xlu2 %v4451_v32 }
 0x57e   : > { %v2305_v50 = vadd.f32 %v6989_v45, %v2304_v59  ;;  %3307 = vperm.xlu0 %4262, %v3299_v31   ;;  %3302 = vperm.xlu2 %4261, %v3298_v10  }
 0x57f   : > { %v3223_v23 = vpop.f32.mrf.mxu2 }
 0x580   : > { %v3224_v62 = vadd.f32 %v7003_v21, %v3223_v23  ;;  %v2330_v20 = vmax.f32 %v2305_v50, 0.0 }
 0x582   : > { %v3253_v4 = vmax.f32 %v3224_v62, 0.0  ;;  %v2916_v9 = vpop.permute.xlu2 %2915 }
 0x583   : > { %v3100_v7 = vsel %vm1192_vm7, %v3084_v40, %v2916_v9 }
 0x584   : > { %v4242_v35 = vpack.i.bf16 %v2328_v63, %v3253_v4  ;;  %v3116_v0 = vsel %vm1209_vm9, %v3100_v7, %v2972_v53 }
 0x585   : > { %4104 = vmatmul.msk.f32.gmra.mxu3 %vm1235_vm8, %v3116_v0  ;;  %v2307_v14 = vpop.f32.mrf.mxu1 }
 0x586   : > { %4243 = vxpose.xlu1.b32.cont [10/16] (narrow) %v4242_v35, 8  ;;  %v2308_v39 = vadd.f32 %v6989_v45, %v2307_v14  ;;  %v3361_v45 = vld [vmem:[%s7389_s7] sm:$0xf] }
 0x587   : > { %3364 = vperm.xlu2 %4261, %v3361_v45  }
 0x588   : > { %v2331_v5 = vmax.f32 %v2308_v39, 0.0 }
 0x597   : > { %v3226_v12 = vpop.f32.mrf.mxu2 }
 0x598   : > { %v3227_v33 = vadd.f32 %v7003_v21, %v3226_v12 }
 0x59a   : > { %v3254_v1 = vmax.f32 %v3227_v33, 0.0 }
 0x59c   : > { %v4244_v38 = vpack.i.bf16 %v2329_v29, %v3254_v1 }
 0x59e   : > { %4245 = vxpose.xlu1.b32.cont [11/16] (narrow) %v4244_v38, 8 }
 0x5b9   : > { %v3229_v34 = vpop.f32.mrf.mxu2 }
 0x5ba   : > { %v3230_v36 = vadd.f32 %v7003_v21, %v3229_v34 }
 0x5bc   : > { %v3255_v46 = vmax.f32 %v3230_v36, 0.0 }
 0x5be   : > { %v4246_v6 = vpack.i.bf16 %v2330_v20, %v3255_v46 }
 0x5c0   : > { %4247 = vxpose.xlu1.b32.cont [12/16] (narrow) %v4246_v6, 8 }
 0x5c7   : > { %v3235_v41 = vpop.f32.mrf.mxu3 }
 0x5c8   : > { %v3236_v58 = vadd.f32 %v7003_v21, %v3235_v41 }
 0x5ca   : > { %v3257_v49 = vmax.f32 %v3236_v58, 0.0 }
 0x5cc   : > { %v4250_v37 = vpack.i.bf16 %v2332_v2, %v3257_v49 }
 0x5d8   : > { %v3303_v44 = vpop.permute.xlu2 %3302 }
 0x5e2   : > { %v3238_v47 = vpop.f32.mrf.mxu3 }
 0x5e3   : > { %v3239_v22 = vadd.f32 %v7003_v21, %v3238_v47 }
 0x5e5   : > { %v3258_v60 = vmax.f32 %v3239_v22, 0.0 }
 0x5e7   : > { %v4252_v24 = vpack.i.bf16 %v2333_v13, %v3258_v60 }
 0x5ef   : > { %v3232_v27 = vpop.f32.mrf.mxu2 }
 0x5f0   : > { %v3233_v51 = vadd.f32 %v7003_v21, %v3232_v27  ;;  %v3308_v53 = vpop.permute.xlu0 %3307 }
 0x5f2   : > { %v3256_v15 = vmax.f32 %v3233_v51, 0.0 }
 0x5f4   : > { %v4248_v11 = vpack.i.bf16 %v2331_v5, %v3256_v15 }
 0x5f6   : > { %4249 = vxpose.xlu1.b32.cont [13/16] (narrow) %v4248_v11, 8 }
 0x5fe   : > { %4251 = vxpose.xlu1.b32.cont [14/16] (narrow) %v4250_v37, 8 }
 0x606   : > { %4253 = vxpose.xlu1.b32.cont [15/16] (narrow) %v4252_v24, 8 }
 0x608   : > { %v3241_v26 = vpop.f32.mrf.mxu3 }
 0x609   : > { %v3242_v18 = vadd.f32 %v7003_v21, %v3241_v26 }
 0x60b   : > { %v3259_v28 = vmax.f32 %v3242_v18, 0.0 }
 0x60d   : > { %v4254_v30 = vpack.i.bf16 %v2334_v48, %v3259_v28 }
 0x60f   : > { %4255 = vxpose.xlu1.b32.end [16/16] (narrow) %v4254_v30, 8 }
 0x63b   : > { %v4256_v21 = vpop.trf.xlu1 }
 0x63c   : > { %v4257_v56 = vunpack.i.l.bf16 %v4256_v21  ;;  %v4260_v19 = vunpack.i.h.bf16 %v4256_v21 }
 0x63e   : > { %3329 = vmatpush.msrb.mxu3 %v4257_v56 }
 0x640   : > { %3330 = vmatpush.msrb.mxu3 %v4260_v19 }
 0x642   : > { %3331 = vmatpush.msrb.mxu3 %v7807_v55 }
 0x643   : > { %4105 = vmatmul.msk.f32.vlgmr.msrb.gmra.mxu3 %vm1175_vm5, %v3293_v3 }
 0x64b   : > { %4106 = vmatmul.msk.f32.gmra.mxu3 %vm1175_vm5, %v3294_v8 }
 0x6c6   : > { %v3333_v42 = vpop.f32.mrf.mxu3 }
 0x6c7   : > { %v3334_v23 = vadd.f32 %v3333_v42, %v3303_v44 }
 0x6c9   : > { %v4107_v62 = vmul.f32 -1.442695, %v3334_v23  ;;  %v3358_v40 = vmax.f32 %v3334_v23, 0.0 }
 0x6cb   : > { %4266 = vpow2.f32 %v4107_v62  ;;  %v3370_v0 = vrot.slane %v3358_v40, 5 }
 0x6ce   : > { %v3336_v63 = vpop.f32.mrf.mxu3 }
 0x6cf   : > { %v3337_v4 = vadd.f32 %v3336_v63, %v3308_v53 }
 0x6d1   : > { %v4267_v9 = vpop.eup %4266  ;;  %v3359_v7 = vmax.f32 %v3337_v4, 0.0 }
 0x6d2   : > { %v3342_v35 = vadd.f32 1.0, %v4267_v9 }
 0x6d3   : > { %v3371_v25 = vrot.slane %v3359_v7, 5 }
 0x6d4   : > { %4268 = vrcp.f32 %v3342_v35  ;;  %v3354_v38 = vand.u32 2147483648, %v3342_v35  ;;  %v3352_v50 = vand.u32 2147483647, %v3342_v35  ;;  %vm3348_vm12 = vweird.f32 %v3342_v35 }
 0x6d5   : > { %v3372_v12 = vsel %vm3369_vm10, %v3370_v0, %v3371_v25 }
 0x6d6   : > { %3392 = vmatpush.msra.mxu3 %v3372_v12  ;;  %v3355_v36 = vor.u32 1.1754944e-38, %v3354_v38  ;;  %vm3353_vm14 = vcmp.eq.f32.partialorder %v3352_v50, 8.507059e+37 }
 0x6d7   : > { %4108 = vmatmul.msk.f32.vlgmr.msra.gmra.mxu3 %vm1107_vm3, %v3360_v57 }
 0x6da   : > { %v4269_v33 = vpop.eup %4268 }
 0x6db   : > { %v3344_v29 = vmul.f32 %v4269_v33, %v3342_v35  ;;  %vm3349_vm11 = vweird.f32 %v4269_v33 }
 0x6dc   : > { %vm3350_vm13 = vmor %vm3348_vm12, %vm3349_vm11 }
 0x6dd   : > { %v3345_v1 = vsub.f32 1.0, %v3344_v29 }
 0x6df   : > { %v3346_v59 = vmul.f32 %v4269_v33, %v3345_v1 }
 0x6e1   : > { %v3347_v34 = vadd.f32 %v4269_v33, %v3346_v59 }
 0x6e3   : > { %v3351_v20 = vsel %vm3350_vm13, %v4269_v33, %v3347_v34 }
 0x6e4   : > { %v3356_v46 = vsel %vm3353_vm14, %v3355_v36, %v3351_v20 }
 0x6e5   : > { %v3400_v6 = vsub.f32 1.0, %v3356_v46  ;;  %3413 = vst [vmem:[%s7438_s0] sm:$0x1] %v3356_v46  ;;  %v3398_v52 = vperm.slane %v3356_v46, 0 }
 0x6e7   : > { %v3401_v17 = vperm.slane %v3400_v6, 0  ;;  %v3399_v39 = vmul.f32 %v3398_v52, %v3334_v23 }
 0x6e9   : > { %v3402_v14 = vmul.f32 %v3401_v17, %v3397_v16 }
 0x6eb   : > { %v3404_v27 = vrot.slane %v3402_v14, 7 }
 0x6ed   : > { %v3406_v51 = vadd.f32 %v3404_v27, %v3399_v39 }
 0x6ef   : > { %3407 = vst [vmem:[%s397_s25 - $0x1] sm:$0x1e] %v3406_v51 }
 0x6f0   : > { %4314 = shalt.err (!%p4311_p7)
}
 0x6f1   : > { %4134 = dma.vmem_to_hbm [thread:$0]  (%p4560_p3), %s3439_s19, 64, %s3441_s24, %s3415_s30   ;;  %v3365_v41 = vpop.permute.xlu2 %3364 }
 0x6f2   : > { %s3452_s21 = scalar_lea.hbm %s7391_s9, %s4112_s29  ;;  %s3467_s11 = scalar_lea.hbm %s7392_s10, %s7274_s28 }
 0x6f3   : > { %s7809_s18 = sadd.s32 4294967295, %s4441_s20   ;;  %s404_s0 = scalar_lea.vmem [#allocation5], %s3655_s16 }
 0x6f4   : > { %s7313_s15 = sand.u32 1, %s7809_s18   ;;  %s3454_s1 = sshll.u32 %s404_s0, 4  ;;  %s3455_s1 = int_to_ptr.vmem [resolvable:$true] %s3454_s1 }
 0x6f5   : > { %s3456_s19 = sshll.u32 %s3452_s21, 4  ;;  %s7810_s24 = scalar_lea.vmem [#allocation7], %s7271_s22  ;;  %s3457_s19 = int_to_ptr.hbm [resolvable:$true] %s3456_s19 }
 0x6f6   : > { %s7319_s30 = sshll.u32 %s7810_s24, 4  ;;  %s7321_s29 = sshll.u32 %s3467_s11, 4  ;;  %s3470_s30 = int_to_ptr.vmem [resolvable:$true] %s7319_s30  ;;  %s3472_s29 = int_to_ptr.hbm [resolvable:$true] %s7321_s29 }
 0x6f7   : > { %s3420_s28 = scalar_lea.sflag [#allocation6], %s7313_s15  ;;  %s4329_s25 = sshra.s32 %s3457_s19, 4  ;;  %s4330_s25 = int_to_ptr.hbm [resolvable:$true] %s4329_s25 }
 0x6f8   : > { %s4331_s16 = scalar_lea.hbm %s4330_s25, 4  ;;  %s4335_s21 = scalar_lea.hbm %s7391_s9, 16 }
 0x6f9   : > { %p4332_p9 = scmp.ne.s32.totalorder %s4330_s25, %s4331_s16  ;;  %p4336_p12 = scmp.lt.s32.totalorder %s4330_s25, %s7391_s9 }
 0x6fa   : > { %p4337_p13 = scmp.lt.s32.totalorder %s4335_s21, %s4331_s16 }
 0x6fb   : > { %p4333_p10 = pnand %p4332_p9, %p4560_p3 }
 0x6fc   : > { %p4338_p0 = por %p4337_p13, %p4336_p12 }
 0x6fd   : > { %p4334_p11 = pneg %p4333_p10 }
 0x6ff   : > { %p4339_p1 = pnand %p4338_p0, %p4334_p11 }
 0x75a   : > { %v3394_v5 = vpop.f32.mrf.mxu3 }
 0x75b   : > { %v3395_v15 = vadd.f32 %v3394_v5, %v3365_v41 }
 0x75d   : > { %v3409_v58 = vrot.slane %v3395_v15, 7 }
 0x75f   : > { %v3411_v11 = vadd.f32 %v3409_v58, %v3406_v51 }
 0x761   : > { %3412 = vst [vmem:[%s404_s0 - $0x1] sm:$0x1e] %v3411_v11 }
 0x762   : > { %4342 = shalt.err (!%p4339_p1)
}
 0x763   : > { %4135 = dma.vmem_to_hbm [thread:$0]  (%p4560_p3), %s3455_s1, 64, %s3457_s19, %s3420_s28  }
 0x764   : > { %s4357_s0 = sshra.s32 %s3472_s29, 4  ;;  %s4363_s24 = scalar_lea.hbm %s7392_s10, 4  ;;  %s4358_s0 = int_to_ptr.hbm [resolvable:$true] %s4357_s0 }
 0x765   : > { %s4359_s11 = scalar_lea.hbm %s4358_s0, 1  ;;  %p4364_p6 = scmp.lt.s32.totalorder %s4358_s0, %s7392_s10 }
 0x766   : > { %p4360_p2 = scmp.ne.s32.totalorder %s4358_s0, %s4359_s11  ;;  %p4365_p7 = scmp.lt.s32.totalorder %s4363_s24, %s4359_s11 }
 0x768   : > { %p4361_p4 = pnand %p4360_p2, %p4560_p3  ;;  %p4366_p9 = por %p4365_p7, %p4364_p6 }
 0x76a   : > { %p4362_p5 = pneg %p4361_p4 }
 0x76c   : > { %p4367_p10 = pnand %p4366_p9, %p4362_p5 }
 0x76e   : > { %4370 = shalt.err (!%p4367_p10)
}
 0x76f   : > { %4136 = dma.vmem_to_hbm [thread:$0]  (%p4560_p3), %s3470_s30, 16, %s3472_s29, %s3420_s28  }
 0x770 PF: > { %p4150_p11 = scmp.ge.s32.totalorder %s4441_s20, 2  ;;  %s3483_s1 = sand.u32 1, %s4413_s13  }
 0x771   : > { %s3484_s19 = scalar_lea.sflag [#allocation4], %s3483_s1 }
 0x772   : > { %p4141_p12 = pnand %p4150_p11, %p4571_p8 }
 0x774   : > { %p4142_p13 = pneg %p4141_p12 }
 0x776   : > { %4404 = dma.done.wait (%p4142_p13), %s3484_s19, 64  }
 0x777   : > { %4406 = vsyncadd (%p4142_p13), %s3484_s19, 4294967232  ;;  %s7811_s22 = sadd.s32 4294967294, %s4441_s20  }
 0x778   : > { %s3493_s26 = sand.u32 1, %s7811_s22  }
 0x779   : > { %s3494_s12 = scalar_lea.sflag [#allocation6], %s3493_s26 }
 0x77a   : > { %4408 = dma.done.wait (%p4142_p13), %s3494_s12, 80  }
 0x77b   : > { %4410 = vsyncadd (%p4142_p13), %s3494_s12, 4294967216  ;;  %s27_s20 = sadd.s32 1, %s4441_s20   ;;  %s7812_s30 = sld [smem:[#allocation10_spill]] }
 0x77c   : > { %p24_p3 = scmp.ge.s32.totalorder %s27_s20, 6   ;;  %s7813_s15 = sld [smem:[#allocation15_spill]] }
 0x77d   : > { %s7814_s16 = sld [smem:[#allocation11_spill]]  ;;  %s7818_s13 = smov %s4417_s14 }
 0x77e   : > { %s7815_s17 = sld [smem:[#allocation12_spill]]  ;;  %26 = sbr.rel (!%p24_p3) target bundleno = 10 (0xa), region = 133 }
 0x77f   : > { %s7816_s18 = sld [smem:[#allocation13_spill]] }
 0x780   : > { %s7817_s19 = sld [smem:[#allocation14_spill]] }
 0x781   : > { %s7819_s14 = smov %s7812_s30 }
 0x783   :  { %3509 = vsyncpa [#allocation4], 1 }
 0x784   :  { %3511 = vsyncpa [#allocation4 + $0x1], 1 }
 0x785   :  { %3512 = vsyncpa [#allocation6], 1 }
 0x786   :  { %3514 = vsyncpa [#allocation6 + $0x1], 1 }

</bundles_post_ra>
